<compile_context>
chip_gen: v7x
topology: tpu7x:2x2x1
jax: 0.10.0
libtpu: 0.0.40
codegen_flags: <defaults>
</compile_context>

<pallas_src>
import functools
import numpy as np
import jax
import jax.numpy as jnp
from jax.experimental import pallas as pl
from jax.experimental.pallas import tpu as pltpu


# ---------------------------- Fused Pallas kernel ----------------------------

def _bt_kernel(xf_ref, xq_ref, w1_ref, s1_ref, b1_ref,
               wq_ref, bq_ref, wk_ref, bk_ref, wv_ref, bv_ref,
               o_ref, k_s, v_s, *, heads, d):
    """One grid step = (batch b, query tile qi).

    Shapes (channels on sublanes, spatial pixels on lanes):
      xf_ref : (1, C, HW)  full image of batch b (for K/V)
      xq_ref : (1, C, T)   query/residual pixel tile
      w1_ref : (C, C)      cv1 1x1 conv weight (out, in); s1/b1: folded BN (C,1)
      wq/wk/wv : (C, C), bq/bk/bv : (C, 1)   MHSA 1x1 convs (with bias)
      o_ref  : (1, C, T)
      k_s/v_s: (C, HW) f32 VMEM scratch, persistent across query tiles
    """
    # ---- once per batch element: K/V over the full image into VMEM scratch ----
    @pl.when(pl.program_id(1) == 0)
    def _init_kv():
        xb = xf_ref[0].astype(jnp.float32)                                # (C, HW)
        y = jnp.dot(w1_ref[...], xb, preferred_element_type=jnp.float32)  # cv1
        y = y * s1_ref[...] + b1_ref[...]                                 # folded BN
        y = y * jax.nn.sigmoid(y)                                         # SiLU
        k_s[...] = jnp.dot(wk_ref[...], y,
                           preferred_element_type=jnp.float32) + bk_ref[...]
        v_s[...] = jnp.dot(wv_ref[...], y,
                           preferred_element_type=jnp.float32) + bv_ref[...]

    # ---- query tile: cv1 -> q projection (cheap recompute on the tile) ----
    xq = xq_ref[0].astype(jnp.float32)                                    # (C, T)
    yq = jnp.dot(w1_ref[...], xq, preferred_element_type=jnp.float32)
    yq = yq * s1_ref[...] + b1_ref[...]
    yq = yq * jax.nn.sigmoid(yq)
    q = jnp.dot(wq_ref[...], yq,
                preferred_element_type=jnp.float32) + bq_ref[...]         # (C, T)

    # ---- per-head attention (heads is small & static: unrolled) ----
    outs = []
    for h in range(heads):
        sl = slice(h * d, (h + 1) * d)
        qh = q[sl, :]                     # (d, T)
        kh = k_s[sl, :]                   # (d, HW)
        vh = v_s[sl, :]                   # (d, HW)
        # energy[i, j] = q_i . k_j   -> (T, HW)
        e = jax.lax.dot_general(qh, kh, (((0,), (0,)), ((), ())),
                                preferred_element_type=jnp.float32)
        e = e - jnp.max(e, axis=-1, keepdims=True)
        p = jnp.exp(e)
        p = p / jnp.sum(p, axis=-1, keepdims=True)                        # softmax(keys)
        # out[c, i] = sum_j v[c, j] * p[i, j]   -> (d, T)
        oh = jax.lax.dot_general(vh, p, (((1,), (1,)), ((), ())),
                                 preferred_element_type=jnp.float32)
        outs.append(oh)
    attn = jnp.concatenate(outs, axis=0)                                  # (C, T)

    # ---- residual add + single lane-dense store ----
    o_ref[0] = (attn + xq).astype(o_ref.dtype)


# ---------------------------- Wrapper ----------------------------

def bottleneck_transformer_fwd(x_nchw, p, heads):
    """x_nchw: (N, C, H, W) float32.  Returns (N, C, H, W)."""
    N, C, H, W = x_nchw.shape
    assert C % heads == 0, "C must be divisible by heads"
    d = C // heads
    HW = H * W
    x = x_nchw.reshape(N, C, HW)           # NCHW kept native; pixels -> lanes
    T = 128 if HW % 128 == 0 else HW       # query tile (lane-dense when possible)
    n_qt = HW // T

    kernel = functools.partial(_bt_kernel, heads=heads, d=d)
    full = pl.BlockSpec((C, C), lambda b, qi: (0, 0))
    col = pl.BlockSpec((C, 1), lambda b, qi: (0, 0))

    out = pl.pallas_call(
        kernel,
        out_shape=jax.ShapeDtypeStruct((N, C, HW), x.dtype),
        grid_spec=pltpu.PrefetchScalarGridSpec(
            num_scalar_prefetch=0,
            grid=(N, n_qt),
            in_specs=[
                pl.BlockSpec((1, C, HW), lambda b, qi: (b, 0, 0)),  # full image (K/V)
                pl.BlockSpec((1, C, T), lambda b, qi: (b, 0, qi)),  # query/residual tile
                full,   # w1
                col,    # s1 (folded BN scale)
                col,    # b1 (folded BN bias)
                full,   # wq
                col,    # bq
                full,   # wk
                col,    # bk
                full,   # wv
                col,    # bv
            ],
            out_specs=pl.BlockSpec((1, C, T), lambda b, qi: (b, 0, qi)),
            scratch_shapes=[pltpu.VMEM((C, HW), jnp.float32),   # K
                            pltpu.VMEM((C, HW), jnp.float32)],  # V
        ),
        compiler_params=pltpu.CompilerParams(
            dimension_semantics=("parallel", "arbitrary")),
    )(x, x, p['w1'], p['s1'], p['b1'], p['wq'], p['bq'],
      p['wk'], p['bk'], p['wv'], p['bv'])
    return out.reshape(N, C, H, W)


# ---------------------------- Pure-JAX reference ----------------------------

def ref_forward(x_nchw, p, heads):
    N, C, H, W = x_nchw.shape
    HW = H * W
    d = C // heads
    hp = jax.lax.Precision.HIGHEST
    xf = x_nchw.reshape(N, C, HW)
    # cv1: 1x1 conv + folded BN + SiLU
    y = jnp.einsum('oc,ncp->nop', p['w1'], xf, precision=hp)
    y = y * p['s1'][None] + p['b1'][None]
    y = y * jax.nn.sigmoid(y)
    # MHSA
    q = jnp.einsum('oc,ncp->nop', p['wq'], y, precision=hp) + p['bq'][None]
    k = jnp.einsum('oc,ncp->nop', p['wk'], y, precision=hp) + p['bk'][None]
    v = jnp.einsum('oc,ncp->nop', p['wv'], y, precision=hp) + p['bv'][None]
    q = q.reshape(N, heads, d, HW)
    k = k.reshape(N, heads, d, HW)
    v = v.reshape(N, heads, d, HW)
    e = jnp.einsum('nhdi,nhdj->nhij', q, k, precision=hp)
    a = jax.nn.softmax(e, axis=-1)
    o = jnp.einsum('nhdj,nhij->nhdi', v, a, precision=hp).reshape(N, C, HW)
    return (xf + o).reshape(N, C, H, W)


# ---------------------------- Deterministic init ----------------------------

def init_params(key, c):
    ks = jax.random.split(key, 8)
    # cv1: conv weight (no bias) + BatchNorm folded to (scale, bias)
    w1 = jax.random.normal(ks[0], (c, c), jnp.float32) / np.sqrt(c)
    gamma = 1.0 + 0.1 * jax.random.normal(ks[1], (c,), jnp.float32)
    beta = 0.1 * jax.random.normal(ks[2], (c,), jnp.float32)
    mean = 0.1 * jax.random.normal(ks[3], (c,), jnp.float32)
    var = 1.0 + 0.1 * jnp.abs(jax.random.normal(ks[4], (c,), jnp.float32))
    inv = gamma / jnp.sqrt(var + 1e-5)
    s1 = inv.reshape(c, 1)
    b1 = (beta - mean * inv).reshape(c, 1)

    def qkv(k_):
        kw, kb = jax.random.split(k_)
        w = jax.random.normal(kw, (c, c), jnp.float32) / np.sqrt(c)
        b = (0.1 * jax.random.normal(kb, (c,), jnp.float32)).reshape(c, 1)
        return w, b

    wq, bq = qkv(ks[5])
    wk, bk = qkv(ks[6])
    wv, bv = qkv(ks[7])
    return dict(w1=w1, s1=s1, b1=b1, wq=wq, bq=bq, wk=wk, bk=bk, wv=wv, bv=bv)


# ---------------------------- Main ----------------------------

if __name__ == "__main__":
    root = jax.random.PRNGKey(0)
    configs = [
        # (c, H, W, heads)  -- c1 == c2 == c, stride=1, expansion=1, mhsa=True
        (32, 16, 16, 4),    # HW=256 -> two query tiles of 128, grid (2, 2)
        (64, 8, 8, 8),      # HW=64  -> single query tile,      grid (2, 1)
    ]
    for idx, (c, H, W, heads) in enumerate(configs):
        kp, kx = jax.random.split(jax.random.fold_in(root, idx))
        params = init_params(kp, c)
        x = jax.random.normal(kx, (2, c, H, W), jnp.float32)   # NCHW input

        out = bottleneck_transformer_fwd(x, params, heads)
        out = jax.block_until_ready(out)

        ref = ref_forward(x, params, heads)
        assert out.shape == (2, c, H, W), out.shape
        err = float(jnp.max(jnp.abs(out - ref)))
        assert err < 5e-3, f"config {idx}: mismatch vs reference, max abs err = {err}"
    print("KERNEL_OK")
</pallas_src>

<mosaic_0001>
module attributes {stable_mosaic.version = 11 : i64} {
  func.func @_bt_kernel(%arg0: i32, %arg1: i32, %arg2: memref<1x32x256xf32, #tpu.memory_space<vmem>>, %arg3: memref<1x32x128xf32, #tpu.memory_space<vmem>>, %arg4: memref<32x32xf32, #tpu.memory_space<vmem>>, %arg5: memref<32x1xf32, #tpu.memory_space<vmem>>, %arg6: memref<32x1xf32, #tpu.memory_space<vmem>>, %arg7: memref<32x32xf32, #tpu.memory_space<vmem>>, %arg8: memref<32x1xf32, #tpu.memory_space<vmem>>, %arg9: memref<32x32xf32, #tpu.memory_space<vmem>>, %arg10: memref<32x1xf32, #tpu.memory_space<vmem>>, %arg11: memref<32x32xf32, #tpu.memory_space<vmem>>, %arg12: memref<32x1xf32, #tpu.memory_space<vmem>>, %arg13: memref<1x32x128xf32, #tpu.memory_space<vmem>>, %arg14: memref<32x256xf32, #tpu.memory_space<vmem>>, %arg15: memref<32x256xf32, #tpu.memory_space<vmem>>) attributes {dimension_semantics = [#tpu.dimension_semantics<parallel>, #tpu.dimension_semantics<arbitrary>], iteration_bounds = array<i64: 2, 2>, scalar_prefetch = 0 : i64, scratch_operands = 2 : i64, tpu.core_type = #tpu.core_type<tc>, window_params = [{transform_indices = @transform_0, window_bounds = array<i64: 1, 32, 256>}, {transform_indices = @transform_1, window_bounds = array<i64: 1, 32, 128>}, {pipeline_mode = #tpu.pipeline_mode<synchronous>, transform_indices = @transform_2, window_bounds = array<i64: 32, 32>}, {pipeline_mode = #tpu.pipeline_mode<synchronous>, transform_indices = @transform_3, window_bounds = array<i64: 32, 1>}, {pipeline_mode = #tpu.pipeline_mode<synchronous>, transform_indices = @transform_4, window_bounds = array<i64: 32, 1>}, {pipeline_mode = #tpu.pipeline_mode<synchronous>, transform_indices = @transform_5, window_bounds = array<i64: 32, 32>}, {pipeline_mode = #tpu.pipeline_mode<synchronous>, transform_indices = @transform_6, window_bounds = array<i64: 32, 1>}, {pipeline_mode = #tpu.pipeline_mode<synchronous>, transform_indices = @transform_7, window_bounds = array<i64: 32, 32>}, {pipeline_mode = #tpu.pipeline_mode<synchronous>, transform_indices = @transform_8, window_bounds = array<i64: 32, 1>}, {pipeline_mode = #tpu.pipeline_mode<synchronous>, transform_indices = @transform_9, window_bounds = array<i64: 32, 32>}, {pipeline_mode = #tpu.pipeline_mode<synchronous>, transform_indices = @transform_10, window_bounds = array<i64: 32, 1>}, {transform_indices = @transform_11, window_bounds = array<i64: 1, 32, 128>}]} {
    %c0_i32 = arith.constant 0 : i32
    %0 = arith.cmpi eq, %arg1, %c0_i32 : i32
    %1 = arith.extui %0 : i1 to i32
    %c0_i32_0 = arith.constant 0 : i32
    %2 = arith.cmpi ne, %1, %c0_i32_0 : i32
    scf.if %2 {
      %c0_47 = arith.constant 0 : index
      %c0_48 = arith.constant 0 : index
      %c0_49 = arith.constant 0 : index
      %85 = vector.load %arg2[%c0_47, %c0_48, %c0_49] : memref<1x32x256xf32, #tpu.memory_space<vmem>>, vector<1x32x256xf32>
      %86 = vector.shape_cast %85 : vector<1x32x256xf32> to vector<32x256xf32>
      %c0_50 = arith.constant 0 : index
      %c0_51 = arith.constant 0 : index
      %87 = vector.load %arg4[%c0_50, %c0_51] : memref<32x32xf32, #tpu.memory_space<vmem>>, vector<32x32xf32>
      %cst_52 = arith.constant dense<0.000000e+00> : vector<32x256xf32>
      %88 = tpu.matmul %87, %86, %cst_52 {dimension_numbers = #tpu.dot_dimension_numbers<[1], [0], [0], [1], [0, 0, 1, 1], [], []>} : vector<32x32xf32>, vector<32x256xf32>, vector<32x256xf32> -> vector<32x256xf32>
      %c0_53 = arith.constant 0 : index
      %c0_54 = arith.constant 0 : index
      %89 = vector.load %arg5[%c0_53, %c0_54] : memref<32x1xf32, #tpu.memory_space<vmem>>, vector<32x1xf32>
      %90 = vector.broadcast %89 : vector<32x1xf32> to vector<32x256xf32>
      %91 = arith.mulf %88, %90 : vector<32x256xf32>
      %c0_55 = arith.constant 0 : index
      %c0_56 = arith.constant 0 : index
      %92 = vector.load %arg6[%c0_55, %c0_56] : memref<32x1xf32, #tpu.memory_space<vmem>>, vector<32x1xf32>
      %93 = vector.broadcast %92 : vector<32x1xf32> to vector<32x256xf32>
      %94 = arith.addf %91, %93 : vector<32x256xf32>
      %95 = arith.negf %94 : vector<32x256xf32>
      %96 = math.exp %95 : vector<32x256xf32>
      %cst_57 = arith.constant 1.000000e+00 : f32
      %97 = vector.broadcast %cst_57 : f32 to vector<32x256xf32>
      %98 = arith.addf %97, %96 : vector<32x256xf32>
      %99 = arith.divf %97, %98 : vector<32x256xf32>
      %100 = arith.mulf %94, %99 : vector<32x256xf32>
      %c0_58 = arith.constant 0 : index
      %c0_59 = arith.constant 0 : index
      %101 = vector.load %arg9[%c0_58, %c0_59] : memref<32x32xf32, #tpu.memory_space<vmem>>, vector<32x32xf32>
      %cst_60 = arith.constant dense<0.000000e+00> : vector<32x256xf32>
      %102 = tpu.matmul %101, %100, %cst_60 {dimension_numbers = #tpu.dot_dimension_numbers<[1], [0], [0], [1], [0, 0, 1, 1], [], []>} : vector<32x32xf32>, vector<32x256xf32>, vector<32x256xf32> -> vector<32x256xf32>
      %c0_61 = arith.constant 0 : index
      %c0_62 = arith.constant 0 : index
      %103 = vector.load %arg10[%c0_61, %c0_62] : memref<32x1xf32, #tpu.memory_space<vmem>>, vector<32x1xf32>
      %104 = vector.broadcast %103 : vector<32x1xf32> to vector<32x256xf32>
      %105 = arith.addf %102, %104 : vector<32x256xf32>
      %c0_63 = arith.constant 0 : index
      %c0_64 = arith.constant 0 : index
      %106 = vector.load %arg14[%c0_63, %c0_64] : memref<32x256xf32, #tpu.memory_space<vmem>>, vector<32x256xf32>
      tpu.vector_store %arg14[%c0_63, %c0_64], %105 {strides = array<i32>} : memref<32x256xf32, #tpu.memory_space<vmem>>, vector<32x256xf32>,
      %c0_65 = arith.constant 0 : index
      %c0_66 = arith.constant 0 : index
      %107 = vector.load %arg11[%c0_65, %c0_66] : memref<32x32xf32, #tpu.memory_space<vmem>>, vector<32x32xf32>
      %cst_67 = arith.constant dense<0.000000e+00> : vector<32x256xf32>
      %108 = tpu.matmul %107, %100, %cst_67 {dimension_numbers = #tpu.dot_dimension_numbers<[1], [0], [0], [1], [0, 0, 1, 1], [], []>} : vector<32x32xf32>, vector<32x256xf32>, vector<32x256xf32> -> vector<32x256xf32>
      %c0_68 = arith.constant 0 : index
      %c0_69 = arith.constant 0 : index
      %109 = vector.load %arg12[%c0_68, %c0_69] : memref<32x1xf32, #tpu.memory_space<vmem>>, vector<32x1xf32>
      %110 = vector.broadcast %109 : vector<32x1xf32> to vector<32x256xf32>
      %111 = arith.addf %108, %110 : vector<32x256xf32>
      %c0_70 = arith.constant 0 : index
      %c0_71 = arith.constant 0 : index
      %112 = vector.load %arg15[%c0_70, %c0_71] : memref<32x256xf32, #tpu.memory_space<vmem>>, vector<32x256xf32>
      tpu.vector_store %arg15[%c0_70, %c0_71], %111 {strides = array<i32>} : memref<32x256xf32, #tpu.memory_space<vmem>>, vector<32x256xf32>,
    } else {
    }
    %c0 = arith.constant 0 : index
    %c0_1 = arith.constant 0 : index
    %c0_2 = arith.constant 0 : index
    %3 = vector.load %arg3[%c0, %c0_1, %c0_2] : memref<1x32x128xf32, #tpu.memory_space<vmem>>, vector<1x32x128xf32>
    %4 = vector.shape_cast %3 : vector<1x32x128xf32> to vector<32x128xf32>
    %c0_3 = arith.constant 0 : index
    %c0_4 = arith.constant 0 : index
    %5 = vector.load %arg4[%c0_3, %c0_4] : memref<32x32xf32, #tpu.memory_space<vmem>>, vector<32x32xf32>
    %cst = arith.constant dense<0.000000e+00> : vector<32x128xf32>
    %6 = tpu.matmul %5, %4, %cst {dimension_numbers = #tpu.dot_dimension_numbers<[1], [0], [0], [1], [0, 0, 1, 1], [], []>} : vector<32x32xf32>, vector<32x128xf32>, vector<32x128xf32> -> vector<32x128xf32>
    %c0_5 = arith.constant 0 : index
    %c0_6 = arith.constant 0 : index
    %7 = vector.load %arg5[%c0_5, %c0_6] : memref<32x1xf32, #tpu.memory_space<vmem>>, vector<32x1xf32>
    %8 = vector.broadcast %7 : vector<32x1xf32> to vector<32x128xf32>
    %9 = arith.mulf %6, %8 : vector<32x128xf32>
    %c0_7 = arith.constant 0 : index
    %c0_8 = arith.constant 0 : index
    %10 = vector.load %arg6[%c0_7, %c0_8] : memref<32x1xf32, #tpu.memory_space<vmem>>, vector<32x1xf32>
    %11 = vector.broadcast %10 : vector<32x1xf32> to vector<32x128xf32>
    %12 = arith.addf %9, %11 : vector<32x128xf32>
    %13 = arith.negf %12 : vector<32x128xf32>
    %14 = math.exp %13 : vector<32x128xf32>
    %cst_9 = arith.constant 1.000000e+00 : f32
    %15 = vector.broadcast %cst_9 : f32 to vector<32x128xf32>
    %16 = arith.addf %15, %14 : vector<32x128xf32>
    %17 = arith.divf %15, %16 : vector<32x128xf32>
    %18 = arith.mulf %12, %17 : vector<32x128xf32>
    %c0_10 = arith.constant 0 : index
    %c0_11 = arith.constant 0 : index
    %19 = vector.load %arg7[%c0_10, %c0_11] : memref<32x32xf32, #tpu.memory_space<vmem>>, vector<32x32xf32>
    %cst_12 = arith.constant dense<0.000000e+00> : vector<32x128xf32>
    %20 = tpu.matmul %19, %18, %cst_12 {dimension_numbers = #tpu.dot_dimension_numbers<[1], [0], [0], [1], [0, 0, 1, 1], [], []>} : vector<32x32xf32>, vector<32x128xf32>, vector<32x128xf32> -> vector<32x128xf32>
    %c0_13 = arith.constant 0 : index
    %c0_14 = arith.constant 0 : index
    %21 = vector.load %arg8[%c0_13, %c0_14] : memref<32x1xf32, #tpu.memory_space<vmem>>, vector<32x1xf32>
    %22 = vector.broadcast %21 : vector<32x1xf32> to vector<32x128xf32>
    %23 = arith.addf %20, %22 : vector<32x128xf32>
    %24 = vector.extract_strided_slice %23 {offsets = [0, 0], sizes = [8, 128], strides = [1, 1]} : vector<32x128xf32> to vector<8x128xf32>
    %c0_15 = arith.constant 0 : index
    %c0_16 = arith.constant 0 : index
    %25 = vector.load %arg14[%c0_15, %c0_16] : memref<32x256xf32, #tpu.memory_space<vmem>>, vector<8x256xf32>
    %c0_17 = arith.constant 0 : index
    %c0_18 = arith.constant 0 : index
    %26 = vector.load %arg15[%c0_17, %c0_18] : memref<32x256xf32, #tpu.memory_space<vmem>>, vector<8x256xf32>
    %cst_19 = arith.constant dense<0.000000e+00> : vector<128x256xf32>
    %27 = tpu.matmul %24, %25, %cst_19 {dimension_numbers = #tpu.dot_dimension_numbers<[0], [0], [1], [1], [0, 1, 1, 1], [], []>} : vector<8x128xf32>, vector<8x256xf32>, vector<128x256xf32> -> vector<128x256xf32>
    %cst_20 = arith.constant dense<0xFF800000> : vector<128xf32>
    %28 = vector.multi_reduction <maximumf>, %27, %cst_20 [1] : vector<128x256xf32> to vector<128xf32>
    %29 = vector.shape_cast %28 : vector<128xf32> to vector<128x1xf32>
    %30 = vector.broadcast %29 : vector<128x1xf32> to vector<128x256xf32>
    %31 = arith.subf %27, %30 : vector<128x256xf32>
    %32 = math.exp %31 : vector<128x256xf32>
    %cst_21 = arith.constant dense<0.000000e+00> : vector<128xf32>
    %33 = vector.multi_reduction <add>, %32, %cst_21 [1] : vector<128x256xf32> to vector<128xf32>
    %34 = vector.shape_cast %33 : vector<128xf32> to vector<128x1xf32>
    %35 = vector.broadcast %34 : vector<128x1xf32> to vector<128x256xf32>
    %36 = arith.divf %32, %35 : vector<128x256xf32>
    %cst_22 = arith.constant dense<0.000000e+00> : vector<8x128xf32>
    %37 = tpu.matmul %26, %36, %cst_22 {dimension_numbers = #tpu.dot_dimension_numbers<[1], [1], [0], [0], [0, 0, 1, 0], [], []>} : vector<8x256xf32>, vector<128x256xf32>, vector<8x128xf32> -> vector<8x128xf32>
    %38 = vector.extract_strided_slice %23 {offsets = [8, 0], sizes = [8, 128], strides = [1, 1]} : vector<32x128xf32> to vector<8x128xf32>
    %c8 = arith.constant 8 : index
    %c0_23 = arith.constant 0 : index
    %39 = vector.load %arg14[%c8, %c0_23] : memref<32x256xf32, #tpu.memory_space<vmem>>, vector<8x256xf32>
    %c8_24 = arith.constant 8 : index
    %c0_25 = arith.constant 0 : index
    %40 = vector.load %arg15[%c8_24, %c0_25] : memref<32x256xf32, #tpu.memory_space<vmem>>, vector<8x256xf32>
    %cst_26 = arith.constant dense<0.000000e+00> : vector<128x256xf32>
    %41 = tpu.matmul %38, %39, %cst_26 {dimension_numbers = #tpu.dot_dimension_numbers<[0], [0], [1], [1], [0, 1, 1, 1], [], []>} : vector<8x128xf32>, vector<8x256xf32>, vector<128x256xf32> -> vector<128x256xf32>
    %cst_27 = arith.constant dense<0xFF800000> : vector<128xf32>
    %42 = vector.multi_reduction <maximumf>, %41, %cst_27 [1] : vector<128x256xf32> to vector<128xf32>
    %43 = vector.shape_cast %42 : vector<128xf32> to vector<128x1xf32>
    %44 = vector.broadcast %43 : vector<128x1xf32> to vector<128x256xf32>
    %45 = arith.subf %41, %44 : vector<128x256xf32>
    %46 = math.exp %45 : vector<128x256xf32>
    %cst_28 = arith.constant dense<0.000000e+00> : vector<128xf32>
    %47 = vector.multi_reduction <add>, %46, %cst_28 [1] : vector<128x256xf32> to vector<128xf32>
    %48 = vector.shape_cast %47 : vector<128xf32> to vector<128x1xf32>
    %49 = vector.broadcast %48 : vector<128x1xf32> to vector<128x256xf32>
    %50 = arith.divf %46, %49 : vector<128x256xf32>
    %cst_29 = arith.constant dense<0.000000e+00> : vector<8x128xf32>
    %51 = tpu.matmul %40, %50, %cst_29 {dimension_numbers = #tpu.dot_dimension_numbers<[1], [1], [0], [0], [0, 0, 1, 0], [], []>} : vector<8x256xf32>, vector<128x256xf32>, vector<8x128xf32> -> vector<8x128xf32>
    %52 = vector.extract_strided_slice %23 {offsets = [16, 0], sizes = [8, 128], strides = [1, 1]} : vector<32x128xf32> to vector<8x128xf32>
    %c16 = arith.constant 16 : index
    %c0_30 = arith.constant 0 : index
    %53 = vector.load %arg14[%c16, %c0_30] : memref<32x256xf32, #tpu.memory_space<vmem>>, vector<8x256xf32>
    %c16_31 = arith.constant 16 : index
    %c0_32 = arith.constant 0 : index
    %54 = vector.load %arg15[%c16_31, %c0_32] : memref<32x256xf32, #tpu.memory_space<vmem>>, vector<8x256xf32>
    %cst_33 = arith.constant dense<0.000000e+00> : vector<128x256xf32>
    %55 = tpu.matmul %52, %53, %cst_33 {dimension_numbers = #tpu.dot_dimension_numbers<[0], [0], [1], [1], [0, 1, 1, 1], [], []>} : vector<8x128xf32>, vector<8x256xf32>, vector<128x256xf32> -> vector<128x256xf32>
    %cst_34 = arith.constant dense<0xFF800000> : vector<128xf32>
    %56 = vector.multi_reduction <maximumf>, %55, %cst_34 [1] : vector<128x256xf32> to vector<128xf32>
    %57 = vector.shape_cast %56 : vector<128xf32> to vector<128x1xf32>
    %58 = vector.broadcast %57 : vector<128x1xf32> to vector<128x256xf32>
    %59 = arith.subf %55, %58 : vector<128x256xf32>
    %60 = math.exp %59 : vector<128x256xf32>
    %cst_35 = arith.constant dense<0.000000e+00> : vector<128xf32>
    %61 = vector.multi_reduction <add>, %60, %cst_35 [1] : vector<128x256xf32> to vector<128xf32>
    %62 = vector.shape_cast %61 : vector<128xf32> to vector<128x1xf32>
    %63 = vector.broadcast %62 : vector<128x1xf32> to vector<128x256xf32>
    %64 = arith.divf %60, %63 : vector<128x256xf32>
    %cst_36 = arith.constant dense<0.000000e+00> : vector<8x128xf32>
    %65 = tpu.matmul %54, %64, %cst_36 {dimension_numbers = #tpu.dot_dimension_numbers<[1], [1], [0], [0], [0, 0, 1, 0], [], []>} : vector<8x256xf32>, vector<128x256xf32>, vector<8x128xf32> -> vector<8x128xf32>
    %66 = vector.extract_strided_slice %23 {offsets = [24, 0], sizes = [8, 128], strides = [1, 1]} : vector<32x128xf32> to vector<8x128xf32>
    %c24 = arith.constant 24 : index
    %c0_37 = arith.constant 0 : index
    %67 = vector.load %arg14[%c24, %c0_37] : memref<32x256xf32, #tpu.memory_space<vmem>>, vector<8x256xf32>
    %c24_38 = arith.constant 24 : index
    %c0_39 = arith.constant 0 : index
    %68 = vector.load %arg15[%c24_38, %c0_39] : memref<32x256xf32, #tpu.memory_space<vmem>>, vector<8x256xf32>
    %cst_40 = arith.constant dense<0.000000e+00> : vector<128x256xf32>
    %69 = tpu.matmul %66, %67, %cst_40 {dimension_numbers = #tpu.dot_dimension_numbers<[0], [0], [1], [1], [0, 1, 1, 1], [], []>} : vector<8x128xf32>, vector<8x256xf32>, vector<128x256xf32> -> vector<128x256xf32>
    %cst_41 = arith.constant dense<0xFF800000> : vector<128xf32>
    %70 = vector.multi_reduction <maximumf>, %69, %cst_41 [1] : vector<128x256xf32> to vector<128xf32>
    %71 = vector.shape_cast %70 : vector<128xf32> to vector<128x1xf32>
    %72 = vector.broadcast %71 : vector<128x1xf32> to vector<128x256xf32>
    %73 = arith.subf %69, %72 : vector<128x256xf32>
    %74 = math.exp %73 : vector<128x256xf32>
    %cst_42 = arith.constant dense<0.000000e+00> : vector<128xf32>
    %75 = vector.multi_reduction <add>, %74, %cst_42 [1] : vector<128x256xf32> to vector<128xf32>
    %76 = vector.shape_cast %75 : vector<128xf32> to vector<128x1xf32>
    %77 = vector.broadcast %76 : vector<128x1xf32> to vector<128x256xf32>
    %78 = arith.divf %74, %77 : vector<128x256xf32>
    %cst_43 = arith.constant dense<0.000000e+00> : vector<8x128xf32>
    %79 = tpu.matmul %68, %78, %cst_43 {dimension_numbers = #tpu.dot_dimension_numbers<[1], [1], [0], [0], [0, 0, 1, 0], [], []>} : vector<8x256xf32>, vector<128x256xf32>, vector<8x128xf32> -> vector<8x128xf32>
    %80 = tpu.concatenate %37, %51, %65, %79 in 0 : vector<8x128xf32>, vector<8x128xf32>, vector<8x128xf32>, vector<8x128xf32> -> vector<32x128xf32>
    %81 = arith.addf %80, %4 : vector<32x128xf32>
    %c0_44 = arith.constant 0 : index
    %c0_45 = arith.constant 0 : index
    %c0_46 = arith.constant 0 : index
    %82 = vector.load %arg13[%c0_44, %c0_45, %c0_46] : memref<1x32x128xf32, #tpu.memory_space<vmem>>, vector<1x32x128xf32>
    %83 = vector.shape_cast %82 : vector<1x32x128xf32> to vector<32x128xf32>
    %84 = vector.shape_cast %81 : vector<32x128xf32> to vector<1x32x128xf32>
    tpu.vector_store %arg13[%c0_44, %c0_45, %c0_46], %84 {strides = array<i32>} : memref<1x32x128xf32, #tpu.memory_space<vmem>>, vector<1x32x128xf32>,
    return
  }
  func.func @transform_0(%arg0: i32, %arg1: i32) -> (i32, i32, i32) {
    %c0_i32 = arith.constant 0 : i32
    %c0_i32_0 = arith.constant 0 : i32
    %c0_i32_1 = arith.constant 0 : i32
    return %arg0, %c0_i32, %c0_i32_0 : i32, i32, i32
  }
  func.func @transform_1(%arg0: i32, %arg1: i32) -> (i32, i32, i32) {
    %c0_i32 = arith.constant 0 : i32
    %c0_i32_0 = arith.constant 0 : i32
    return %arg0, %c0_i32, %arg1 : i32, i32, i32
  }
  func.func @transform_2(%arg0: i32, %arg1: i32) -> (i32, i32) {
    %c0_i32 = arith.constant 0 : i32
    %c0_i32_0 = arith.constant 0 : i32
    %c0_i32_1 = arith.constant 0 : i32
    return %c0_i32, %c0_i32_0 : i32, i32
  }
  func.func @transform_3(%arg0: i32, %arg1: i32) -> (i32, i32) {
    %c0_i32 = arith.constant 0 : i32
    %c0_i32_0 = arith.constant 0 : i32
    %c0_i32_1 = arith.constant 0 : i32
    return %c0_i32, %c0_i32_0 : i32, i32
  }
  func.func @transform_4(%arg0: i32, %arg1: i32) -> (i32, i32) {
    %c0_i32 = arith.constant 0 : i32
    %c0_i32_0 = arith.constant 0 : i32
    %c0_i32_1 = arith.constant 0 : i32
    return %c0_i32, %c0_i32_0 : i32, i32
  }
  func.func @transform_5(%arg0: i32, %arg1: i32) -> (i32, i32) {
    %c0_i32 = arith.constant 0 : i32
    %c0_i32_0 = arith.constant 0 : i32
    %c0_i32_1 = arith.constant 0 : i32
    return %c0_i32, %c0_i32_0 : i32, i32
  }
  func.func @transform_6(%arg0: i32, %arg1: i32) -> (i32, i32) {
    %c0_i32 = arith.constant 0 : i32
    %c0_i32_0 = arith.constant 0 : i32
    %c0_i32_1 = arith.constant 0 : i32
    return %c0_i32, %c0_i32_0 : i32, i32
  }
  func.func @transform_7(%arg0: i32, %arg1: i32) -> (i32, i32) {
    %c0_i32 = arith.constant 0 : i32
    %c0_i32_0 = arith.constant 0 : i32
    %c0_i32_1 = arith.constant 0 : i32
    return %c0_i32, %c0_i32_0 : i32, i32
  }
  func.func @transform_8(%arg0: i32, %arg1: i32) -> (i32, i32) {
    %c0_i32 = arith.constant 0 : i32
    %c0_i32_0 = arith.constant 0 : i32
    %c0_i32_1 = arith.constant 0 : i32
    return %c0_i32, %c0_i32_0 : i32, i32
  }
  func.func @transform_9(%arg0: i32, %arg1: i32) -> (i32, i32) {
    %c0_i32 = arith.constant 0 : i32
    %c0_i32_0 = arith.constant 0 : i32
    %c0_i32_1 = arith.constant 0 : i32
    return %c0_i32, %c0_i32_0 : i32, i32
  }
  func.func @transform_10(%arg0: i32, %arg1: i32) -> (i32, i32) {
    %c0_i32 = arith.constant 0 : i32
    %c0_i32_0 = arith.constant 0 : i32
    %c0_i32_1 = arith.constant 0 : i32
    return %c0_i32, %c0_i32_0 : i32, i32
  }
  func.func @transform_11(%arg0: i32, %arg1: i32) -> (i32, i32, i32) {
    %c0_i32 = arith.constant 0 : i32
    %c0_i32_0 = arith.constant 0 : i32
    return %arg0, %c0_i32, %arg1 : i32, i32, i32
  }
}

</mosaic_0001>

<bundles_post_ra>
// kernel: tpu_custom_call.1
= control target key start
LH: loop header
LB: loop body
LE: loop exit
PB: predicated region body
PF: predicated region fallthrough
CT: control target
= control target key end

     0   :  { %s6451_s0 = inlined_call_operand.vmem [shape: f32[2,32,256], index: 0, kind: input, shape index: {}]   ;;  %s6452_s1 = inlined_call_operand.hbm [shape: f32[2,32,256], index: 1, kind: input, shape index: {}]   ;;  %s6453_s2 = inlined_call_operand.vmem [shape: f32[32,32], index: 2, kind: input, shape index: {}]   ;;  %s6454_s3 = inlined_call_operand.vmem [shape: f32[32,1], index: 3, kind: input, shape index: {}]   ;;  %s6455_s4 = inlined_call_operand.vmem [shape: f32[32,1], index: 4, kind: input, shape index: {}]   ;;  %s6456_s5 = inlined_call_operand.hbm [shape: f32[32,32], index: 5, kind: input, shape index: {}]   ;;  %s6457_s6 = inlined_call_operand.vmem [shape: f32[32,1], index: 6, kind: input, shape index: {}]   ;;  %s6458_s7 = inlined_call_operand.hbm [shape: f32[32,32], index: 7, kind: input, shape index: {}]   ;;  %s6459_s8 = inlined_call_operand.vmem [shape: f32[32,1], index: 8, kind: input, shape index: {}]   ;;  %s6460_s9 = inlined_call_operand.vmem [shape: f32[32,32], index: 9, kind: input, shape index: {}]   ;;  %s6461_s10 = inlined_call_operand.vmem [shape: f32[32,1], index: 10, kind: input, shape index: {}]   ;;  %s6462_s11 = inlined_call_operand.hbm [shape: f32[2,32,256], index: 11, kind: output, shape index: {}]  }
   0x1   :  { %6480 = sst [smem:[#allocation18_spill]] %s6451_s0 }
   0x2   :  { %6481 = sst [smem:[#allocation19_spill]] %s6452_s1 }
   0x3   :  { %6482 = sst [smem:[#allocation20_spill]] %s6456_s5 }
   0x4   :  { %6483 = sst [smem:[#allocation21_spill]] %s6457_s6 }
   0x5   :  { %6484 = sst [smem:[#allocation22_spill]] %s6459_s8 }
   0x6   :  { %6485 = sst [smem:[#allocation23_spill]] %s6460_s9 }
   0x7   :  { %6486 = sst [smem:[#allocation24_spill]] %s6461_s10 }
   0x8   :  { %6487 = sst [smem:[#allocation25_spill]] %s6462_s11 }
   0x9   :  { %16 = vsyncpa [#allocation5], 0 }
   0xa   :  { %18 = vsyncpa [#allocation5 + $0x1], 0 }
   0xb   :  { %19 = vsyncpa [#allocation8], 0 }
   0xc   :  { %20 = vsyncpa [#allocation6], 0 }
   0xd   :  { %22 = vsyncpa [#allocation6 + $0x1], 0  ;;  %s4809_s17 = smov 0   ;;  %s4811_s18 = smov 0  }
   0xe   :  { %s4813_s19 = smov 0   ;;  %s4815_s20 = smov 0  }
   0xf   :  { %s4817_s21 = smov 0   ;;  %s4819_s22 = smov 0  }
  0x10   :  { %s4821_s23 = smov 0   ;;  %s4823_s24 = smov 0  }
  0x11 LB: > { %6488 = sst [smem:[#allocation14_spill]] %s4705_s17  ;;  %s3661_s25 = sadd.s32 4294967295, %s4733_s24   ;;  %s4733_s24 = sphi %s4823_s24, %s28_s24   ;;  %s4729_s23 = sphi %s4821_s23, %s6528_s23   ;;  %s4725_s22 = sphi %s4819_s22, %s6527_s22   ;;  %s4721_s21 = sphi %s4817_s21, %s6526_s21   ;;  %s4717_s20 = sphi %s4815_s20, %s6525_s20   ;;  %s4713_s19 = sphi %s4813_s19, %s6524_s19   ;;  %s4709_s18 = sphi %s4811_s18, %s6523_s18   ;;  %s4705_s17 = sphi %s4809_s17, %s6522_s17  }
  0x12   : > { %6489 = sst [smem:[#allocation15_spill]] %s4733_s24  ;;  %s3662_s26 = sadd.s32 4294967294, %s4733_s24  }
  0x13   : > { %p82_p0 = scmp.ne.s32.totalorder %s4713_s19, %s4709_s18  ;;  %p83_p1 = scmp.eq.s32.totalorder %s4733_s24, 0 }
  0x14   : > { %p88_p2 = scmp.ne.s32.totalorder %s4709_s18, %s4705_s17  ;;  %p4857_p3 = scmp.eq.s32.totalorder %s3661_s25, 0 }
  0x15   : > { %p303_p4 = scmp.eq.s32.totalorder %s3661_s25, 3  ;;  %p4861_p5 = por %p83_p1, %p82_p0 }
  0x16   : > { %s6490_s28 = scalar_select %p4857_p3, 1, 0 }
  0x17   : > { %p309_p6 = scmp.eq.s32.totalorder %s3662_s26, 3  ;;  %p4867_p7 = por %p4857_p3, %p88_p2 }
  0x18   : > { %p4871_p8 = por %p303_p4, %p82_p0  ;;  %p3663_p10 = scmp.ge.s32.totalorder %s4733_s24, 1 }
  0x19   : > { %s6492_s30 = scalar_select %p4867_p7, 1, 0 }
  0x1a   : > { %s6493_s12 = scalar_select %p4871_p8, 1, 0 }
  0x1b   : > { %p4875_p9 = por %p309_p6, %p88_p2  ;;  %p316_p11 = scmp.lt.s32.totalorder %s4733_s24, 5 }
  0x1c   : > { %6494 = sst [smem:[#allocation16_spill]] %s6493_s12  ;;  %s4735_s15 = smov [#allocation7]  }
  0x1d   : > { %s6495_s13 = scalar_select %p4875_p9, 1, 0 }
  0x1e   : > { %p4881_p12 = pnand %p3663_p10, %p316_p11  ;;  %s337_s16 = sshll.u32 %s4735_s15, 4  ;;  %s4885_s16 = int_to_ptr.vmem [resolvable:$true] %s337_s16 }
  0x1f   : > { %6496 = sst [smem:[#allocation17_spill]] %s6495_s13  ;;  %p4025_p0 = scmp.lt.s32.totalorder %s4733_s24, 4 }
  0x20   : > { %p4008_p13 = pneg %p4881_p12  ;;  %s4736_s26 = smov [#allocation9]  }
  0x21   : > { %s353_s27 = sshll.u32 %s4736_s26, 4  ;;  %p4898_p2 = pnand %p4025_p0, %p4861_p5  ;;  %s4902_s27 = int_to_ptr.vmem [resolvable:$true] %s353_s27 }
  0x22   : > { %p4892_p1 = pnand %p4008_p13, %p4857_p3  ;;  %s6500_s5 = sld [smem:[#allocation20_spill]] }
  0x24   : > { %p4547_p6 = pneg %p4892_p1 }
  0x28   : > { %s4545_s24 = scalar_lea.hbm %s6500_s5, 512 }
  0x29   : > { %p4546_p4 = scmp.ne.s32.totalorder %s6500_s5, %s4545_s24  ;;  %p4552_p5 = scmp.lt.u32.totalorder %s4545_s24, %s6500_s5 }
  0x2b   : > { %p4548_p10 = pnand %p4547_p6, %p4546_p4 }
  0x2d   : > { %p4549_p11 = pneg %p4548_p10 }
  0x2f   : > { %p4554_p13 = pnand %p4552_p5, %p4549_p11 }
  0x31   : > { %4557 = shalt.err (!%p4554_p13)
}
  0x32   : > { %s4558_s17 = scalar_lea.vmem %s4885_s16, 512  ;;  %p4566_p3 = scmp.lt.s32.totalorder %s4885_s16, %s4885_s16 }
  0x33   : > { %p4559_p0 = scmp.ne.s32.totalorder %s4885_s16, %s4558_s17  ;;  %p4567_p4 = scmp.lt.s32.totalorder %s4558_s17, %s4558_s17 }
  0x35   : > { %p4561_p9 = pnand %p4559_p0, %p4547_p6  ;;  %p4568_p10 = por %p4567_p4, %p4566_p3 }
  0x37   : > { %p4562_p8 = pneg %p4561_p9 }
  0x39   : > { %p4569_p7 = pnand %p4568_p10, %p4562_p8 }
  0x3b   : > { %4572 = shalt.err (!%p4569_p7)
}
  0x3c   : > { %s6478_s11 = smov 128   ;;  %s6479_s24 = smov 8  }
  0x3d   : > { %4011 = dma.hbm_to_vmem [thread:$0]  (!%p4892_p1), %s6500_s5, 512, %s4885_s16, [#allocation8], %s6478_s11, %s6478_s11, %s6479_s24  }
  0x3e   : > { %s4573_s17 = scalar_lea.hbm %s6458_s7, 512 }
  0x3f   : > { %p4574_p3 = scmp.ne.s32.totalorder %s6458_s7, %s4573_s17  ;;  %p4580_p9 = scmp.lt.u32.totalorder %s4573_s17, %s6458_s7 }
  0x41   : > { %p4576_p7 = pnand %p4574_p3, %p4547_p6 }
  0x43   : > { %p4577_p8 = pneg %p4576_p7 }
  0x45   : > { %p4582_p11 = pnand %p4580_p9, %p4577_p8 }
  0x47   : > { %4585 = shalt.err (!%p4582_p11)
}
  0x48   : > { %s4586_s16 = scalar_lea.vmem %s4902_s27, 512  ;;  %p4594_p4 = scmp.lt.s32.totalorder %s4902_s27, %s4902_s27 }
  0x49   : > { %p4587_p5 = scmp.ne.s32.totalorder %s4902_s27, %s4586_s16  ;;  %p4595_p10 = scmp.lt.s32.totalorder %s4586_s16, %s4586_s16 }
  0x4b   : > { %p4589_p13 = pnand %p4587_p5, %p4547_p6  ;;  %p4596_p3 = por %p4595_p10, %p4594_p4 }
  0x4d   : > { %p4590_p0 = pneg %p4589_p13 }
  0x4f   : > { %p4597_p7 = pnand %p4596_p3, %p4590_p0 }
  0x51   : > { %4600 = shalt.err (!%p4597_p7)
}
  0x52   : > { %4014 = dma.hbm_to_vmem [thread:$0]  (!%p4892_p1), %s6458_s7, 512, %s4902_s27, [#allocation8], %s6478_s11, %s6478_s11, %s6479_s24  }
  0x53   : > { %s37_s9 = sadd.s32 1, %s4725_s22  ;;  %s40_s10 = sadd.s32 1, %s4729_s23 }
  0x54   : > { %p38_p6 = scmp.ge.s32.totalorder %s37_s9, 2  ;;  %s384_s25 = sand.u32 1, %s4713_s19  }
  0x55   : > { %s3667_s12 = sshll.u32 %s384_s25, 5  ;;  %s3668_s29 = sshll.u32 %s4729_s23, 3 }
  0x56   : > { %s6530_s9 = smov (%p38_p6, %s37_s9), 0  ;;  %s6532_s10 = smov (!%p38_p6, %s40_s10), %s4729_s23 }
  0x57   : > { %s71_s15 = ssub.s32 %s4725_s22, %s6530_s9  ;;  %p42_p8 = scmp.ge.s32.totalorder %s6532_s10, 2 }
  0x58   : > { %s393_s26 = sadd.s32 %s4725_s22, %s3668_s29  ;;  %s388_s17 = scalar_lea.vmem [#allocation4], %s3667_s12 }
  0x59   : > { %s396_s16 = sshll.u32 %s388_s17, 4  ;;  %s6534_s10 = smov (%p42_p8, %s6532_s10), 0  ;;  %s4974_s16 = int_to_ptr.vmem [resolvable:$true] %s396_s16 }
  0x5a   : > { %s3669_s27 = sshll.u32 %s393_s26, 7  ;;  %s70_s6 = ssub.s32 %s4729_s23, %s6534_s10 }
  0x5b   : > { %s6501_s1 = sld [smem:[#allocation19_spill]]  ;;  %s4983_s5 = sor.u32 %s71_s15, %s70_s6 }
  0x5c   : > { %s4986_s12 = scalar_lea.sflag [#allocation5], %s384_s25  ;;  %p4603_p11 = pneg %p4898_p2 }
  0x61   : > { %s4981_s24 = scalar_lea.hbm %s6501_s1, %s3669_s27  ;;  %s4606_s17 = scalar_lea.hbm %s6501_s1, 2048 }
  0x62   : > { %s4601_s29 = scalar_lea.hbm %s4981_s24, 512  ;;  %p4607_p0 = scmp.lt.u32.totalorder %s4981_s24, %s6501_s1 }
  0x63   : > { %p4602_p9 = scmp.ne.s32.totalorder %s4981_s24, %s4601_s29  ;;  %p4608_p4 = scmp.lt.u32.totalorder %s4606_s17, %s4601_s29 }
  0x64   : > { %p4610_p3 = scmp.lt.u32.totalorder %s4601_s29, %s4981_s24 }
  0x65   : > { %p4604_p5 = pnand %p4603_p11, %p4602_p9  ;;  %p4609_p10 = por %p4608_p4, %p4607_p0 }
  0x67   : > { %p4605_p13 = pneg %p4604_p5  ;;  %p4611_p7 = por %p4610_p3, %p4609_p10 }
  0x69   : > { %p4612_p6 = pnand %p4611_p7, %p4605_p13 }
  0x6b   : > { %4615 = shalt.err (!%p4612_p6)
}
  0x6c   : > { %s4616_s25 = scalar_lea.vmem %s4974_s16, 512  ;;  %s4739_s15 = smov [#allocation4]  }
  0x6d   : > { %p4617_p8 = scmp.ne.s32.totalorder %s4974_s16, %s4616_s25  ;;  %s4621_s6 = sshll.u32 %s4739_s15, 4  ;;  %s4622_s6 = int_to_ptr.vmem [resolvable:$false] %s4621_s6 }
  0x6e   : > { %s4623_s11 = scalar_lea.vmem %s4622_s6, 1024  ;;  %p4624_p1 = scmp.lt.s32.totalorder %s4974_s16, %s4622_s6 }
  0x6f   : > { %p4619_p9 = pnand %p4617_p8, %p4603_p11  ;;  %p4625_p0 = scmp.lt.s32.totalorder %s4623_s11, %s4616_s25 }
  0x71   : > { %p4620_p5 = pneg %p4619_p9  ;;  %p4626_p4 = por %p4625_p0, %p4624_p1 }
  0x73   : > { %p4627_p10 = pnand %p4626_p4, %p4620_p5 }
  0x75   : > { %4630 = shalt.err (!%p4627_p10)
}
  0x76   : > { %s4740_s29 = smov 256   ;;  %s6502_s26 = smov 8  }
  0x77   : > { %s6503_s17 = smov 128   ;;  %s6504_s27 = sadd.s32 1, %s4713_s19 }
  0x78   : > { %4018 = dma.hbm_to_vmem [thread:$0]  (!%p4898_p2), %s4981_s24, 512, %s4974_s16, %s4986_s12, %s4740_s29, %s6503_s17, %s6502_s26  }
  0x79   : > { %p6505_p11 = scmp.eq.s32.totalorder %s4983_s5, 0  ;;  %408 = sbr.rel (%p4881_p12) target bundleno = 4190 (0x105e), region = 64 }
  0x7a   : > { %s5026_s25 = sand.u32 (!%p4881_p12), 1, %s4709_s18   ;;  %p6506_p1 = scmp.ne.s32.totalorder (!%p4881_p12), %s6492_s30, 0 }
  0x7b   : > { %s5021_s8 = scalar_select %p6505_p11, %s4713_s19, %s6504_s27  }
  0x7c   : > { %s3671_s13 = sshll.u32 (!%p4881_p12), %s5026_s25, 5  ;;  %s411_s15 = scalar_lea.sflag (!%p4881_p12), [#allocation5], %s5026_s25 }
  0x7d   : > { %s5030_s6 = scalar_lea.vmem (!%p4881_p12), [#allocation4], %s3671_s13 }
  0x80   : > { %4692 = dma.done.wait (%p6506_p1), %s411_s15, 512  }
  0x81   : > { %4694 = vsyncadd (%p6506_p1), %s411_s15, 4294966784  ;;  %p6507_p2 = scmp.ne.s32.totalorder %s6490_s28, 0 }
  0x83   : > { %4696 = dma.done.wait (%p6507_p2), [#allocation8], 1024  }
  0x84   : > { %4698 = vsyncadd (%p6507_p2), [#allocation8], 4294966272  ;;  %p466_p12 = scmp.lt.s32.totalorder %s4721_s21, 1  ;;  %s6508_s0 = sld [smem:[#allocation18_spill]] }
  0x85   : > { %s5045_s11 = scalar_lea.vmem [#allocation10], %s3671_s13  ;;  %p3677_p13 = scmp.ne.s32.totalorder %s4717_s20, 0 }
  0x86   : > { %s467_s5 = scalar_select %p466_p12, %s4721_s21, 1 }
  0x87   : > { %474 = sbr.rel (%p3677_p13) target bundleno = 638 (0x27e), region = 80  ;;  %v4741_v7 = vmov (!%p3677_p13), 0.0   ;;  %v4742_v12 = vmov (!%p3677_p13), 0   ;;  %v621_v14 = vld [vmem:[%s6455_s4] sm:$0xff] (!%p3677_p13)  ;;  %v622_v16 = vld [vmem:[%s6455_s4 + $0x8] sm:$0xff] (!%p3677_p13)  ;;  %vm487_vm0 = vcmask (!%p3677_p13), 261120  }
  0x88   : > { %s3779_s14 = sshll.u32 %s467_s5, 6  ;;  %564 = vmatprep.mubr.f32.mxu0 (!%p3677_p13), %v4741_v7  ;;  %576 = vmatprep.mubr.f32.mxu1 (!%p3677_p13), %v4741_v7  ;;  %v589_v15 = vld [vmem:[%s6454_s3] sm:$0xff] (!%p3677_p13)  ;;  %v590_v17 = vld [vmem:[%s6454_s3 + $0x8] sm:$0xff] (!%p3677_p13)  ;;  %v485_v19 = vld [vmem:[%s6453_s2 + $0x10] sm:$0xff] (!%p3677_p13)  ;;  %s6509_s28 = sld [smem:[#allocation22_spill]] (!%p3677_p13) }
  0x89   : > { %4106 = vset.pattern.permute.xlu1 (!%p3677_p13), %v4742_v12  ;;  %4105 = vset.pattern.permute.xlu0 (!%p3677_p13), %v4742_v12  ;;  %v483_v18 = vld [vmem:[%s6453_s2] sm:$0xff] (!%p3677_p13)  ;;  %v592_v20 = vld [vmem:[%s6454_s3 + $0x18] sm:$0xff] (!%p3677_p13)  ;;  %v591_v21 = vld [vmem:[%s6454_s3 + $0x10] sm:$0xff] (!%p3677_p13)  ;;  %s6511_s13 = sld [smem:[#allocation23_spill]] (!%p3677_p13) }
  0x8a   : > { %s470_s12 = scalar_lea.vmem %s6508_s0, %s3779_s14  ;;  %627 = vperm.xlu1 (!%p3677_p13), %4106, %v621_v14   ;;  %595 = vperm.xlu0 (!%p3677_p13), %4105, %v589_v15   ;;  %v484_v22 = vld [vmem:[%s6453_s2 + $0x8] sm:$0xff] (!%p3677_p13)  ;;  %v486_v23 = vld [vmem:[%s6453_s2 + $0x18] sm:$0xff] (!%p3677_p13)  ;;  %v623_v25 = vld [vmem:[%s6455_s4 + $0x10] sm:$0xff] (!%p3677_p13)  ;;  %s6510_s14 = sld [smem:[#allocation24_spill]] (!%p3677_p13) }
  0x8b   : > { %v476_v0 = vld [vmem:[%s470_s12 + $0x8] sm:$0xff] (!%p3677_p13)  ;;  %v478_v1 = vld [vmem:[%s470_s12 + $0x18] sm:$0xff] (!%p3677_p13)  ;;  %v475_v2 = vld [vmem:[%s470_s12] sm:$0xff] (!%p3677_p13) }
  0x8c   : > { %v3824_v3 = vpack.c.bf16 (!%p3677_p13), %v478_v1, %v476_v0  ;;  %v477_v4 = vld [vmem:[%s470_s12 + $0x10] sm:$0xff] (!%p3677_p13)  ;;  %v480_v5 = vld [vmem:[%s470_s12 + $0x28] sm:$0xff] (!%p3677_p13)  ;;  %v482_v6 = vld [vmem:[%s470_s12 + $0x38] sm:$0xff] (!%p3677_p13) }
  0x8d   : > { %v3826_v8 = vpack.c.bf16 (!%p3677_p13), %v477_v4, %v475_v2  ;;  %v3828_v9 = vpack.c.bf16 (!%p3677_p13), %v482_v6, %v480_v5  ;;  %v479_v10 = vld [vmem:[%s470_s12 + $0x20] sm:$0xff] (!%p3677_p13)  ;;  %v481_v11 = vld [vmem:[%s470_s12 + $0x30] sm:$0xff] (!%p3677_p13)  ;;  %v624_v24 = vld [vmem:[%s6455_s4 + $0x18] sm:$0xff] (!%p3677_p13) }
  0x8e   : > { %3825 = vmatprep.subr.bf16.mxu0 %v3824_v3  ;;  %3992 = vmatprep.subr.bf16.mxu1 %v3824_v3  ;;  %v3830_v13 = vpack.c.bf16 %v481_v11, %v479_v10  ;;  %v714_v26 = vld [vmem:[%s6509_s28 + $0x8] sm:$0xff]  ;;  %v713_v27 = vld [vmem:[%s6509_s28] sm:$0xff]  ;;  %v716_v28 = vld [vmem:[%s6509_s28 + $0x18] sm:$0xff] }
  0x8f   : > { %3827 = vmatpush1.bf16.msra.mxu0 %v3826_v8  ;;  %3994 = vmatpush1.bf16.msra.mxu1 %v3826_v8  ;;  %v715_v29 = vld [vmem:[%s6509_s28 + $0x10] sm:$0xff] }
  0x90   : > { %3829 = vmatprep.subr.bf16.mxu0 %v3828_v9  ;;  %3993 = vmatprep.subr.bf16.mxu1 %v3828_v9  ;;  %v851_v30 = vld [vmem:[%s6510_s14 + $0x8] sm:$0xff]  ;;  %v850_v31 = vld [vmem:[%s6510_s14] sm:$0xff]  ;;  %v853_v32 = vld [vmem:[%s6510_s14 + $0x18] sm:$0xff] }
  0x91   : > { %632 = vperm.xlu1 %4106, %v622_v16   ;;  %600 = vperm.xlu0 %4105, %v590_v17   ;;  %v852_v33 = vld [vmem:[%s6510_s14 + $0x10] sm:$0xff] }
  0x93   : > { %3831 = vmatpush1.bf16.msra.mxu0 %v3830_v13  ;;  %3995 = vmatpush1.bf16.msra.mxu1 %v3830_v13 }
  0x95   : > { %610 = vperm.xlu1 %4106, %v592_v20   ;;  %605 = vperm.xlu0 %4105, %v591_v21  }
  0x96   : > { %3678 = vmatmul.mubr.msk.f32.vlgmr.msra.gmra.mrb[0].mxu0 %vm487_vm0, %v483_v18  ;;  %3680 = vmatmul.mubr.msk.f32.vlgmr.msra.gmra.mrb[0].mxu1 %vm487_vm0, %v485_v19 }
  0x97   : > { %570 = vmatprep.mubr.f32.mxu0 %v4741_v7  ;;  %582 = vmatprep.mubr.f32.mxu1 %v4741_v7 }
  0x99   : > { %642 = vperm.xlu1 %4106, %v624_v24   ;;  %637 = vperm.xlu0 %4105, %v623_v25  }
  0x9a   : > { %3679 = vmatmul.mubr.msk.f32.gmra.mrb[2].mxu0 %vm487_vm0, %v484_v22  ;;  %3681 = vmatmul.mubr.msk.f32.gmra.mrb[2].mxu1 %vm487_vm0, %v486_v23 }
  0x9b   : > { %813 = vmatprep.mubr.f32.mxu1 %v4741_v7  ;;  %950 = vmatprep.mubr.f32.mxu0 %v4741_v7 }
  0x9d   : > { %724 = vperm.xlu1 %4106, %v714_v26   ;;  %719 = vperm.xlu0 %4105, %v713_v27  }
  0xa1   : > { %734 = vperm.xlu1 %4106, %v716_v28   ;;  %729 = vperm.xlu0 %4105, %v715_v29  }
  0xa5   : > { %861 = vperm.xlu1 %4106, %v851_v30   ;;  %856 = vperm.xlu0 %4105, %v850_v31  }
  0xa9   : > { %871 = vperm.xlu1 %4106, %v853_v32   ;;  %866 = vperm.xlu0 %4105, %v852_v33  }
 0x109   : > { %v596_v34 = vpop.permute.xlu0 %595  ;;  %v628_v35 = vpop.permute.xlu1 %627 }
 0x110   : > { %v601_v36 = vpop.permute.xlu0 %600  ;;  %v633_v37 = vpop.permute.xlu1 %632 }
 0x114   : > { %v606_v38 = vpop.permute.xlu0 %605  ;;  %v611_v39 = vpop.permute.xlu1 %610 }
 0x118   : > { %v638_v46 = vpop.permute.xlu0 %637  ;;  %v643_v61 = vpop.permute.xlu1 %642 }
 0x169   : > { %v566_v40 = vpop.f32.mrb[0].mxu0  ;;  %v578_v41 = vpop.f32.mrb[0].mxu1 }
 0x16a   : > { %v613_v42 = vmul.f32 %v596_v34, %v566_v40  ;;  %v617_v43 = vmul.f32 %v606_v38, %v578_v41  ;;  %v568_v44 = vpop.f32.mrb[1].mxu0  ;;  %v580_v45 = vpop.f32.mrb[1].mxu1 }
 0x16b   : > { %v614_v47 = vmul.f32 %v596_v34, %v568_v44  ;;  %v618_v48 = vmul.f32 %v606_v38, %v580_v45 }
 0x16c   : > { %v5118_v49 = vadd.f32 %v628_v35, %v613_v42  ;;  %v5120_v50 = vadd.f32 %v638_v46, %v617_v43 }
 0x16d   : > { %v5122_v51 = vadd.f32 %v628_v35, %v614_v47  ;;  %v5124_v52 = vadd.f32 %v638_v46, %v618_v48  ;;  %v572_v53 = vpop.f32.mrb[2].mxu0  ;;  %v584_v54 = vpop.f32.mrb[2].mxu1  ;;  %v709_v47 = vld [vmem:[#allocation9] sm:$0xff] }
 0x16e   : > { %v3682_v55 = vmul.f32 -1.442695, %v5118_v49  ;;  %v3686_v56 = vmul.f32 -1.442695, %v5120_v50  ;;  %v615_v57 = vmul.f32 %v601_v36, %v572_v53  ;;  %v619_v58 = vmul.f32 %v611_v39, %v584_v54  ;;  %v574_v59 = vpop.f32.mrb[3].mxu0  ;;  %v586_v60 = vpop.f32.mrb[3].mxu1 }
 0x16f   : > { %v3683_v62 = vmul.f32 -1.442695, %v5122_v51  ;;  %v3687_v63 = vmul.f32 -1.442695, %v5124_v52  ;;  %v616_v0 = vmul.f32 %v601_v36, %v574_v59  ;;  %v620_v1 = vmul.f32 %v611_v39, %v586_v60  ;;  %v846_v48 = vld [vmem:[%s6511_s13] sm:$0xff]  ;;  %v712_v53 = vld [vmem:[#allocation9 + $0x18] sm:$0xff] }
 0x170   : > { %4107 = vpow2.f32 %v3682_v55  ;;  %v647_v2 = vadd.f32 %v633_v37, %v615_v57  ;;  %v651_v3 = vadd.f32 %v643_v61, %v619_v58  ;;  %v849_v54 = vld [vmem:[%s6511_s13 + $0x18] sm:$0xff]  ;;  %v720_v55 = vpop.permute.xlu0 %719 }
 0x171   : > { %4109 = vpow2.f32 %v3686_v56  ;;  %v648_v4 = vadd.f32 %v633_v37, %v616_v0  ;;  %v652_v5 = vadd.f32 %v643_v61, %v620_v1  ;;  %v725_v56 = vpop.permute.xlu1 %724 }
 0x172   : > { %4111 = vpow2.f32 %v3683_v62  ;;  %v3684_v6 = vmul.f32 -1.442695, %v647_v2  ;;  %v3688_v8 = vmul.f32 -1.442695, %v651_v3 }
 0x173   : > { %4113 = vpow2.f32 %v3687_v63  ;;  %v3685_v9 = vmul.f32 -1.442695, %v648_v4  ;;  %v3689_v10 = vmul.f32 -1.442695, %v652_v5 }
 0x174   : > { %4115 = vpow2.f32 %v3684_v6  ;;  %v730_v57 = vpop.permute.xlu0 %729 }
 0x175   : > { %4117 = vpow2.f32 %v3688_v8  ;;  %v735_v58 = vpop.permute.xlu1 %734 }
 0x176   : > { %4119 = vpow2.f32 %v3685_v9 }
 0x177   : > { %4121 = vpow2.f32 %v3689_v10 }
 0x178   : > { %v857_v59 = vpop.permute.xlu0 %856 }
 0x17a   : > { %v4108_v11 = vpop.eup %4107 }
 0x17b   : > { %v4110_v12 = vpop.eup %4109  ;;  %v677_v13 = vadd.f32 1.0, %v4108_v11 }
 0x17c   : > { %v4112_v14 = vpop.eup %4111  ;;  %v681_v15 = vadd.f32 1.0, %v4110_v12 }
 0x17d   : > { %v4114_v16 = vpop.eup %4113  ;;  %4123 = vrcp.f32 %v677_v13  ;;  %v678_v17 = vadd.f32 1.0, %v4112_v14  ;;  %v867_v13 = vpop.permute.xlu0 %866 }
 0x17e   : > { %v4116_v18 = vpop.eup %4115  ;;  %4125 = vrcp.f32 %v681_v15  ;;  %v682_v19 = vadd.f32 1.0, %v4114_v16 }
 0x17f   : > { %v4118_v20 = vpop.eup %4117  ;;  %4127 = vrcp.f32 %v678_v17  ;;  %v679_v21 = vadd.f32 1.0, %v4116_v18 }
 0x180   : > { %v4120_v22 = vpop.eup %4119  ;;  %4129 = vrcp.f32 %v682_v19  ;;  %v683_v23 = vadd.f32 1.0, %v4118_v20 }
 0x181   : > { %v4122_v24 = vpop.eup %4121  ;;  %4131 = vrcp.f32 %v679_v21  ;;  %v680_v25 = vadd.f32 1.0, %v4120_v22 }
 0x182   : > { %4133 = vrcp.f32 %v683_v23  ;;  %v684_v26 = vadd.f32 1.0, %v4122_v24 }
 0x183   : > { %4135 = vrcp.f32 %v680_v25 }
 0x184   : > { %4137 = vrcp.f32 %v684_v26 }
 0x187   : > { %v4124_v27 = vpop.eup %4123 }
 0x188   : > { %v4126_v28 = vpop.eup %4125  ;;  %v701_v33 = vmul.f32 %v4124_v27, %v5118_v49  ;;  %v710_v49 = vld [vmem:[#allocation9 + $0x8] sm:$0xff] }
 0x189   : > { %v4128_v29 = vpop.eup %4127  ;;  %v705_v36 = vmul.f32 %v4126_v28, %v5120_v50  ;;  %v847_v50 = vld [vmem:[%s6511_s13 + $0x8] sm:$0xff] }
 0x18a   : > { %v4130_v30 = vpop.eup %4129  ;;  %v702_v39 = vmul.f32 %v4128_v29, %v5122_v51  ;;  %v711_v51 = vld [vmem:[#allocation9 + $0x10] sm:$0xff] }
 0x18b   : > { %v4132_v31 = vpop.eup %4131  ;;  %v706_v42 = vmul.f32 %v4130_v30, %v5124_v52  ;;  %v848_v52 = vld [vmem:[%s6511_s13 + $0x10] sm:$0xff] }
 0x18c   : > { %v4134_v32 = vpop.eup %4133  ;;  %v703_v34 = vmul.f32 %v4132_v31, %v647_v2 }
 0x18d   : > { %v4136_v35 = vpop.eup %4135  ;;  %v707_v37 = vmul.f32 %v4134_v32, %v651_v3  ;;  %v862_v3 = vpop.permute.xlu1 %861 }
 0x18e   : > { %v4138_v38 = vpop.eup %4137  ;;  %v3834_v40 = vpack.c.bf16 %v703_v34, %v701_v33  ;;  %v704_v41 = vmul.f32 %v4136_v35, %v648_v4 }
 0x18f   : > { %v3838_v43 = vpack.c.bf16 %v707_v37, %v705_v36  ;;  %v708_v44 = vmul.f32 %v4138_v38, %v652_v5 }
 0x190   : > { %v3832_v45 = vpack.c.bf16 %v704_v41, %v702_v39 }
 0x191   : > { %v3836_v46 = vpack.c.bf16 %v708_v44, %v706_v42  ;;  %v872_v22 = vpop.permute.xlu1 %871 }
 0x192   : > { %3833 = vmatprep.subr.bf16.mxu1 %v3832_v45  ;;  %3841 = vmatprep.subr.bf16.mxu0 %v3832_v45 }
 0x193   : > { %3835 = vmatpush1.bf16.msra.mxu1 %v3834_v40  ;;  %3843 = vmatpush1.bf16.msra.mxu0 %v3834_v40 }
 0x194   : > { %3837 = vmatprep.subr.bf16.mxu1 %v3836_v46  ;;  %3845 = vmatprep.subr.bf16.mxu0 %v3836_v46 }
 0x197   : > { %3839 = vmatpush1.bf16.msra.mxu1 %v3838_v43  ;;  %3847 = vmatpush1.bf16.msra.mxu0 %v3838_v43 }
 0x19a   : > { %3690 = vmatmul.mubr.msk.f32.vlgmr.msra.gmra.mrb[4].mxu1 %vm487_vm0, %v709_v47  ;;  %3694 = vmatmul.mubr.msk.f32.vlgmr.msra.gmra.mrb[4].mxu0 %vm487_vm0, %v846_v48 }
 0x19b   : > { %819 = vmatprep.mubr.f32.mxu1 %v4741_v7  ;;  %956 = vmatprep.mubr.f32.mxu0 %v4741_v7 }
 0x19e   : > { %3691 = vmatmul.mubr.msk.f32.gmra.mrb[6].mxu1 %vm487_vm0, %v710_v49  ;;  %3695 = vmatmul.mubr.msk.f32.gmra.mrb[6].mxu0 %vm487_vm0, %v847_v50 }
 0x19f   : > { %825 = vmatprep.mubr.f32.mxu1 %v4741_v7  ;;  %962 = vmatprep.mubr.f32.mxu0 %v4741_v7 }
 0x1a2   : > { %3692 = vmatmul.mubr.msk.f32.gmra.mrb[8].mxu1 %vm487_vm0, %v711_v51  ;;  %3696 = vmatmul.mubr.msk.f32.gmra.mrb[8].mxu0 %vm487_vm0, %v848_v52 }
 0x1a3   : > { %831 = vmatprep.mubr.f32.mxu1 %v4741_v7  ;;  %968 = vmatprep.mubr.f32.mxu0 %v4741_v7 }
 0x1a6   : > { %3693 = vmatmul.mubr.msk.f32.gmra.mrb[10].mxu1 %vm487_vm0, %v712_v53  ;;  %3697 = vmatmul.mubr.msk.f32.gmra.mrb[10].mxu0 %vm487_vm0, %v849_v54 }
 0x26d   : > { %v815_v60 = vpop.f32.mrb[4].mxu1  ;;  %v952_v61 = vpop.f32.mrb[4].mxu0 }
 0x26e   : > { %v816_v62 = vadd.f32 %v815_v60, %v720_v55  ;;  %v953_v63 = vadd.f32 %v952_v61, %v857_v59  ;;  %v817_v0 = vpop.f32.mrb[5].mxu1  ;;  %v954_v7 = vpop.f32.mrb[5].mxu0 }
 0x26f   : > { %v818_v1 = vadd.f32 %v817_v0, %v720_v55  ;;  %v955_v2 = vadd.f32 %v954_v7, %v857_v59 }
 0x270   : > { %838 = vst [vmem:[#allocation2] sm:$0xff] %v816_v62  ;;  %975 = vst [vmem:[#allocation3] sm:$0xff] %v953_v63 }
 0x271   : > { %839 = vst [vmem:[#allocation2 + $0x8] sm:$0xff] %v818_v1  ;;  %976 = vst [vmem:[#allocation3 + $0x8] sm:$0xff] %v955_v2  ;;  %v821_v4 = vpop.f32.mrb[6].mxu1  ;;  %v958_v5 = vpop.f32.mrb[6].mxu0 }
 0x272   : > { %v822_v6 = vadd.f32 %v821_v4, %v725_v56  ;;  %v959_v8 = vadd.f32 %v958_v5, %v862_v3  ;;  %v823_v9 = vpop.f32.mrb[7].mxu1  ;;  %v960_v10 = vpop.f32.mrb[7].mxu0 }
 0x273   : > { %v824_v11 = vadd.f32 %v823_v9, %v725_v56  ;;  %v961_v12 = vadd.f32 %v960_v10, %v862_v3 }
 0x274   : > { %840 = vst [vmem:[#allocation2 + $0x10] sm:$0xff] %v822_v6  ;;  %977 = vst [vmem:[#allocation3 + $0x10] sm:$0xff] %v959_v8 }
 0x275   : > { %841 = vst [vmem:[#allocation2 + $0x18] sm:$0xff] %v824_v11  ;;  %978 = vst [vmem:[#allocation3 + $0x18] sm:$0xff] %v961_v12  ;;  %v827_v14 = vpop.f32.mrb[8].mxu1  ;;  %v964_v15 = vpop.f32.mrb[8].mxu0 }
 0x276   : > { %v828_v16 = vadd.f32 %v827_v14, %v730_v57  ;;  %v965_v17 = vadd.f32 %v964_v15, %v867_v13  ;;  %v829_v18 = vpop.f32.mrb[9].mxu1  ;;  %v966_v19 = vpop.f32.mrb[9].mxu0 }
 0x277   : > { %v830_v20 = vadd.f32 %v829_v18, %v730_v57  ;;  %v967_v21 = vadd.f32 %v966_v19, %v867_v13 }
 0x278   : > { %842 = vst [vmem:[#allocation2 + $0x20] sm:$0xff] %v828_v16  ;;  %979 = vst [vmem:[#allocation3 + $0x20] sm:$0xff] %v965_v17 }
 0x279   : > { %843 = vst [vmem:[#allocation2 + $0x28] sm:$0xff] %v830_v20  ;;  %980 = vst [vmem:[#allocation3 + $0x28] sm:$0xff] %v967_v21  ;;  %v833_v23 = vpop.f32.mrb[10].mxu1  ;;  %v970_v24 = vpop.f32.mrb[10].mxu0 }
 0x27a   : > { %v834_v25 = vadd.f32 %v833_v23, %v735_v58  ;;  %v971_v26 = vadd.f32 %v970_v24, %v872_v22  ;;  %v835_v27 = vpop.f32.mrb[11].mxu1  ;;  %v972_v28 = vpop.f32.mrb[11].mxu0 }
 0x27b   : > { %v836_v29 = vadd.f32 %v835_v27, %v735_v58  ;;  %v973_v30 = vadd.f32 %v972_v28, %v872_v22 }
 0x27c   : > { %844 = vst [vmem:[#allocation2 + $0x30] sm:$0xff] %v834_v25  ;;  %981 = vst [vmem:[#allocation3 + $0x30] sm:$0xff] %v971_v26 }
 0x27d   : > { %845 = vst [vmem:[#allocation2 + $0x38] sm:$0xff] %v836_v29  ;;  %982 = vst [vmem:[#allocation3 + $0x38] sm:$0xff] %v973_v30 }
 0x27e PF: > { %v983_v31 = vld [vmem:[%s5030_s6] sm:$0xff]  ;;  %v984_v32 = vld [vmem:[%s5030_s6 + $0x8] sm:$0xff]  ;;  %v985_v33 = vld [vmem:[%s5030_s6 + $0x10] sm:$0xff]  ;;  %vm991_vm1 = vcmask 261120   ;;  %v4743_v37 = vmov 0   ;;  %s6512_s24 = sld [smem:[#allocation21_spill]] }
 0x27f   : > { %v3848_v34 = vpack.c.bf16 %v984_v32, %v983_v31  ;;  %v986_v35 = vld [vmem:[%s5030_s6 + $0x18] sm:$0xff]  ;;  %v987_v36 = vld [vmem:[%s6453_s2] sm:$0xff]  ;;  %4139 = vset.pattern.permute.xlu0 %v4743_v37  ;;  %4140 = vset.pattern.permute.xlu1 %v4743_v37  ;;  %v1090_v41 = vld [vmem:[%s6454_s3 + $0x8] sm:$0xff]  ;;  %vm1334_vm2 = vcmask 64512   ;;  %s6514_s15 = sld [smem:[#allocation16_spill]]  ;;  %s3775_s5 = sshll.u32 %s4721_s21, 3 }
 0x280   : > { %v3852_v38 = vpack.c.bf16 %v986_v35, %v985_v33  ;;  %3804 = vmatprep.mubr.msk.f32.mxu0 %vm991_vm1, %v987_v36  ;;  %v1089_v39 = vld [vmem:[%s6454_s3] sm:$0xff]  ;;  %v1118_v42 = vld [vmem:[%s6455_s4 + $0x8] sm:$0xff]  ;;  %v1091_v44 = vld [vmem:[%s6454_s3 + $0x10] sm:$0xff]  ;;  %v4744_v35 = vmov 0.0   ;;  %s3542_s30 = sshll.u32 %s5045_s11, 4  ;;  %s6515_s17 = sld [smem:[#allocation25_spill]]  ;;  %s6395_s30 = int_to_ptr.vmem [resolvable:$true] %s3542_s30 }
 0x281   : > { %3849 = vmatprep.subr.bf16.mxu0 %v3848_v34  ;;  %1095 = vperm.xlu0 %4139, %v1089_v39   ;;  %v1117_v40 = vld [vmem:[%s6455_s4] sm:$0xff]  ;;  %v988_v43 = vld [vmem:[%s6453_s2 + $0x8] sm:$0xff]  ;;  %v989_v45 = vld [vmem:[%s6453_s2 + $0x10] sm:$0xff]  ;;  %s3528_s1 = scalar_lea.sflag [#allocation6], %s5026_s25  ;;  %s4631_s21 = scalar_lea.vmem %s6395_s30, 512 }
 0x282   : > { %3851 = vmatpush3.bf16.msra.mxu0 %v3848_v34  ;;  %1123 = vperm.xlu1 %4140, %v1117_v40   ;;  %v1092_v46 = vld [vmem:[%s6454_s3 + $0x18] sm:$0xff]  ;;  %v1119_v48 = vld [vmem:[%s6455_s4 + $0x10] sm:$0xff]  ;;  %v1173_v51 = vld [vmem:[#allocation7] sm:$0xff]  ;;  %p4632_p3 = scmp.ne.s32.totalorder %s6395_s30, %s4631_s21 }
 0x283   : > { %3853 = vmatprep.subr.bf16.mxu0 %v3852_v38  ;;  %v990_v47 = vld [vmem:[%s6453_s2 + $0x18] sm:$0xff]  ;;  %v1174_v30 = vld [vmem:[#allocation7 + $0x8] sm:$0xff]  ;;  %v1298_v32 = vld [vmem:[#allocation2] sm:$0xff] }
 0x284   : > { %v1120_v49 = vld [vmem:[%s6455_s4 + $0x18] sm:$0xff]  ;;  %s6513_s16 = smov %s6512_s24  ;;  %v1177_v50 = vld [vmem:[%s6512_s24] sm:$0xff]  ;;  %v1299_v31 = vld [vmem:[#allocation2 + $0x8] sm:$0xff]  ;;  %s3539_s24 = sadd.s32 %s4717_s20, %s3775_s5 }
 0x285   : > { %1100 = vperm.xlu0 %4139, %v1090_v41   ;;  %v1175_v33 = vld [vmem:[#allocation7 + $0x10] sm:$0xff]  ;;  %v1176_v34 = vld [vmem:[#allocation7 + $0x18] sm:$0xff]  ;;  %s3776_s12 = sshll.u32 %s3539_s24, 7  ;;  %p6517_p7 = scmp.ne.s32.totalorder %s6514_s15, 0 }
 0x286   : > { %3855 = vmatpush3.bf16.msra.mxu0 %v3852_v38  ;;  %1128 = vperm.xlu1 %4140, %v1118_v42   ;;  %s6516_s27 = smov %s6515_s17  ;;  %s6393_s0 = scalar_lea.hbm %s6515_s17, %s3776_s12 }
 0x287   : > { %p4633_p6 = pnand %p4632_p3, %p6517_p7  ;;  %s4745_s20 = smov [#allocation10]  }
 0x288   : > { %s4635_s5 = sshll.u32 %s4745_s20, 4  ;;  %s4636_s5 = int_to_ptr.vmem [resolvable:$false] %s4635_s5 }
 0x289   : > { %3805 = vmatmul.mubr.msk.f32.vlgmr.msra.gmra.mrb[0].mxu0 %vm991_vm1, %v988_v43  ;;  %1105 = vperm.xlu0 %4139, %v1091_v44   ;;  %p4634_p8 = pneg %p4633_p6  ;;  %s4637_s24 = scalar_lea.vmem %s4636_s5, 1024 }
 0x28a   : > { %3807 = vmatprep.mubr.msk.f32.mxu0 %vm991_vm1, %v989_v45  ;;  %1110 = vperm.xlu1 %4140, %v1092_v46   ;;  %p4638_p9 = scmp.lt.s32.totalorder %s6395_s30, %s4636_s5  ;;  %p4639_p5 = scmp.lt.s32.totalorder %s4637_s24, %s4631_s21 }
 0x28c   : > { %p4640_p0 = por %p4639_p5, %p4638_p9 }
 0x28d   : > { %3808 = vmatmul.mubr.msk.f32.gmra.mrb[2].mxu0 %vm991_vm1, %v990_v47  ;;  %1133 = vperm.xlu0 %4139, %v1119_v48  }
 0x28e   : > { %1138 = vperm.xlu1 %4140, %v1120_v49   ;;  %3818 = vmatprep.mubr.msk.f32.mxu0 %vm991_vm1, %v1173_v51  ;;  %p4641_p4 = pnand %p4640_p0, %p4634_p8 }
 0x291   : > { %1183 = vperm.xlu0 %4139, %v1177_v50  }
 0x300   : > { %v1096_v53 = vpop.permute.xlu0 %1095 }
 0x301   : > { %v1124_v52 = vpop.permute.xlu1 %1123 }
 0x304   : > { %v1101_v55 = vpop.permute.xlu0 %1100 }
 0x305   : > { %v1129_v54 = vpop.permute.xlu1 %1128 }
 0x308   : > { %v1106_v58 = vpop.permute.xlu0 %1105 }
 0x309   : > { %v1111_v56 = vpop.permute.xlu1 %1110 }
 0x30c   : > { %v1134_v6 = vpop.permute.xlu0 %1133 }
 0x30d   : > { %v1139_v3 = vpop.permute.xlu1 %1138 }
 0x310   : > { %v1184_v37 = vpop.permute.xlu0 %1183 }
 0x35c   : > { %v3806_v57 = vpop.f32.mrb[0].mxu0 }
 0x35d   : > { %v1114_v59 = vmul.f32 %v3806_v57, %v1101_v55  ;;  %v1070_v60 = vpop.f32.mrb[1].mxu0 }
 0x35e   : > { %v1113_v61 = vmul.f32 %v1096_v53, %v1070_v60 }
 0x35f   : > { %v1142_v62 = vadd.f32 %v1129_v54, %v1114_v59 }
 0x360   : > { %v1141_v63 = vadd.f32 %v1124_v52, %v1113_v61  ;;  %v3809_v0 = vpop.f32.mrb[2].mxu0 }
 0x361   : > { %v3703_v7 = vmul.f32 -1.442695, %v1142_v62  ;;  %v1116_v1 = vmul.f32 %v3809_v0, %v1111_v56  ;;  %v1080_v2 = vpop.f32.mrb[3].mxu0 }
 0x362   : > { %v3702_v4 = vmul.f32 -1.442695, %v1141_v63  ;;  %v1115_v5 = vmul.f32 %v1106_v58, %v1080_v2 }
 0x363   : > { %4141 = vpow2.f32 %v3703_v7  ;;  %v1144_v8 = vadd.f32 %v1139_v3, %v1116_v1 }
 0x364   : > { %4143 = vpow2.f32 %v3702_v4  ;;  %v1143_v9 = vadd.f32 %v1134_v6, %v1115_v5 }
 0x365   : > { %v3705_v10 = vmul.f32 -1.442695, %v1144_v8 }
 0x366   : > { %v3704_v11 = vmul.f32 -1.442695, %v1143_v9 }
 0x367   : > { %4145 = vpow2.f32 %v3705_v10 }
 0x368   : > { %4147 = vpow2.f32 %v3704_v11 }
 0x36d   : > { %v4142_v12 = vpop.eup %4141 }
 0x36e   : > { %v4144_v13 = vpop.eup %4143  ;;  %v1158_v14 = vadd.f32 1.0, %v4142_v12 }
 0x36f   : > { %v1157_v15 = vadd.f32 1.0, %v4144_v13 }
 0x370   : > { %4149 = vrcp.f32 %v1158_v14 }
 0x371   : > { %v4146_v16 = vpop.eup %4145  ;;  %4151 = vrcp.f32 %v1157_v15 }
 0x372   : > { %v4148_v17 = vpop.eup %4147  ;;  %v1160_v18 = vadd.f32 1.0, %v4146_v16 }
 0x373   : > { %v1159_v19 = vadd.f32 1.0, %v4148_v17 }
 0x374   : > { %4153 = vrcp.f32 %v1160_v18 }
 0x375   : > { %4155 = vrcp.f32 %v1159_v19 }
 0x37a   : > { %v4150_v20 = vpop.eup %4149 }
 0x37b   : > { %v4152_v21 = vpop.eup %4151  ;;  %v1170_v22 = vmul.f32 %v4150_v20, %v1142_v62 }
 0x37c   : > { %v1169_v23 = vmul.f32 %v4152_v21, %v1141_v63 }
 0x37e   : > { %v4154_v24 = vpop.eup %4153  ;;  %v3856_v25 = vpack.c.bf16 %v1170_v22, %v1169_v23 }
 0x37f   : > { %v4156_v26 = vpop.eup %4155  ;;  %v1172_v27 = vmul.f32 %v4154_v24, %v1144_v8 }
 0x380   : > { %v1171_v28 = vmul.f32 %v4156_v26, %v1143_v9  ;;  %3857 = vmatprep.subr.bf16.mxu0 %v3856_v25 }
 0x381   : > { %3859 = vmatpush3.bf16.msra.mxu0 %v3856_v25 }
 0x382   : > { %v3860_v29 = vpack.c.bf16 %v1172_v27, %v1171_v28 }
 0x384   : > { %3861 = vmatprep.subr.bf16.mxu0 %v3860_v29 }
 0x385   : > { %3863 = vmatpush3.bf16.msra.mxu0 %v3860_v29 }
 0x386   : > { %1383 = vmatprep.subr.mxu0 %v1299_v31 }
 0x388   : > { %3819 = vmatmul.mubr.msk.f32.vlgmr.msra.gmra.mrb[4].mxu0 %vm991_vm1, %v1174_v30 }
 0x389   : > { %3821 = vmatprep.mubr.msk.f32.mxu0 %vm991_vm1, %v1175_v33  ;;  %1384 = vmatpush1.msra.mxu0 %v1298_v32 }
 0x38c   : > { %3822 = vmatmul.mubr.msk.f32.gmra.mrb[6].mxu0 %vm991_vm1, %v1176_v34 }
 0x38d   : > { %1447 = vmatprep.mubr.f32.mxu0 %v4744_v35 }
 0x45b   : > { %v5212_v36 = vpop.f32.mrb[4].mxu0 }
 0x45c   : > { %v1279_v38 = vpop.f32.mrb[5].mxu0 }
 0x45d   : > { %v1280_v39 = vadd.f32 %v1279_v38, %v1184_v37 }
 0x45f   : > { %1302 = vxpose.xlu1.b32.start.end [1/1] (short) %v1280_v39, 128  ;;  %v5214_v40 = vpop.f32.mrb[6].mxu0 }
 0x460   : > { %v5216_v41 = vpop.f32.mrb[7].mxu0 }
 0x4df   : > { %v1318_v42 = vpop.trf.xlu1 }
 0x4e0   : > { %3710 = vmatmul.mubr.msk.f32.vlgmr.msra.gmra.mrb[8].mxu0 %vm1334_vm2, %v1318_v42 }
 0x4e1   : > { %1453 = vmatprep.mubr.f32.mxu0 %v4744_v35 }
 0x4e3   : > { %v1319_v43 = vpop.trf.xlu1 }
 0x4e4   : > { %3711 = vmatmul.mubr.msk.f32.gmra.mrb[10].mxu0 %vm1334_vm2, %v1319_v43 }
 0x4e5   : > { %1459 = vmatprep.mubr.f32.mxu0 %v4744_v35 }
 0x4e7   : > { %v1320_v44 = vpop.trf.xlu1 }
 0x4e8   : > { %3712 = vmatmul.mubr.msk.f32.gmra.mrb[12].mxu0 %vm1334_vm2, %v1320_v44 }
 0x4e9   : > { %1465 = vmatprep.mubr.f32.mxu0 %v4744_v35 }
 0x4eb   : > { %v1321_v45 = vpop.trf.xlu1 }
 0x4ec   : > { %3713 = vmatmul.mubr.msk.f32.gmra.mrb[14].mxu0 %vm1334_vm2, %v1321_v45 }
 0x4ed   : > { %1471 = vmatprep.mubr.f32.mxu0 %v4744_v35 }
 0x4ef   : > { %v1322_v46 = vpop.trf.xlu1 }
 0x4f0   : > { %3714 = vmatmul.mubr.msk.f32.gmra.mrb[16].mxu0 %vm1334_vm2, %v1322_v46 }
 0x4f1   : > { %1477 = vmatprep.mubr.f32.mxu0 %v4744_v35 }
 0x4f3   : > { %v1323_v47 = vpop.trf.xlu1 }
 0x4f4   : > { %3715 = vmatmul.mubr.msk.f32.gmra.mrb[18].mxu0 %vm1334_vm2, %v1323_v47 }
 0x4f5   : > { %1483 = vmatprep.mubr.f32.mxu0 %v4744_v35 }
 0x4f7   : > { %v1324_v48 = vpop.trf.xlu1 }
 0x4f8   : > { %3716 = vmatmul.mubr.msk.f32.gmra.mrb[20].mxu0 %vm1334_vm2, %v1324_v48 }
 0x4f9   : > { %1489 = vmatprep.mubr.f32.mxu0 %v4744_v35 }
 0x4fb   : > { %v1325_v49 = vpop.trf.xlu1 }
 0x4fc   : > { %3717 = vmatmul.mubr.msk.f32.gmra.mrb[22].mxu0 %vm1334_vm2, %v1325_v49 }
 0x4fd   : > { %1495 = vmatprep.mubr.f32.mxu0 %v4744_v35 }
 0x4ff   : > { %v1326_v50 = vpop.trf.xlu1 }
 0x500   : > { %3718 = vmatmul.mubr.msk.f32.gmra.mrb[24].mxu0 %vm1334_vm2, %v1326_v50 }
 0x501   : > { %1501 = vmatprep.mubr.f32.mxu0 %v4744_v35 }
 0x503   : > { %v1327_v51 = vpop.trf.xlu1 }
 0x504   : > { %3719 = vmatmul.mubr.msk.f32.gmra.mrb[26].mxu0 %vm1334_vm2, %v1327_v51 }
 0x505   : > { %1507 = vmatprep.mubr.f32.mxu0 %v4744_v35 }
 0x507   : > { %v1328_v52 = vpop.trf.xlu1 }
 0x508   : > { %3720 = vmatmul.mubr.msk.f32.gmra.mrb[28].mxu0 %vm1334_vm2, %v1328_v52 }
 0x509   : > { %1513 = vmatprep.mubr.f32.mxu0 %v4744_v35 }
 0x50b   : > { %v1329_v53 = vpop.trf.xlu1 }
 0x50c   : > { %3721 = vmatmul.mubr.msk.f32.gmra.mrb[30].mxu0 %vm1334_vm2, %v1329_v53 }
 0x50d   : > { %1519 = vmatprep.mubr.f32.mxu0 %v4744_v35 }
 0x50f   : > { %v1330_v54 = vpop.trf.xlu1 }
 0x510   : > { %3722 = vmatmul.mubr.msk.f32.gmra.mrb[32].mxu0 %vm1334_vm2, %v1330_v54 }
 0x511   : > { %1525 = vmatprep.mubr.f32.mxu0 %v4744_v35 }
 0x513   : > { %v1331_v55 = vpop.trf.xlu1 }
 0x514   : > { %3723 = vmatmul.mubr.msk.f32.gmra.mrb[34].mxu0 %vm1334_vm2, %v1331_v55 }
 0x515   : > { %1531 = vmatprep.mubr.f32.mxu0 %v4744_v35 }
 0x517   : > { %v1332_v56 = vpop.trf.xlu1 }
 0x518   : > { %3724 = vmatmul.mubr.msk.f32.gmra.mrb[36].mxu0 %vm1334_vm2, %v1332_v56 }
 0x519   : > { %1537 = vmatprep.mubr.f32.mxu0 %v4744_v35 }
 0x51b   : > { %v1333_v57 = vpop.trf.xlu1 }
 0x51c   : > { %3725 = vmatmul.mubr.msk.f32.gmra.mrb[38].mxu0 %vm1334_vm2, %v1333_v57 }
 0x5b3   : > { %v5249_v58 = vpop.f32.mrb[8].mxu0 }
 0x5b4   : > { %v5251_v59 = vpop.f32.mrb[9].mxu0 }
 0x5b5   : > { %v1544_v60 = vmax.f32 %v5249_v58, %v5251_v59 }
 0x5b7   : > { %1545 = vmax.xlane.f32.xlu0 %v1544_v60  ;;  %v5255_v61 = vpop.f32.mrb[10].mxu0 }
 0x5b8   : > { %v5257_v62 = vpop.f32.mrb[11].mxu0 }
 0x5b9   : > { %v1547_v63 = vmax.f32 %v5255_v61, %v5257_v62 }
 0x5bb   : > { %1548 = vmax.xlane.f32.xlu0 %v1547_v63  ;;  %v5261_v0 = vpop.f32.mrb[12].mxu0 }
 0x5bc   : > { %v5263_v7 = vpop.f32.mrb[13].mxu0 }
 0x5bd   : > { %v1550_v1 = vmax.f32 %v5261_v0, %v5263_v7 }
 0x5bf   : > { %1551 = vmax.xlane.f32.xlu0 %v1550_v1  ;;  %v5267_v2 = vpop.f32.mrb[14].mxu0 }
 0x5c0   : > { %v5269_v3 = vpop.f32.mrb[15].mxu0 }
 0x5c1   : > { %v1553_v4 = vmax.f32 %v5267_v2, %v5269_v3 }
 0x5c3   : > { %1554 = vmax.xlane.f32.xlu1 %v1553_v4  ;;  %v5273_v5 = vpop.f32.mrb[16].mxu0 }
 0x5c4   : > { %v5275_v6 = vpop.f32.mrb[17].mxu0 }
 0x5c5   : > { %v1556_v8 = vmax.f32 %v5273_v5, %v5275_v6 }
 0x5c7   : > { %1557 = vmax.xlane.f32.xlu0 %v1556_v8  ;;  %v5279_v9 = vpop.f32.mrb[18].mxu0 }
 0x5c8   : > { %v5281_v10 = vpop.f32.mrb[19].mxu0 }
 0x5c9   : > { %v1559_v11 = vmax.f32 %v5279_v9, %v5281_v10 }
 0x5cb   : > { %1560 = vmax.xlane.f32.xlu0 %v1559_v11  ;;  %v5285_v12 = vpop.f32.mrb[20].mxu0 }
 0x5cc   : > { %v5287_v13 = vpop.f32.mrb[21].mxu0 }
 0x5cd   : > { %v1562_v14 = vmax.f32 %v5285_v12, %v5287_v13 }
 0x5cf   : > { %1563 = vmax.xlane.f32.xlu0 %v1562_v14  ;;  %v5291_v15 = vpop.f32.mrb[22].mxu0 }
 0x5d0   : > { %v5293_v16 = vpop.f32.mrb[23].mxu0 }
 0x5d1   : > { %v1565_v17 = vmax.f32 %v5291_v15, %v5293_v16 }
 0x5d3   : > { %1566 = vmax.xlane.f32.xlu0 %v1565_v17  ;;  %v5297_v18 = vpop.f32.mrb[24].mxu0 }
 0x5d4   : > { %v5299_v19 = vpop.f32.mrb[25].mxu0 }
 0x5d5   : > { %v1568_v20 = vmax.f32 %v5297_v18, %v5299_v19 }
 0x5d7   : > { %1569 = vmax.xlane.f32.xlu0 %v1568_v20  ;;  %v5303_v21 = vpop.f32.mrb[26].mxu0 }
 0x5d8   : > { %v5305_v22 = vpop.f32.mrb[27].mxu0 }
 0x5d9   : > { %v1571_v23 = vmax.f32 %v5303_v21, %v5305_v22 }
 0x5db   : > { %1572 = vmax.xlane.f32.xlu0 %v1571_v23  ;;  %v5309_v24 = vpop.f32.mrb[28].mxu0 }
 0x5dc   : > { %v5311_v25 = vpop.f32.mrb[29].mxu0 }
 0x5dd   : > { %v1574_v26 = vmax.f32 %v5309_v24, %v5311_v25 }
 0x5df   : > { %1575 = vmax.xlane.f32.xlu0 %v1574_v26  ;;  %v5315_v27 = vpop.f32.mrb[30].mxu0 }
 0x5e0   : > { %v5317_v28 = vpop.f32.mrb[31].mxu0 }
 0x5e1   : > { %v1577_v29 = vmax.f32 %v5315_v27, %v5317_v28 }
 0x5e3   : > { %1578 = vmax.xlane.f32.xlu0 %v1577_v29  ;;  %v5321_v30 = vpop.f32.mrb[32].mxu0 }
 0x5e4   : > { %v5323_v31 = vpop.f32.mrb[33].mxu0 }
 0x5e5   : > { %v1580_v32 = vmax.f32 %v5321_v30, %v5323_v31 }
 0x5e7   : > { %1581 = vmax.xlane.f32.xlu0 %v1580_v32  ;;  %v5327_v33 = vpop.f32.mrb[34].mxu0 }
 0x5e8   : > { %v5329_v34 = vpop.f32.mrb[35].mxu0 }
 0x5e9   : > { %v1583_v37 = vmax.f32 %v5327_v33, %v5329_v34 }
 0x5eb   : > { %1584 = vmax.xlane.f32.xlu0 %v1583_v37  ;;  %v5333_v38 = vpop.f32.mrb[36].mxu0 }
 0x5ec   : > { %v5335_v39 = vpop.f32.mrb[37].mxu0 }
 0x5ed   : > { %v1586_v42 = vmax.f32 %v5333_v38, %v5335_v39 }
 0x5ef   : > { %1587 = vmax.xlane.f32.xlu0 %v1586_v42  ;;  %v5339_v43 = vpop.f32.mrb[38].mxu0 }
 0x5f0   : > { %v5341_v44 = vpop.f32.mrb[39].mxu0 }
 0x5f1   : > { %v1589_v45 = vmax.f32 %v5339_v43, %v5341_v44 }
 0x5f3   : > { %1590 = vmax.xlane.f32.xlu0 %v1589_v45 }
 0x644   : > { %v1546_v46 = vpop.xlane.xlu0 %1545 }
 0x645   : > { %v1592_v47 = vsub.f32 %v5249_v58, %v1546_v46  ;;  %v1593_v48 = vsub.f32 %v5251_v59, %v1546_v46 }
 0x647   : > { %v1624_v49 = vmul.f32 1.442695, %v1592_v47  ;;  %v1626_v50 = vmul.f32 1.442695, %v1593_v48 }
 0x648   : > { %v1549_v51 = vpop.xlane.xlu0 %1548 }
 0x649   : > { %4157 = vpow2.f32 %v1624_v49  ;;  %v1594_v52 = vsub.f32 %v5255_v61, %v1549_v51  ;;  %v1595_v53 = vsub.f32 %v5257_v62, %v1549_v51 }
 0x64a   : > { %4159 = vpow2.f32 %v1626_v50 }
 0x64b   : > { %v1628_v54 = vmul.f32 1.442695, %v1594_v52  ;;  %v1630_v55 = vmul.f32 1.442695, %v1595_v53 }
 0x64c   : > { %v1552_v56 = vpop.xlane.xlu0 %1551 }
 0x64d   : > { %4161 = vpow2.f32 %v1628_v54  ;;  %v1596_v57 = vsub.f32 %v5261_v0, %v1552_v56  ;;  %v1597_v60 = vsub.f32 %v5263_v7, %v1552_v56 }
 0x64e   : > { %4163 = vpow2.f32 %v1630_v55 }
 0x64f   : > { %v1632_v58 = vmul.f32 1.442695, %v1596_v57  ;;  %v1634_v59 = vmul.f32 1.442695, %v1597_v60 }
 0x650   : > { %v1555_v63 = vpop.xlane.xlu1 %1554 }
 0x651   : > { %4165 = vpow2.f32 %v1632_v58  ;;  %v1598_v1 = vsub.f32 %v5267_v2, %v1555_v63  ;;  %v1599_v61 = vsub.f32 %v5269_v3, %v1555_v63 }
 0x652   : > { %4167 = vpow2.f32 %v1634_v59 }
 0x653   : > { %v5353_v62 = vpop.eup %4157  ;;  %v1636_v4 = vmul.f32 1.442695, %v1598_v1  ;;  %v1638_v8 = vmul.f32 1.442695, %v1599_v61 }
 0x654   : > { %v5355_v11 = vpop.eup %4159  ;;  %v1558_v14 = vpop.xlane.xlu0 %1557 }
 0x655   : > { %4169 = vpow2.f32 %v1636_v4  ;;  %v1600_v0 = vsub.f32 %v5273_v5, %v1558_v14  ;;  %v1601_v7 = vsub.f32 %v5275_v6, %v1558_v14  ;;  %v1688_v17 = vadd.f32 %v5355_v11, %v5353_v62 }
 0x656   : > { %4171 = vpow2.f32 %v1638_v8 }
 0x657   : > { %v5361_v2 = vpop.eup %4161  ;;  %v1640_v3 = vmul.f32 1.442695, %v1600_v0  ;;  %v1642_v20 = vmul.f32 1.442695, %v1601_v7  ;;  %1689 = vadd.xlane.f32.xlu0 %v1688_v17 }
 0x658   : > { %v5363_v23 = vpop.eup %4163  ;;  %v1561_v26 = vpop.xlane.xlu0 %1560 }
 0x659   : > { %4173 = vpow2.f32 %v1640_v3  ;;  %v1602_v29 = vsub.f32 %v5279_v9, %v1561_v26  ;;  %v1603_v32 = vsub.f32 %v5281_v10, %v1561_v26  ;;  %v1691_v5 = vadd.f32 %v5363_v23, %v5361_v2 }
 0x65a   : > { %4175 = vpow2.f32 %v1642_v20 }
 0x65b   : > { %v5369_v6 = vpop.eup %4165  ;;  %v1644_v37 = vmul.f32 1.442695, %v1602_v29  ;;  %v1646_v42 = vmul.f32 1.442695, %v1603_v32  ;;  %1692 = vadd.xlane.f32.xlu0 %v1691_v5 }
 0x65c   : > { %v5371_v45 = vpop.eup %4167  ;;  %v1564_v46 = vpop.xlane.xlu0 %1563 }
 0x65d   : > { %4177 = vpow2.f32 %v1644_v37  ;;  %v1604_v47 = vsub.f32 %v5285_v12, %v1564_v46  ;;  %v1605_v48 = vsub.f32 %v5287_v13, %v1564_v46  ;;  %v1694_v9 = vadd.f32 %v5371_v45, %v5369_v6 }
 0x65e   : > { %4179 = vpow2.f32 %v1646_v42 }
 0x65f   : > { %v5377_v10 = vpop.eup %4169  ;;  %v1648_v49 = vmul.f32 1.442695, %v1604_v47  ;;  %v1650_v50 = vmul.f32 1.442695, %v1605_v48  ;;  %1695 = vadd.xlane.f32.xlu0 %v1694_v9 }
 0x660   : > { %v5379_v51 = vpop.eup %4171  ;;  %v1567_v52 = vpop.xlane.xlu0 %1566 }
 0x661   : > { %4181 = vpow2.f32 %v1648_v49  ;;  %v1606_v53 = vsub.f32 %v5291_v15, %v1567_v52  ;;  %v1607_v54 = vsub.f32 %v5293_v16, %v1567_v52  ;;  %v1697_v12 = vadd.f32 %v5379_v51, %v5377_v10 }
 0x662   : > { %4183 = vpow2.f32 %v1650_v50 }
 0x663   : > { %v5385_v13 = vpop.eup %4173  ;;  %v1652_v55 = vmul.f32 1.442695, %v1606_v53  ;;  %v1654_v56 = vmul.f32 1.442695, %v1607_v54  ;;  %1698 = vadd.xlane.f32.xlu0 %v1697_v12 }
 0x664   : > { %v5387_v57 = vpop.eup %4175  ;;  %v1570_v60 = vpop.xlane.xlu0 %1569 }
 0x665   : > { %4185 = vpow2.f32 %v1652_v55  ;;  %v1608_v58 = vsub.f32 %v5297_v18, %v1570_v60  ;;  %v1609_v59 = vsub.f32 %v5299_v19, %v1570_v60  ;;  %v1700_v15 = vadd.f32 %v5387_v57, %v5385_v13 }
 0x666   : > { %4187 = vpow2.f32 %v1654_v56 }
 0x667   : > { %v5393_v16 = vpop.eup %4177  ;;  %v1656_v63 = vmul.f32 1.442695, %v1608_v58  ;;  %v1658_v1 = vmul.f32 1.442695, %v1609_v59  ;;  %1701 = vadd.xlane.f32.xlu0 %v1700_v15 }
 0x668   : > { %v5395_v61 = vpop.eup %4179  ;;  %v1573_v4 = vpop.xlane.xlu0 %1572 }
 0x669   : > { %4189 = vpow2.f32 %v1656_v63  ;;  %v1610_v8 = vsub.f32 %v5303_v21, %v1573_v4  ;;  %v1611_v14 = vsub.f32 %v5305_v22, %v1573_v4  ;;  %v1703_v18 = vadd.f32 %v5395_v61, %v5393_v16 }
 0x66a   : > { %4191 = vpow2.f32 %v1658_v1 }
 0x66b   : > { %v5401_v19 = vpop.eup %4181  ;;  %v1660_v0 = vmul.f32 1.442695, %v1610_v8  ;;  %v1662_v7 = vmul.f32 1.442695, %v1611_v14  ;;  %1704 = vadd.xlane.f32.xlu0 %v1703_v18 }
 0x66c   : > { %v5403_v17 = vpop.eup %4183  ;;  %v1576_v3 = vpop.xlane.xlu0 %1575 }
 0x66d   : > { %4193 = vpow2.f32 %v1660_v0  ;;  %v1612_v20 = vsub.f32 %v5309_v24, %v1576_v3  ;;  %v1613_v26 = vsub.f32 %v5311_v25, %v1576_v3  ;;  %v1706_v21 = vadd.f32 %v5403_v17, %v5401_v19 }
 0x66e   : > { %4195 = vpow2.f32 %v1662_v7 }
 0x66f   : > { %v5409_v22 = vpop.eup %4185  ;;  %v1664_v29 = vmul.f32 1.442695, %v1612_v20  ;;  %v1666_v32 = vmul.f32 1.442695, %v1613_v26  ;;  %1707 = vadd.xlane.f32.xlu0 %v1706_v21 }
 0x670   : > { %v5411_v5 = vpop.eup %4187  ;;  %v1579_v37 = vpop.xlane.xlu0 %1578 }
 0x671   : > { %4197 = vpow2.f32 %v1664_v29  ;;  %v1614_v42 = vsub.f32 %v5315_v27, %v1579_v37  ;;  %v1615_v46 = vsub.f32 %v5317_v28, %v1579_v37  ;;  %v1709_v24 = vadd.f32 %v5411_v5, %v5409_v22 }
 0x672   : > { %4199 = vpow2.f32 %v1666_v32 }
 0x673   : > { %v5417_v25 = vpop.eup %4189  ;;  %v1668_v47 = vmul.f32 1.442695, %v1614_v42  ;;  %v1670_v48 = vmul.f32 1.442695, %v1615_v46  ;;  %1710 = vadd.xlane.f32.xlu0 %v1709_v24 }
 0x674   : > { %v5419_v9 = vpop.eup %4191  ;;  %v1582_v49 = vpop.xlane.xlu0 %1581 }
 0x675   : > { %4201 = vpow2.f32 %v1668_v47  ;;  %v1616_v50 = vsub.f32 %v5321_v30, %v1582_v49  ;;  %v1617_v52 = vsub.f32 %v5323_v31, %v1582_v49  ;;  %v1712_v27 = vadd.f32 %v5419_v9, %v5417_v25  ;;  %v1178_v49 = vld [vmem:[%s6513_s16 + $0x8] sm:$0xff] }
 0x676   : > { %4203 = vpow2.f32 %v1670_v48 }
 0x677   : > { %v5425_v28 = vpop.eup %4193  ;;  %v1672_v53 = vmul.f32 1.442695, %v1616_v50  ;;  %v1674_v54 = vmul.f32 1.442695, %v1617_v52  ;;  %1713 = vadd.xlane.f32.xlu0 %v1712_v27  ;;  %v1301_v50 = vld [vmem:[#allocation3 + $0x8] sm:$0xff] }
 0x678   : > { %v5427_v12 = vpop.eup %4195  ;;  %v1585_v55 = vpop.xlane.xlu0 %1584  ;;  %1848 = vmatprep.mubr.f32.mxu1 %v1301_v50 }
 0x679   : > { %4205 = vpow2.f32 %v1672_v53  ;;  %v1618_v56 = vsub.f32 %v5327_v33, %v1585_v55  ;;  %v1619_v60 = vsub.f32 %v5329_v34, %v1585_v55  ;;  %v1715_v30 = vadd.f32 %v5427_v12, %v5425_v28 }
 0x67a   : > { %4207 = vpow2.f32 %v1674_v54 }
 0x67b   : > { %v5433_v31 = vpop.eup %4197  ;;  %v1676_v58 = vmul.f32 1.442695, %v1618_v56  ;;  %v1678_v59 = vmul.f32 1.442695, %v1619_v60  ;;  %1716 = vadd.xlane.f32.xlu0 %v1715_v30 }
 0x67c   : > { %v5435_v15 = vpop.eup %4199  ;;  %v1588_v63 = vpop.xlane.xlu0 %1587 }
 0x67d   : > { %4209 = vpow2.f32 %v1676_v58  ;;  %v1620_v1 = vsub.f32 %v5333_v38, %v1588_v63  ;;  %v1621_v4 = vsub.f32 %v5335_v39, %v1588_v63  ;;  %v1718_v33 = vadd.f32 %v5435_v15, %v5433_v31 }
 0x67e   : > { %4211 = vpow2.f32 %v1678_v59 }
 0x67f   : > { %v5441_v34 = vpop.eup %4201  ;;  %v1680_v8 = vmul.f32 1.442695, %v1620_v1  ;;  %v1682_v14 = vmul.f32 1.442695, %v1621_v4  ;;  %1719 = vadd.xlane.f32.xlu0 %v1718_v33 }
 0x680   : > { %v5443_v18 = vpop.eup %4203  ;;  %v1591_v0 = vpop.xlane.xlu0 %1590 }
 0x681   : > { %4213 = vpow2.f32 %v1680_v8  ;;  %v1622_v7 = vsub.f32 %v5339_v43, %v1591_v0  ;;  %v1623_v3 = vsub.f32 %v5341_v44, %v1591_v0  ;;  %v1721_v38 = vadd.f32 %v5443_v18, %v5441_v34 }
 0x682   : > { %4215 = vpow2.f32 %v1682_v14 }
 0x683   : > { %v5449_v39 = vpop.eup %4205  ;;  %v1684_v20 = vmul.f32 1.442695, %v1622_v7  ;;  %v1686_v26 = vmul.f32 1.442695, %v1623_v3  ;;  %1722 = vadd.xlane.f32.xlu0 %v1721_v38 }
 0x684   : > { %v5451_v21 = vpop.eup %4207 }
 0x685   : > { %4217 = vpow2.f32 %v1684_v20  ;;  %v1724_v29 = vadd.f32 %v5451_v21, %v5449_v39 }
 0x686   : > { %4219 = vpow2.f32 %v1686_v26 }
 0x687   : > { %v5455_v32 = vpop.eup %4209  ;;  %1725 = vadd.xlane.f32.xlu0 %v1724_v29 }
 0x688   : > { %v5457_v43 = vpop.eup %4211 }
 0x689   : > { %v1727_v44 = vadd.f32 %v5457_v43, %v5455_v32 }
 0x68b   : > { %v5461_v37 = vpop.eup %4213  ;;  %1728 = vadd.xlane.f32.xlu1 %v1727_v44 }
 0x68c   : > { %v5463_v42 = vpop.eup %4215 }
 0x68d   : > { %v1730_v46 = vadd.f32 %v5463_v42, %v5461_v37 }
 0x68f   : > { %v5467_v24 = vpop.eup %4217  ;;  %1731 = vadd.xlane.f32.xlu1 %v1730_v46 }
 0x690   : > { %v5469_v47 = vpop.eup %4219 }
 0x691   : > { %v1733_v48 = vadd.f32 %v5469_v47, %v5467_v24 }
 0x693   : > { %1734 = vadd.xlane.f32.xlu1 %v1733_v48 }
 0x69d   : > { %1188 = vperm.xlu0 %4139, %v1178_v49  }
 0x6e4   : > { %v1690_v52 = vpop.xlane.xlu0 %1689 }
 0x6e5   : > { %4221 = vrcp.f32 %v1690_v52 }
 0x6e8   : > { %v1693_v27 = vpop.xlane.xlu0 %1692 }
 0x6e9   : > { %4223 = vrcp.f32 %v1693_v27 }
 0x6ec   : > { %v1696_v53 = vpop.xlane.xlu0 %1695 }
 0x6ed   : > { %4225 = vrcp.f32 %v1696_v53 }
 0x6ef   : > { %v4222_v55 = vpop.eup %4221 }
 0x6f0   : > { %v1699_v54 = vpop.xlane.xlu0 %1698  ;;  %v1738_v30 = vmul.f32 %v4222_v55, %v5355_v11  ;;  %v1737_v59 = vmul.f32 %v4222_v55, %v5353_v62 }
 0x6f1   : > { %4227 = vrcp.f32 %v1699_v54 }
 0x6f3   : > { %v4224_v56 = vpop.eup %4223 }
 0x6f4   : > { %v1702_v60 = vpop.xlane.xlu0 %1701  ;;  %v1741_v58 = vmul.f32 %v4224_v56, %v5363_v23  ;;  %v1740_v63 = vmul.f32 %v4224_v56, %v5361_v2 }
 0x6f5   : > { %4229 = vrcp.f32 %v1702_v60 }
 0x6f6   : > { %v3864_v1 = vpack.c.bf16 %v1741_v58, %v1738_v30  ;;  %v3866_v4 = vpack.c.bf16 %v1740_v63, %v1737_v59 }
 0x6f7   : > { %v4226_v8 = vpop.eup %4225 }
 0x6f8   : > { %3865 = vmatprep.subr.bf16.mxu1 %v3864_v1  ;;  %v1705_v33 = vpop.xlane.xlu0 %1704  ;;  %v1744_v7 = vmul.f32 %v4226_v8, %v5371_v45  ;;  %v1743_v23 = vmul.f32 %v4226_v8, %v5369_v6 }
 0x6f9   : > { %4231 = vrcp.f32 %v1705_v33  ;;  %3867 = vmatpush1.bf16.xpose.msra.mxu1 %v3866_v4 }
 0x6fb   : > { %v4228_v14 = vpop.eup %4227 }
 0x6fc   : > { %v1708_v0 = vpop.xlane.xlu0 %1707  ;;  %v1747_v11 = vmul.f32 %v4228_v14, %v5379_v51  ;;  %v1746_v62 = vmul.f32 %v4228_v14, %v5377_v10 }
 0x6fd   : > { %4233 = vrcp.f32 %v1708_v0 }
 0x6fe   : > { %v3868_v3 = vpack.c.bf16 %v1747_v11, %v1744_v7  ;;  %v3870_v2 = vpack.c.bf16 %v1746_v62, %v1743_v23 }
 0x6ff   : > { %v4230_v20 = vpop.eup %4229 }
 0x700   : > { %3869 = vmatprep.subr.bf16.mxu1 %v3868_v3  ;;  %v1711_v38 = vpop.xlane.xlu0 %1710  ;;  %v1750_v44 = vmul.f32 %v4230_v20, %v5387_v57  ;;  %v1749_v51 = vmul.f32 %v4230_v20, %v5385_v13 }
 0x701   : > { %4235 = vrcp.f32 %v1711_v38  ;;  %3871 = vmatpush1.bf16.xpose.msra.mxu1 %v3870_v2 }
 0x703   : > { %v4232_v26 = vpop.eup %4231 }
 0x704   : > { %v1714_v29 = vpop.xlane.xlu0 %1713  ;;  %v1753_v45 = vmul.f32 %v4232_v26, %v5395_v61  ;;  %v1752_v6 = vmul.f32 %v4232_v26, %v5393_v16 }
 0x705   : > { %4237 = vrcp.f32 %v1714_v29 }
 0x706   : > { %v3872_v46 = vpack.c.bf16 %v1753_v45, %v1750_v44  ;;  %v3874_v10 = vpack.c.bf16 %v1752_v6, %v1749_v51  ;;  %v1855_v44 = vld [vmem:[#allocation2 + $0x18] sm:$0xff] }
 0x707   : > { %v4234_v49 = vpop.eup %4233 }
 0x708   : > { %3873 = vmatprep.subr.bf16.mxu1 %v3872_v46  ;;  %v1717_v48 = vpop.xlane.xlu0 %1716  ;;  %v1756_v27 = vmul.f32 %v4234_v49, %v5403_v17  ;;  %v1755_v61 = vmul.f32 %v4234_v49, %v5401_v19 }
 0x709   : > { %4239 = vrcp.f32 %v1717_v48  ;;  %3875 = vmatpush1.bf16.xpose.msra.mxu1 %v3874_v10 }
 0x70b   : > { %v4236_v50 = vpop.eup %4235 }
 0x70c   : > { %v1720_v52 = vpop.xlane.xlu0 %1719  ;;  %v1759_v57 = vmul.f32 %v4236_v50, %v5411_v5  ;;  %v1758_v13 = vmul.f32 %v4236_v50, %v5409_v22 }
 0x70d   : > { %4241 = vrcp.f32 %v1720_v52 }
 0x70e   : > { %v3876_v53 = vpack.c.bf16 %v1759_v57, %v1756_v27  ;;  %v3878_v16 = vpack.c.bf16 %v1758_v13, %v1755_v61 }
 0x70f   : > { %v4238_v55 = vpop.eup %4237 }
 0x710   : > { %3877 = vmatprep.subr.bf16.mxu1 %v3876_v53  ;;  %v1723_v54 = vpop.xlane.xlu0 %1722  ;;  %v1762_v30 = vmul.f32 %v4238_v55, %v5419_v9  ;;  %v1761_v5 = vmul.f32 %v4238_v55, %v5417_v25  ;;  %v4541_v53 = vld [vmem:[%s5030_s6] sm:$0xff] }
 0x711   : > { %4243 = vrcp.f32 %v1723_v54  ;;  %3879 = vmatpush1.bf16.xpose.msra.mxu1 %v3878_v16 }
 0x713   : > { %v4240_v56 = vpop.eup %4239 }
 0x714   : > { %v1726_v60 = vpop.xlane.xlu0 %1725  ;;  %v1765_v17 = vmul.f32 %v4240_v56, %v5427_v12  ;;  %v1764_v19 = vmul.f32 %v4240_v56, %v5425_v28 }
 0x715   : > { %4245 = vrcp.f32 %v1726_v60 }
 0x716   : > { %v3880_v58 = vpack.c.bf16 %v1765_v17, %v1762_v30  ;;  %v3882_v22 = vpack.c.bf16 %v1764_v19, %v1761_v5 }
 0x717   : > { %v4242_v63 = vpop.eup %4241 }
 0x718   : > { %3881 = vmatprep.subr.bf16.mxu1 %v3880_v58  ;;  %v1729_v59 = vpop.xlane.xlu1 %1728  ;;  %v1768_v8 = vmul.f32 %v4242_v63, %v5435_v15  ;;  %v1767_v12 = vmul.f32 %v4242_v63, %v5433_v31 }
 0x719   : > { %4247 = vrcp.f32 %v1729_v59  ;;  %3883 = vmatpush1.bf16.xpose.msra.mxu1 %v3882_v22 }
 0x71b   : > { %v4244_v1 = vpop.eup %4243 }
 0x71c   : > { %v1189_v4 = vpop.permute.xlu0 %1188  ;;  %v1732_v33 = vpop.xlane.xlu1 %1731  ;;  %v1771_v9 = vmul.f32 %v4244_v1, %v5443_v18  ;;  %v1770_v25 = vmul.f32 %v4244_v1, %v5441_v34 }
 0x71d   : > { %v1285_v28 = vadd.f32 %v5212_v36, %v1189_v4  ;;  %4249 = vrcp.f32 %v1732_v33 }
 0x71e   : > { %v3884_v14 = vpack.c.bf16 %v1771_v9, %v1768_v8  ;;  %v3886_v0 = vpack.c.bf16 %v1770_v25, %v1767_v12 }
 0x71f   : > { %1858 = vxpose.xlu1.b32.start.end [1/1] (short) %v1285_v28, 128  ;;  %v4246_v11 = vpop.eup %4245 }
 0x720   : > { %3885 = vmatprep.subr.bf16.mxu1 %v3884_v14  ;;  %v1735_v7 = vpop.xlane.xlu1 %1734  ;;  %v1774_v15 = vmul.f32 %v4246_v11, %v5451_v21  ;;  %v1773_v31 = vmul.f32 %v4246_v11, %v5449_v39  ;;  %v1300_v39 = vld [vmem:[#allocation3] sm:$0xff] }
 0x721   : > { %4251 = vrcp.f32 %v1735_v7  ;;  %3887 = vmatpush1.bf16.xpose.msra.mxu1 %v3886_v0 }
 0x723   : > { %v4248_v23 = vpop.eup %4247 }
 0x724   : > { %v1777_v18 = vmul.f32 %v4248_v23, %v5457_v43  ;;  %v1776_v34 = vmul.f32 %v4248_v23, %v5455_v32  ;;  %v1854_v32 = vld [vmem:[#allocation2 + $0x10] sm:$0xff] }
 0x726   : > { %v3888_v62 = vpack.c.bf16 %v1777_v18, %v1774_v15  ;;  %v3890_v36 = vpack.c.bf16 %v1776_v34, %v1773_v31 }
 0x727   : > { %v4250_v3 = vpop.eup %4249 }
 0x728   : > { %3889 = vmatprep.subr.bf16.mxu1 %v3888_v62  ;;  %v1780_v38 = vmul.f32 %v4250_v3, %v5463_v42  ;;  %v1779_v26 = vmul.f32 %v4250_v3, %v5461_v37 }
 0x729   : > { %3891 = vmatpush1.bf16.xpose.msra.mxu1 %v3890_v36 }
 0x72b   : > { %v4252_v2 = vpop.eup %4251 }
 0x72c   : > { %v1783_v20 = vmul.f32 %v4252_v2, %v5469_v47  ;;  %v1782_v21 = vmul.f32 %v4252_v2, %v5467_v24 }
 0x72e   : > { %v3892_v29 = vpack.c.bf16 %v1783_v20, %v1780_v38  ;;  %v3894_v43 = vpack.c.bf16 %v1782_v21, %v1779_v26 }
 0x730   : > { %3893 = vmatprep.subr.bf16.mxu1 %v3892_v29 }
 0x731   : > { %3895 = vmatpush1.bf16.xpose.msra.mxu1 %v3894_v43 }
 0x732   : > { %1938 = vmatprep.subr.mxu1 %v1855_v44 }
 0x738   : > { %1849 = vmatmul.mubr.f32.vlgmr.msra.gmra.mrb[0].mxu1 %v1300_v39 }
 0x739   : > { %1939 = vmatpush1.msra.mxu1 %v1854_v32  ;;  %2002 = vmatprep.mubr.f32.mxu1 %v4744_v35 }
 0x79f   : > { %v1874_v45 = vpop.trf.xlu1 }
 0x7a0   : > { %3726 = vmatmul.mubr.msk.f32.vlgmr.msra.gmra.mrb[2].mxu1 %vm1334_vm2, %v1874_v45 }
 0x7a1   : > { %2008 = vmatprep.mubr.f32.mxu1 %v4744_v35 }
 0x7a3   : > { %v1875_v37 = vpop.trf.xlu1 }
 0x7a4   : > { %3727 = vmatmul.mubr.msk.f32.gmra.mrb[4].mxu1 %vm1334_vm2, %v1875_v37 }
 0x7a5   : > { %2014 = vmatprep.mubr.f32.mxu1 %v4744_v35 }
 0x7a7   : > { %v1876_v42 = vpop.trf.xlu1 }
 0x7a8   : > { %3728 = vmatmul.mubr.msk.f32.gmra.mrb[6].mxu1 %vm1334_vm2, %v1876_v42 }
 0x7a9   : > { %2020 = vmatprep.mubr.f32.mxu1 %v4744_v35 }
 0x7ab   : > { %v1877_v24 = vpop.trf.xlu1 }
 0x7ac   : > { %3729 = vmatmul.mubr.msk.f32.gmra.mrb[8].mxu1 %vm1334_vm2, %v1877_v24 }
 0x7ad   : > { %2026 = vmatprep.mubr.f32.mxu1 %v4744_v35 }
 0x7af   : > { %v1878_v47 = vpop.trf.xlu1 }
 0x7b0   : > { %3730 = vmatmul.mubr.msk.f32.gmra.mrb[10].mxu1 %vm1334_vm2, %v1878_v47 }
 0x7b1   : > { %2032 = vmatprep.mubr.f32.mxu1 %v4744_v35 }
 0x7b3   : > { %v1879_v51 = vpop.trf.xlu1 }
 0x7b4   : > { %3731 = vmatmul.mubr.msk.f32.gmra.mrb[12].mxu1 %vm1334_vm2, %v1879_v51 }
 0x7b5   : > { %2038 = vmatprep.mubr.f32.mxu1 %v4744_v35 }
 0x7b7   : > { %v1880_v6 = vpop.trf.xlu1 }
 0x7b8   : > { %3732 = vmatmul.mubr.msk.f32.gmra.mrb[14].mxu1 %vm1334_vm2, %v1880_v6 }
 0x7b9   : > { %2044 = vmatprep.mubr.f32.mxu1 %v4744_v35 }
 0x7bb   : > { %v1881_v46 = vpop.trf.xlu1 }
 0x7bc   : > { %3733 = vmatmul.mubr.msk.f32.gmra.mrb[16].mxu1 %vm1334_vm2, %v1881_v46 }
 0x7bd   : > { %2050 = vmatprep.mubr.f32.mxu1 %v4744_v35 }
 0x7bf   : > { %v1882_v10 = vpop.trf.xlu1 }
 0x7c0   : > { %3734 = vmatmul.mubr.msk.f32.gmra.mrb[18].mxu1 %vm1334_vm2, %v1882_v10 }
 0x7c1   : > { %2056 = vmatprep.mubr.f32.mxu1 %v4744_v35 }
 0x7c3   : > { %v1883_v48 = vpop.trf.xlu1 }
 0x7c4   : > { %3735 = vmatmul.mubr.msk.f32.gmra.mrb[20].mxu1 %vm1334_vm2, %v1883_v48 }
 0x7c5   : > { %2062 = vmatprep.mubr.f32.mxu1 %v4744_v35 }
 0x7c7   : > { %v1884_v49 = vpop.trf.xlu1 }
 0x7c8   : > { %3736 = vmatmul.mubr.msk.f32.gmra.mrb[22].mxu1 %vm1334_vm2, %v1884_v49 }
 0x7c9   : > { %2068 = vmatprep.mubr.f32.mxu1 %v4744_v35 }
 0x7cb   : > { %v1885_v50 = vpop.trf.xlu1 }
 0x7cc   : > { %3737 = vmatmul.mubr.msk.f32.gmra.mrb[24].mxu1 %vm1334_vm2, %v1885_v50 }
 0x7cd   : > { %2074 = vmatprep.mubr.f32.mxu1 %v4744_v35 }
 0x7cf   : > { %v1886_v52 = vpop.trf.xlu1 }
 0x7d0   : > { %3738 = vmatmul.mubr.msk.f32.gmra.mrb[26].mxu1 %vm1334_vm2, %v1886_v52 }
 0x7d1   : > { %2080 = vmatprep.mubr.f32.mxu1 %v4744_v35 }
 0x7d3   : > { %v1887_v27 = vpop.trf.xlu1 }
 0x7d4   : > { %3739 = vmatmul.mubr.msk.f32.gmra.mrb[28].mxu1 %vm1334_vm2, %v1887_v27 }
 0x7d5   : > { %2086 = vmatprep.mubr.f32.mxu1 %v4744_v35 }
 0x7d7   : > { %v1888_v57 = vpop.trf.xlu1 }
 0x7d8   : > { %3740 = vmatmul.mubr.msk.f32.gmra.mrb[30].mxu1 %vm1334_vm2, %v1888_v57 }
 0x7d9   : > { %2092 = vmatprep.mubr.f32.mxu1 %v4744_v35 }
 0x7db   : > { %v1889_v61 = vpop.trf.xlu1 }
 0x7dc   : > { %3741 = vmatmul.mubr.msk.f32.gmra.mrb[32].mxu1 %vm1334_vm2, %v1889_v61 }
 0x80b   : > { %v1850_v13 = vpop.f32.mrb[0].mxu1 }
 0x80c   : > { %v3519_v16 = vadd.f32 %v4541_v53, %v1850_v13  ;;  %v1852_v54 = vpop.f32.mrb[1].mxu1 }
 0x80e   : > { %3523 = vst [vmem:[%s5045_s11] sm:$0xff] %v3519_v16 }
 0x873   : > { %v5543_v55 = vpop.f32.mrb[2].mxu1 }
 0x874   : > { %v5545_v56 = vpop.f32.mrb[3].mxu1 }
 0x875   : > { %v2099_v60 = vmax.f32 %v5543_v55, %v5545_v56 }
 0x877   : > { %2100 = vmax.xlane.f32.xlu0 %v2099_v60  ;;  %v5549_v30 = vpop.f32.mrb[4].mxu1 }
 0x878   : > { %v5551_v17 = vpop.f32.mrb[5].mxu1 }
 0x879   : > { %v2102_v5 = vmax.f32 %v5549_v30, %v5551_v17 }
 0x87b   : > { %2103 = vmax.xlane.f32.xlu0 %v2102_v5  ;;  %v5555_v19 = vpop.f32.mrb[6].mxu1 }
 0x87c   : > { %v5557_v58 = vpop.f32.mrb[7].mxu1 }
 0x87d   : > { %v2105_v22 = vmax.f32 %v5555_v19, %v5557_v58 }
 0x87f   : > { %2106 = vmax.xlane.f32.xlu0 %v2105_v22  ;;  %v5561_v59 = vpop.f32.mrb[8].mxu1 }
 0x880   : > { %v5563_v63 = vpop.f32.mrb[9].mxu1 }
 0x881   : > { %v2108_v1 = vmax.f32 %v5561_v59, %v5563_v63 }
 0x883   : > { %2109 = vmax.xlane.f32.xlu1 %v2108_v1  ;;  %v5567_v4 = vpop.f32.mrb[10].mxu1 }
 0x884   : > { %v5569_v33 = vpop.f32.mrb[11].mxu1 }
 0x885   : > { %v2111_v8 = vmax.f32 %v5567_v4, %v5569_v33 }
 0x887   : > { %2112 = vmax.xlane.f32.xlu0 %v2111_v8  ;;  %v5573_v9 = vpop.f32.mrb[12].mxu1 }
 0x888   : > { %v5575_v12 = vpop.f32.mrb[13].mxu1 }
 0x889   : > { %v2114_v25 = vmax.f32 %v5573_v9, %v5575_v12 }
 0x88b   : > { %2115 = vmax.xlane.f32.xlu0 %v2114_v25  ;;  %v5579_v28 = vpop.f32.mrb[14].mxu1 }
 0x88c   : > { %v5581_v14 = vpop.f32.mrb[15].mxu1 }
 0x88d   : > { %v2117_v0 = vmax.f32 %v5579_v28, %v5581_v14 }
 0x88f   : > { %2118 = vmax.xlane.f32.xlu0 %v2117_v0  ;;  %v5585_v7 = vpop.f32.mrb[16].mxu1 }
 0x890   : > { %v5587_v11 = vpop.f32.mrb[17].mxu1 }
 0x891   : > { %v2120_v23 = vmax.f32 %v5585_v7, %v5587_v11 }
 0x893   : > { %2121 = vmax.xlane.f32.xlu0 %v2120_v23  ;;  %v5591_v15 = vpop.f32.mrb[18].mxu1 }
 0x894   : > { %v5593_v18 = vpop.f32.mrb[19].mxu1 }
 0x895   : > { %v2123_v31 = vmax.f32 %v5591_v15, %v5593_v18 }
 0x897   : > { %2124 = vmax.xlane.f32.xlu0 %v2123_v31  ;;  %v5597_v34 = vpop.f32.mrb[20].mxu1 }
 0x898   : > { %v5599_v62 = vpop.f32.mrb[21].mxu1 }
 0x899   : > { %v2126_v36 = vmax.f32 %v5597_v34, %v5599_v62 }
 0x89b   : > { %2127 = vmax.xlane.f32.xlu0 %v2126_v36  ;;  %v5603_v3 = vpop.f32.mrb[22].mxu1 }
 0x89c   : > { %v5605_v2 = vpop.f32.mrb[23].mxu1 }
 0x89d   : > { %v2129_v38 = vmax.f32 %v5603_v3, %v5605_v2 }
 0x89f   : > { %2130 = vmax.xlane.f32.xlu0 %v2129_v38  ;;  %v5609_v20 = vpop.f32.mrb[24].mxu1 }
 0x8a0   : > { %v5611_v26 = vpop.f32.mrb[25].mxu1 }
 0x8a1   : > { %v2132_v21 = vmax.f32 %v5609_v20, %v5611_v26 }
 0x8a3   : > { %2133 = vmax.xlane.f32.xlu0 %v2132_v21  ;;  %v5615_v29 = vpop.f32.mrb[26].mxu1 }
 0x8a4   : > { %v5617_v43 = vpop.f32.mrb[27].mxu1 }
 0x8a5   : > { %v2135_v44 = vmax.f32 %v5615_v29, %v5617_v43 }
 0x8a7   : > { %2136 = vmax.xlane.f32.xlu0 %v2135_v44  ;;  %v5621_v39 = vpop.f32.mrb[28].mxu1 }
 0x8a8   : > { %v5623_v32 = vpop.f32.mrb[29].mxu1 }
 0x8a9   : > { %v2138_v45 = vmax.f32 %v5621_v39, %v5623_v32 }
 0x8ab   : > { %2139 = vmax.xlane.f32.xlu0 %v2138_v45  ;;  %v5627_v37 = vpop.f32.mrb[30].mxu1 }
 0x8ac   : > { %v5629_v42 = vpop.f32.mrb[31].mxu1 }
 0x8ad   : > { %v2141_v24 = vmax.f32 %v5627_v37, %v5629_v42 }
 0x8af   : > { %2142 = vmax.xlane.f32.xlu0 %v2141_v24  ;;  %v5633_v47 = vpop.f32.mrb[32].mxu1 }
 0x8b0   : > { %v5635_v51 = vpop.f32.mrb[33].mxu1 }
 0x8b1   : > { %v2144_v6 = vmax.f32 %v5633_v47, %v5635_v51 }
 0x8b3   : > { %2145 = vmax.xlane.f32.xlu0 %v2144_v6 }
 0x904   : > { %v2101_v46 = vpop.xlane.xlu0 %2100 }
 0x905   : > { %v2147_v10 = vsub.f32 %v5543_v55, %v2101_v46  ;;  %v2148_v48 = vsub.f32 %v5545_v56, %v2101_v46 }
 0x907   : > { %v2179_v49 = vmul.f32 1.442695, %v2147_v10  ;;  %v2181_v50 = vmul.f32 1.442695, %v2148_v48 }
 0x908   : > { %v2104_v52 = vpop.xlane.xlu0 %2103 }
 0x909   : > { %4253 = vpow2.f32 %v2179_v49  ;;  %v2149_v27 = vsub.f32 %v5549_v30, %v2104_v52  ;;  %v2150_v57 = vsub.f32 %v5551_v17, %v2104_v52 }
 0x90a   : > { %4255 = vpow2.f32 %v2181_v50 }
 0x90b   : > { %v2183_v61 = vmul.f32 1.442695, %v2149_v27  ;;  %v2185_v13 = vmul.f32 1.442695, %v2150_v57 }
 0x90c   : > { %v2107_v53 = vpop.xlane.xlu0 %2106 }
 0x90d   : > { %4257 = vpow2.f32 %v2183_v61  ;;  %v2151_v16 = vsub.f32 %v5555_v19, %v2107_v53  ;;  %v2152_v54 = vsub.f32 %v5557_v58, %v2107_v53 }
 0x90e   : > { %4259 = vpow2.f32 %v2185_v13 }
 0x90f   : > { %v2187_v55 = vmul.f32 1.442695, %v2151_v16  ;;  %v2189_v56 = vmul.f32 1.442695, %v2152_v54 }
 0x910   : > { %v2110_v60 = vpop.xlane.xlu1 %2109 }
 0x911   : > { %4261 = vpow2.f32 %v2187_v55  ;;  %v2153_v5 = vsub.f32 %v5561_v59, %v2110_v60  ;;  %v2154_v30 = vsub.f32 %v5563_v63, %v2110_v60 }
 0x912   : > { %4263 = vpow2.f32 %v2189_v56 }
 0x913   : > { %v5647_v17 = vpop.eup %4253  ;;  %v2191_v22 = vmul.f32 1.442695, %v2153_v5  ;;  %v2193_v1 = vmul.f32 1.442695, %v2154_v30 }
 0x914   : > { %v5649_v8 = vpop.eup %4255  ;;  %v2113_v25 = vpop.xlane.xlu0 %2112 }
 0x915   : > { %4265 = vpow2.f32 %v2191_v22  ;;  %v2155_v19 = vsub.f32 %v5567_v4, %v2113_v25  ;;  %v2156_v58 = vsub.f32 %v5569_v33, %v2113_v25  ;;  %v2243_v0 = vadd.f32 %v5649_v8, %v5647_v17 }
 0x916   : > { %4267 = vpow2.f32 %v2193_v1 }
 0x917   : > { %v5655_v59 = vpop.eup %4257  ;;  %v2195_v63 = vmul.f32 1.442695, %v2155_v19  ;;  %v2197_v23 = vmul.f32 1.442695, %v2156_v58  ;;  %2244 = vadd.xlane.f32.xlu0 %v2243_v0 }
 0x918   : > { %v5657_v31 = vpop.eup %4259  ;;  %v2116_v36 = vpop.xlane.xlu0 %2115 }
 0x919   : > { %4269 = vpow2.f32 %v2195_v63  ;;  %v2157_v38 = vsub.f32 %v5573_v9, %v2116_v36  ;;  %v2158_v21 = vsub.f32 %v5575_v12, %v2116_v36  ;;  %v2246_v4 = vadd.f32 %v5657_v31, %v5655_v59 }
 0x91a   : > { %4271 = vpow2.f32 %v2197_v23 }
 0x91b   : > { %v5663_v33 = vpop.eup %4261  ;;  %v2199_v44 = vmul.f32 1.442695, %v2157_v38  ;;  %v2201_v45 = vmul.f32 1.442695, %v2158_v21  ;;  %2247 = vadd.xlane.f32.xlu0 %v2246_v4 }
 0x91c   : > { %v5665_v24 = vpop.eup %4263  ;;  %v2119_v6 = vpop.xlane.xlu0 %2118 }
 0x91d   : > { %4273 = vpow2.f32 %v2199_v44  ;;  %v2159_v46 = vsub.f32 %v5579_v28, %v2119_v6  ;;  %v2160_v10 = vsub.f32 %v5581_v14, %v2119_v6  ;;  %v2249_v9 = vadd.f32 %v5665_v24, %v5663_v33 }
 0x91e   : > { %4275 = vpow2.f32 %v2201_v45 }
 0x91f   : > { %v5671_v12 = vpop.eup %4265  ;;  %v2203_v48 = vmul.f32 1.442695, %v2159_v46  ;;  %v2205_v49 = vmul.f32 1.442695, %v2160_v10  ;;  %2250 = vadd.xlane.f32.xlu0 %v2249_v9 }
 0x920   : > { %v5673_v50 = vpop.eup %4267  ;;  %v2122_v52 = vpop.xlane.xlu0 %2121 }
 0x921   : > { %4277 = vpow2.f32 %v2203_v48  ;;  %v2161_v27 = vsub.f32 %v5585_v7, %v2122_v52  ;;  %v2162_v57 = vsub.f32 %v5587_v11, %v2122_v52  ;;  %v2252_v28 = vadd.f32 %v5673_v50, %v5671_v12 }
 0x922   : > { %4279 = vpow2.f32 %v2205_v49 }
 0x923   : > { %v5679_v14 = vpop.eup %4269  ;;  %v2207_v61 = vmul.f32 1.442695, %v2161_v27  ;;  %v2209_v13 = vmul.f32 1.442695, %v2162_v57  ;;  %2253 = vadd.xlane.f32.xlu0 %v2252_v28 }
 0x924   : > { %v5681_v53 = vpop.eup %4271  ;;  %v2125_v16 = vpop.xlane.xlu0 %2124 }
 0x925   : > { %4281 = vpow2.f32 %v2207_v61  ;;  %v2163_v54 = vsub.f32 %v5591_v15, %v2125_v16  ;;  %v2164_v55 = vsub.f32 %v5593_v18, %v2125_v16  ;;  %v2255_v7 = vadd.f32 %v5681_v53, %v5679_v14 }
 0x926   : > { %4283 = vpow2.f32 %v2209_v13 }
 0x927   : > { %v5687_v11 = vpop.eup %4273  ;;  %v2211_v56 = vmul.f32 1.442695, %v2163_v54  ;;  %v2213_v60 = vmul.f32 1.442695, %v2164_v55  ;;  %2256 = vadd.xlane.f32.xlu0 %v2255_v7 }
 0x928   : > { %v5689_v5 = vpop.eup %4275  ;;  %v2128_v30 = vpop.xlane.xlu0 %2127 }
 0x929   : > { %4285 = vpow2.f32 %v2211_v56  ;;  %v2165_v22 = vsub.f32 %v5597_v34, %v2128_v30  ;;  %v2166_v1 = vsub.f32 %v5599_v62, %v2128_v30  ;;  %v2258_v15 = vadd.f32 %v5689_v5, %v5687_v11 }
 0x92a   : > { %4287 = vpow2.f32 %v2213_v60 }
 0x92b   : > { %v5695_v18 = vpop.eup %4277  ;;  %v2215_v25 = vmul.f32 1.442695, %v2165_v22  ;;  %v2217_v19 = vmul.f32 1.442695, %v2166_v1  ;;  %2259 = vadd.xlane.f32.xlu0 %v2258_v15 }
 0x92c   : > { %v5697_v58 = vpop.eup %4279  ;;  %v2131_v0 = vpop.xlane.xlu0 %2130 }
 0x92d   : > { %4289 = vpow2.f32 %v2215_v25  ;;  %v2167_v63 = vsub.f32 %v5603_v3, %v2131_v0  ;;  %v2168_v23 = vsub.f32 %v5605_v2, %v2131_v0  ;;  %v2261_v34 = vadd.f32 %v5697_v58, %v5695_v18 }
 0x92e   : > { %4291 = vpow2.f32 %v2217_v19 }
 0x92f   : > { %v5703_v62 = vpop.eup %4281  ;;  %v2219_v36 = vmul.f32 1.442695, %v2167_v63  ;;  %v2221_v38 = vmul.f32 1.442695, %v2168_v23  ;;  %2262 = vadd.xlane.f32.xlu0 %v2261_v34 }
 0x930   : > { %v5705_v21 = vpop.eup %4283  ;;  %v2134_v4 = vpop.xlane.xlu0 %2133 }
 0x931   : > { %4293 = vpow2.f32 %v2219_v36  ;;  %v2169_v44 = vsub.f32 %v5609_v20, %v2134_v4  ;;  %v2170_v45 = vsub.f32 %v5611_v26, %v2134_v4  ;;  %v2264_v3 = vadd.f32 %v5705_v21, %v5703_v62 }
 0x932   : > { %4295 = vpow2.f32 %v2221_v38 }
 0x933   : > { %v5711_v2 = vpop.eup %4285  ;;  %v2223_v6 = vmul.f32 1.442695, %v2169_v44  ;;  %v2225_v46 = vmul.f32 1.442695, %v2170_v45  ;;  %2265 = vadd.xlane.f32.xlu0 %v2264_v3 }
 0x934   : > { %v5713_v10 = vpop.eup %4287  ;;  %v2137_v9 = vpop.xlane.xlu0 %2136 }
 0x935   : > { %4297 = vpow2.f32 %v2223_v6  ;;  %v2171_v48 = vsub.f32 %v5615_v29, %v2137_v9  ;;  %v2172_v49 = vsub.f32 %v5617_v43, %v2137_v9  ;;  %v2267_v20 = vadd.f32 %v5713_v10, %v5711_v2  ;;  %v1857_v9 = vld [vmem:[#allocation3 + $0x18] sm:$0xff] }
 0x936   : > { %4299 = vpow2.f32 %v2225_v46  ;;  %v1179_v46 = vld [vmem:[%s6513_s16 + $0x10] sm:$0xff]  ;;  %2403 = vmatprep.mubr.f32.mxu0 %v1857_v9 }
 0x937   : > { %v5719_v26 = vpop.eup %4289  ;;  %v2227_v52 = vmul.f32 1.442695, %v2171_v48  ;;  %v2229_v27 = vmul.f32 1.442695, %v2172_v49  ;;  %2268 = vadd.xlane.f32.xlu0 %v2267_v20 }
 0x938   : > { %v5721_v57 = vpop.eup %4291  ;;  %v2140_v28 = vpop.xlane.xlu0 %2139 }
 0x939   : > { %4301 = vpow2.f32 %v2227_v52  ;;  %v2173_v61 = vsub.f32 %v5621_v39, %v2140_v28  ;;  %v2174_v13 = vsub.f32 %v5623_v32, %v2140_v28  ;;  %v2270_v29 = vadd.f32 %v5721_v57, %v5719_v26 }
 0x93a   : > { %4303 = vpow2.f32 %v2229_v27 }
 0x93b   : > { %v5727_v43 = vpop.eup %4293  ;;  %v2231_v16 = vmul.f32 1.442695, %v2173_v61  ;;  %v2233_v54 = vmul.f32 1.442695, %v2174_v13  ;;  %2271 = vadd.xlane.f32.xlu0 %v2270_v29 }
 0x93c   : > { %v5729_v55 = vpop.eup %4295  ;;  %v2143_v7 = vpop.xlane.xlu0 %2142 }
 0x93d   : > { %4305 = vpow2.f32 %v2231_v16  ;;  %v2175_v56 = vsub.f32 %v5627_v37, %v2143_v7  ;;  %v2176_v60 = vsub.f32 %v5629_v42, %v2143_v7  ;;  %v2273_v39 = vadd.f32 %v5729_v55, %v5727_v43 }
 0x93e   : > { %4307 = vpow2.f32 %v2233_v54 }
 0x93f   : > { %v5735_v32 = vpop.eup %4297  ;;  %v2235_v30 = vmul.f32 1.442695, %v2175_v56  ;;  %v2237_v22 = vmul.f32 1.442695, %v2176_v60  ;;  %2274 = vadd.xlane.f32.xlu0 %v2273_v39 }
 0x940   : > { %v5737_v1 = vpop.eup %4299  ;;  %v2146_v15 = vpop.xlane.xlu0 %2145 }
 0x941   : > { %4309 = vpow2.f32 %v2235_v30  ;;  %v2177_v25 = vsub.f32 %v5633_v47, %v2146_v15  ;;  %v2178_v19 = vsub.f32 %v5635_v51, %v2146_v15  ;;  %v2276_v37 = vadd.f32 %v5737_v1, %v5735_v32 }
 0x942   : > { %4311 = vpow2.f32 %v2237_v22 }
 0x943   : > { %v5743_v42 = vpop.eup %4301  ;;  %v2239_v0 = vmul.f32 1.442695, %v2177_v25  ;;  %v2241_v63 = vmul.f32 1.442695, %v2178_v19  ;;  %2277 = vadd.xlane.f32.xlu0 %v2276_v37 }
 0x944   : > { %v5745_v23 = vpop.eup %4303 }
 0x945   : > { %4313 = vpow2.f32 %v2239_v0  ;;  %v2279_v34 = vadd.f32 %v5745_v23, %v5743_v42 }
 0x946   : > { %4315 = vpow2.f32 %v2241_v63 }
 0x947   : > { %v5749_v36 = vpop.eup %4305  ;;  %2280 = vadd.xlane.f32.xlu0 %v2279_v34 }
 0x948   : > { %v5751_v47 = vpop.eup %4307 }
 0x949   : > { %v2282_v51 = vadd.f32 %v5751_v47, %v5749_v36 }
 0x94b   : > { %v5755_v38 = vpop.eup %4309  ;;  %2283 = vadd.xlane.f32.xlu1 %v2282_v51 }
 0x94c   : > { %v5757_v4 = vpop.eup %4311 }
 0x94d   : > { %v2285_v44 = vadd.f32 %v5757_v4, %v5755_v38 }
 0x94f   : > { %v5761_v45 = vpop.eup %4313  ;;  %2286 = vadd.xlane.f32.xlu1 %v2285_v44 }
 0x950   : > { %v5763_v3 = vpop.eup %4315 }
 0x951   : > { %v2288_v6 = vadd.f32 %v5763_v3, %v5761_v45 }
 0x953   : > { %2289 = vadd.xlane.f32.xlu1 %v2288_v6 }
 0x95d   : > { %1193 = vperm.xlu0 %4139, %v1179_v46  }
 0x9a4   : > { %v2245_v48 = vpop.xlane.xlu0 %2244 }
 0x9a5   : > { %4317 = vrcp.f32 %v2245_v48 }
 0x9a8   : > { %v2248_v49 = vpop.xlane.xlu0 %2247 }
 0x9a9   : > { %4319 = vrcp.f32 %v2248_v49 }
 0x9ac   : > { %v2251_v20 = vpop.xlane.xlu0 %2250 }
 0x9ad   : > { %4321 = vrcp.f32 %v2251_v20 }
 0x9af   : > { %v4318_v27 = vpop.eup %4317 }
 0x9b0   : > { %v2254_v52 = vpop.xlane.xlu0 %2253  ;;  %v2293_v13 = vmul.f32 %v4318_v27, %v5649_v8  ;;  %v2292_v16 = vmul.f32 %v4318_v27, %v5647_v17 }
 0x9b1   : > { %4323 = vrcp.f32 %v2254_v52 }
 0x9b3   : > { %v4320_v28 = vpop.eup %4319 }
 0x9b4   : > { %v2257_v61 = vpop.xlane.xlu0 %2256  ;;  %v2296_v29 = vmul.f32 %v4320_v28, %v5657_v31  ;;  %v2295_v54 = vmul.f32 %v4320_v28, %v5655_v59 }
 0x9b5   : > { %4325 = vrcp.f32 %v2257_v61 }
 0x9b6   : > { %v3896_v7 = vpack.c.bf16 %v2296_v29, %v2293_v13  ;;  %v3898_v56 = vpack.c.bf16 %v2295_v54, %v2292_v16 }
 0x9b7   : > { %v4322_v39 = vpop.eup %4321 }
 0x9b8   : > { %3897 = vmatprep.subr.bf16.mxu0 %v3896_v7  ;;  %v2260_v60 = vpop.xlane.xlu0 %2259  ;;  %v2299_v15 = vmul.f32 %v4322_v39, %v5665_v24  ;;  %v2298_v31 = vmul.f32 %v4322_v39, %v5663_v33 }
 0x9b9   : > { %4327 = vrcp.f32 %v2260_v60  ;;  %3899 = vmatpush1.bf16.xpose.msra.mxu0 %v3898_v56 }
 0x9bb   : > { %v4324_v30 = vpop.eup %4323 }
 0x9bc   : > { %v2263_v22 = vpop.xlane.xlu0 %2262  ;;  %v2302_v8 = vmul.f32 %v4324_v30, %v5673_v50  ;;  %v2301_v17 = vmul.f32 %v4324_v30, %v5671_v12 }
 0x9bd   : > { %4329 = vrcp.f32 %v2263_v22 }
 0x9be   : > { %v3900_v25 = vpack.c.bf16 %v2302_v8, %v2299_v15  ;;  %v3902_v59 = vpack.c.bf16 %v2301_v17, %v2298_v31 }
 0x9bf   : > { %v4326_v37 = vpop.eup %4325 }
 0x9c0   : > { %3901 = vmatprep.subr.bf16.mxu0 %v3900_v25  ;;  %v2266_v19 = vpop.xlane.xlu0 %2265  ;;  %v2305_v34 = vmul.f32 %v4326_v37, %v5681_v53  ;;  %v2304_v50 = vmul.f32 %v4326_v37, %v5679_v14 }
 0x9c1   : > { %4331 = vrcp.f32 %v2266_v19  ;;  %3903 = vmatpush1.bf16.xpose.msra.mxu0 %v3902_v59 }
 0x9c3   : > { %v4328_v0 = vpop.eup %4327 }
 0x9c4   : > { %v2269_v63 = vpop.xlane.xlu0 %2268  ;;  %v2308_v24 = vmul.f32 %v4328_v0, %v5689_v5  ;;  %v2307_v33 = vmul.f32 %v4328_v0, %v5687_v11 }
 0x9c5   : > { %4333 = vrcp.f32 %v2269_v63  ;;  %v2410_v63 = vld [vmem:[#allocation2 + $0x28] sm:$0xff] }
 0x9c6   : > { %v3904_v51 = vpack.c.bf16 %v2308_v24, %v2305_v34  ;;  %v3906_v12 = vpack.c.bf16 %v2307_v33, %v2304_v50 }
 0x9c7   : > { %v4330_v6 = vpop.eup %4329 }
 0x9c8   : > { %3905 = vmatprep.subr.bf16.mxu0 %v3904_v51  ;;  %v2272_v44 = vpop.xlane.xlu0 %2271  ;;  %v2311_v48 = vmul.f32 %v4330_v6, %v5697_v58  ;;  %v2310_v5 = vmul.f32 %v4330_v6, %v5695_v18 }
 0x9c9   : > { %4335 = vrcp.f32 %v2272_v44  ;;  %3907 = vmatpush1.bf16.xpose.msra.mxu0 %v3906_v12 }
 0x9cb   : > { %v4332_v46 = vpop.eup %4331 }
 0x9cc   : > { %v2275_v9 = vpop.xlane.xlu0 %2274  ;;  %v2314_v53 = vmul.f32 %v4332_v46, %v5705_v21  ;;  %v2313_v14 = vmul.f32 %v4332_v46, %v5703_v62 }
 0x9cd   : > { %4337 = vrcp.f32 %v2275_v9 }
 0x9ce   : > { %v3908_v49 = vpack.c.bf16 %v2314_v53, %v2311_v48  ;;  %v3910_v11 = vpack.c.bf16 %v2313_v14, %v2310_v5  ;;  %v4542_v14 = vld [vmem:[%s5030_s6 + $0x8] sm:$0xff] }
 0x9cf   : > { %v4334_v52 = vpop.eup %4333 }
 0x9d0   : > { %3909 = vmatprep.subr.bf16.mxu0 %v3908_v49  ;;  %v2278_v20 = vpop.xlane.xlu0 %2277  ;;  %v2317_v61 = vmul.f32 %v4334_v52, %v5713_v10  ;;  %v2316_v21 = vmul.f32 %v4334_v52, %v5711_v2 }
 0x9d1   : > { %4339 = vrcp.f32 %v2278_v20  ;;  %3911 = vmatpush1.bf16.xpose.msra.mxu0 %v3910_v11 }
 0x9d3   : > { %v4336_v27 = vpop.eup %4335 }
 0x9d4   : > { %v2281_v28 = vpop.xlane.xlu0 %2280  ;;  %v2320_v58 = vmul.f32 %v4336_v27, %v5721_v57  ;;  %v2319_v18 = vmul.f32 %v4336_v27, %v5719_v26 }
 0x9d5   : > { %4341 = vrcp.f32 %v2281_v28 }
 0x9d6   : > { %v3912_v13 = vpack.c.bf16 %v2320_v58, %v2317_v61  ;;  %v3914_v62 = vpack.c.bf16 %v2319_v18, %v2316_v21 }
 0x9d7   : > { %v4338_v16 = vpop.eup %4337 }
 0x9d8   : > { %3913 = vmatprep.subr.bf16.mxu0 %v3912_v13  ;;  %v2284_v29 = vpop.xlane.xlu1 %2283  ;;  %v2323_v60 = vmul.f32 %v4338_v16, %v5729_v55  ;;  %v2322_v57 = vmul.f32 %v4338_v16, %v5727_v43 }
 0x9d9   : > { %4343 = vrcp.f32 %v2284_v29  ;;  %3915 = vmatpush1.bf16.xpose.msra.mxu0 %v3914_v62 }
 0x9db   : > { %v4340_v54 = vpop.eup %4339 }
 0x9dc   : > { %v1194_v7 = vpop.permute.xlu0 %1193  ;;  %v2287_v56 = vpop.xlane.xlu1 %2286  ;;  %v2326_v10 = vmul.f32 %v4340_v54, %v5737_v1  ;;  %v2325_v2 = vmul.f32 %v4340_v54, %v5735_v32 }
 0x9dd   : > { %v1290_v26 = vadd.f32 %v5216_v41, %v1194_v7  ;;  %4345 = vrcp.f32 %v2287_v56 }
 0x9de   : > { %v3916_v39 = vpack.c.bf16 %v2326_v10, %v2323_v60  ;;  %v3918_v30 = vpack.c.bf16 %v2325_v2, %v2322_v57 }
 0x9df   : > { %2413 = vxpose.xlu1.b32.start.end [1/1] (short) %v1290_v26, 128  ;;  %v4342_v15 = vpop.eup %4341 }
 0x9e0   : > { %3917 = vmatprep.subr.bf16.mxu0 %v3916_v39  ;;  %v2290_v22 = vpop.xlane.xlu1 %2289  ;;  %v2329_v55 = vmul.f32 %v4342_v15, %v5745_v23  ;;  %v2328_v43 = vmul.f32 %v4342_v15, %v5743_v42  ;;  %v1856_v42 = vld [vmem:[#allocation3 + $0x10] sm:$0xff] }
 0x9e1   : > { %4347 = vrcp.f32 %v2290_v22  ;;  %3919 = vmatpush1.bf16.xpose.msra.mxu0 %v3918_v30 }
 0x9e3   : > { %v4344_v8 = vpop.eup %4343 }
 0x9e4   : > { %v2332_v1 = vmul.f32 %v4344_v8, %v5751_v47  ;;  %v2331_v32 = vmul.f32 %v4344_v8, %v5749_v36  ;;  %v2409_v36 = vld [vmem:[#allocation2 + $0x20] sm:$0xff] }
 0x9e6   : > { %v3920_v31 = vpack.c.bf16 %v2332_v1, %v2329_v55  ;;  %v3922_v41 = vpack.c.bf16 %v2331_v32, %v2328_v43 }
 0x9e7   : > { %v4346_v17 = vpop.eup %4345 }
 0x9e8   : > { %3921 = vmatprep.subr.bf16.mxu0 %v3920_v31  ;;  %v2335_v59 = vmul.f32 %v4346_v17, %v5757_v4  ;;  %v2334_v37 = vmul.f32 %v4346_v17, %v5755_v38 }
 0x9e9   : > { %3923 = vmatpush1.bf16.xpose.msra.mxu0 %v3922_v41 }
 0x9eb   : > { %v4348_v25 = vpop.eup %4347 }
 0x9ec   : > { %v2338_v19 = vmul.f32 %v4348_v25, %v5763_v3  ;;  %v2337_v23 = vmul.f32 %v4348_v25, %v5761_v45 }
 0x9ee   : > { %v3924_v0 = vpack.c.bf16 %v2338_v19, %v2335_v59  ;;  %v3926_v47 = vpack.c.bf16 %v2337_v23, %v2334_v37 }
 0x9f0   : > { %3925 = vmatprep.subr.bf16.mxu0 %v3924_v0 }
 0x9f1   : > { %3927 = vmatpush1.bf16.xpose.msra.mxu0 %v3926_v47 }
 0x9f2   : > { %2493 = vmatprep.subr.mxu0 %v2410_v63 }
 0x9f8   : > { %2404 = vmatmul.mubr.f32.vlgmr.msra.gmra.mrb[40].mxu0 %v1856_v42 }
 0x9f9   : > { %2494 = vmatpush1.msra.mxu0 %v2409_v36  ;;  %2557 = vmatprep.mubr.f32.mxu0 %v4744_v35 }
 0xa5f   : > { %v2429_v34 = vpop.trf.xlu1 }
 0xa60   : > { %3742 = vmatmul.mubr.msk.f32.vlgmr.msra.gmra.mrb[42].mxu0 %vm1334_vm2, %v2429_v34 }
 0xa61   : > { %2563 = vmatprep.mubr.f32.mxu0 %v4744_v35 }
 0xa63   : > { %v2430_v38 = vpop.trf.xlu1 }
 0xa64   : > { %3743 = vmatmul.mubr.msk.f32.gmra.mrb[44].mxu0 %vm1334_vm2, %v2430_v38 }
 0xa65   : > { %2569 = vmatprep.mubr.f32.mxu0 %v4744_v35 }
 0xa67   : > { %v2431_v4 = vpop.trf.xlu1 }
 0xa68   : > { %3744 = vmatmul.mubr.msk.f32.gmra.mrb[46].mxu0 %vm1334_vm2, %v2431_v4 }
 0xa69   : > { %2575 = vmatprep.mubr.f32.mxu0 %v4744_v35 }
 0xa6b   : > { %v2432_v45 = vpop.trf.xlu1 }
 0xa6c   : > { %3745 = vmatmul.mubr.msk.f32.gmra.mrb[48].mxu0 %vm1334_vm2, %v2432_v45 }
 0xa6d   : > { %2581 = vmatprep.mubr.f32.mxu0 %v4744_v35 }
 0xa6f   : > { %v2433_v3 = vpop.trf.xlu1 }
 0xa70   : > { %3746 = vmatmul.mubr.msk.f32.gmra.mrb[50].mxu0 %vm1334_vm2, %v2433_v3 }
 0xa71   : > { %2587 = vmatprep.mubr.f32.mxu0 %v4744_v35 }
 0xa73   : > { %v2434_v24 = vpop.trf.xlu1 }
 0xa74   : > { %3747 = vmatmul.mubr.msk.f32.gmra.mrb[52].mxu0 %vm1334_vm2, %v2434_v24 }
 0xa75   : > { %2593 = vmatprep.mubr.f32.mxu0 %v4744_v35 }
 0xa77   : > { %v2435_v50 = vpop.trf.xlu1 }
 0xa78   : > { %3748 = vmatmul.mubr.msk.f32.gmra.mrb[54].mxu0 %vm1334_vm2, %v2435_v50 }
 0xa79   : > { %2599 = vmatprep.mubr.f32.mxu0 %v4744_v35 }
 0xa7b   : > { %v2436_v33 = vpop.trf.xlu1 }
 0xa7c   : > { %3749 = vmatmul.mubr.msk.f32.gmra.mrb[56].mxu0 %vm1334_vm2, %v2436_v33 }
 0xa7d   : > { %2605 = vmatprep.mubr.f32.mxu0 %v4744_v35 }
 0xa7f   : > { %v2437_v51 = vpop.trf.xlu1 }
 0xa80   : > { %3750 = vmatmul.mubr.msk.f32.gmra.mrb[58].mxu0 %vm1334_vm2, %v2437_v51 }
 0xa81   : > { %2611 = vmatprep.mubr.f32.mxu0 %v4744_v35 }
 0xa83   : > { %v2438_v12 = vpop.trf.xlu1 }
 0xa84   : > { %3751 = vmatmul.mubr.msk.f32.gmra.mrb[60].mxu0 %vm1334_vm2, %v2438_v12 }
 0xa85   : > { %2617 = vmatprep.mubr.f32.mxu0 %v4744_v35 }
 0xa87   : > { %v2439_v44 = vpop.trf.xlu1 }
 0xa88   : > { %3752 = vmatmul.mubr.msk.f32.gmra.mrb[62].mxu0 %vm1334_vm2, %v2439_v44 }
 0xa89   : > { %2623 = vmatprep.mubr.f32.mxu0 %v4744_v35 }
 0xa8b   : > { %v2440_v6 = vpop.trf.xlu1 }
 0xa8c   : > { %3753 = vmatmul.mubr.msk.f32.gmra.mrb[64].mxu0 %vm1334_vm2, %v2440_v6 }
 0xa8d   : > { %2629 = vmatprep.mubr.f32.mxu0 %v4744_v35 }
 0xa8f   : > { %v2441_v46 = vpop.trf.xlu1 }
 0xa90   : > { %3754 = vmatmul.mubr.msk.f32.gmra.mrb[66].mxu0 %vm1334_vm2, %v2441_v46 }
 0xa91   : > { %2635 = vmatprep.mubr.f32.mxu0 %v4744_v35 }
 0xa93   : > { %v2442_v9 = vpop.trf.xlu1 }
 0xa94   : > { %3755 = vmatmul.mubr.msk.f32.gmra.mrb[68].mxu0 %vm1334_vm2, %v2442_v9 }
 0xa95   : > { %2641 = vmatprep.mubr.f32.mxu0 %v4744_v35 }
 0xa97   : > { %v2443_v48 = vpop.trf.xlu1 }
 0xa98   : > { %3756 = vmatmul.mubr.msk.f32.gmra.mrb[70].mxu0 %vm1334_vm2, %v2443_v48 }
 0xa99   : > { %2647 = vmatprep.mubr.f32.mxu0 %v4744_v35 }
 0xa9b   : > { %v2444_v53 = vpop.trf.xlu1 }
 0xa9c   : > { %3757 = vmatmul.mubr.msk.f32.gmra.mrb[72].mxu0 %vm1334_vm2, %v2444_v53 }
 0xacb   : > { %v2405_v5 = vpop.f32.mrb[40].mxu0 }
 0xacc   : > { %v3520_v49 = vadd.f32 %v4542_v14, %v2405_v5  ;;  %v2407_v11 = vpop.f32.mrb[41].mxu0 }
 0xace   : > { %3524 = vst [vmem:[%s5045_s11 + $0x8] sm:$0xff] %v3520_v49 }
 0xb33   : > { %v5837_v20 = vpop.f32.mrb[42].mxu0 }
 0xb34   : > { %v5839_v52 = vpop.f32.mrb[43].mxu0 }
 0xb35   : > { %v2654_v27 = vmax.f32 %v5837_v20, %v5839_v52 }
 0xb37   : > { %2655 = vmax.xlane.f32.xlu0 %v2654_v27  ;;  %v5843_v28 = vpop.f32.mrb[44].mxu0 }
 0xb38   : > { %v5845_v61 = vpop.f32.mrb[45].mxu0 }
 0xb39   : > { %v2657_v58 = vmax.f32 %v5843_v28, %v5845_v61 }
 0xb3b   : > { %2658 = vmax.xlane.f32.xlu0 %v2657_v58  ;;  %v5849_v21 = vpop.f32.mrb[46].mxu0 }
 0xb3c   : > { %v5851_v18 = vpop.f32.mrb[47].mxu0 }
 0xb3d   : > { %v2660_v13 = vmax.f32 %v5849_v21, %v5851_v18 }
 0xb3f   : > { %2661 = vmax.xlane.f32.xlu0 %v2660_v13  ;;  %v5855_v62 = vpop.f32.mrb[48].mxu0 }
 0xb40   : > { %v5857_v29 = vpop.f32.mrb[49].mxu0 }
 0xb41   : > { %v2663_v16 = vmax.f32 %v5855_v62, %v5857_v29 }
 0xb43   : > { %2664 = vmax.xlane.f32.xlu0 %v2663_v16  ;;  %v5861_v54 = vpop.f32.mrb[50].mxu0 }
 0xb44   : > { %v5863_v7 = vpop.f32.mrb[51].mxu0 }
 0xb45   : > { %v2666_v56 = vmax.f32 %v5861_v54, %v5863_v7 }
 0xb47   : > { %2667 = vmax.xlane.f32.xlu1 %v2666_v56  ;;  %v5867_v60 = vpop.f32.mrb[52].mxu0 }
 0xb48   : > { %v5869_v10 = vpop.f32.mrb[53].mxu0 }
 0xb49   : > { %v2669_v57 = vmax.f32 %v5867_v60, %v5869_v10 }
 0xb4b   : > { %2670 = vmax.xlane.f32.xlu0 %v2669_v57  ;;  %v5873_v2 = vpop.f32.mrb[54].mxu0 }
 0xb4c   : > { %v5875_v26 = vpop.f32.mrb[55].mxu0 }
 0xb4d   : > { %v2672_v39 = vmax.f32 %v5873_v2, %v5875_v26 }
 0xb4f   : > { %2673 = vmax.xlane.f32.xlu0 %v2672_v39  ;;  %v5879_v30 = vpop.f32.mrb[56].mxu0 }
 0xb50   : > { %v5881_v22 = vpop.f32.mrb[57].mxu0 }
 0xb51   : > { %v2675_v15 = vmax.f32 %v5879_v30, %v5881_v22 }
 0xb53   : > { %2676 = vmax.xlane.f32.xlu0 %v2675_v15  ;;  %v5885_v8 = vpop.f32.mrb[58].mxu0 }
 0xb54   : > { %v5887_v55 = vpop.f32.mrb[59].mxu0 }
 0xb55   : > { %v2678_v1 = vmax.f32 %v5885_v8, %v5887_v55 }
 0xb57   : > { %2679 = vmax.xlane.f32.xlu0 %v2678_v1  ;;  %v5891_v43 = vpop.f32.mrb[60].mxu0 }
 0xb58   : > { %v5893_v32 = vpop.f32.mrb[61].mxu0 }
 0xb59   : > { %v2681_v31 = vmax.f32 %v5891_v43, %v5893_v32 }
 0xb5b   : > { %2682 = vmax.xlane.f32.xlu0 %v2681_v31  ;;  %v5897_v41 = vpop.f32.mrb[62].mxu0 }
 0xb5c   : > { %v5899_v17 = vpop.f32.mrb[63].mxu0 }
 0xb5d   : > { %v2684_v25 = vmax.f32 %v5897_v41, %v5899_v17 }
 0xb5f   : > { %2685 = vmax.xlane.f32.xlu0 %v2684_v25  ;;  %v5903_v59 = vpop.f32.mrb[64].mxu0 }
 0xb60   : > { %v5905_v19 = vpop.f32.mrb[65].mxu0 }
 0xb61   : > { %v2687_v37 = vmax.f32 %v5903_v59, %v5905_v19 }
 0xb63   : > { %2688 = vmax.xlane.f32.xlu0 %v2687_v37  ;;  %v5909_v23 = vpop.f32.mrb[66].mxu0 }
 0xb64   : > { %v5911_v0 = vpop.f32.mrb[67].mxu0 }
 0xb65   : > { %v2690_v47 = vmax.f32 %v5909_v23, %v5911_v0 }
 0xb67   : > { %2691 = vmax.xlane.f32.xlu0 %v2690_v47  ;;  %v5915_v63 = vpop.f32.mrb[68].mxu0 }
 0xb68   : > { %v5917_v42 = vpop.f32.mrb[69].mxu0 }
 0xb69   : > { %v2693_v36 = vmax.f32 %v5915_v63, %v5917_v42 }
 0xb6b   : > { %2694 = vmax.xlane.f32.xlu0 %v2693_v36  ;;  %v5921_v34 = vpop.f32.mrb[70].mxu0 }
 0xb6c   : > { %v5923_v38 = vpop.f32.mrb[71].mxu0 }
 0xb6d   : > { %v2696_v4 = vmax.f32 %v5921_v34, %v5923_v38 }
 0xb6f   : > { %2697 = vmax.xlane.f32.xlu0 %v2696_v4  ;;  %v5927_v45 = vpop.f32.mrb[72].mxu0 }
 0xb70   : > { %v5929_v3 = vpop.f32.mrb[73].mxu0 }
 0xb71   : > { %v2699_v24 = vmax.f32 %v5927_v45, %v5929_v3 }
 0xb73   : > { %2700 = vmax.xlane.f32.xlu0 %v2699_v24 }
 0xbc4   : > { %v2656_v50 = vpop.xlane.xlu0 %2655 }
 0xbc5   : > { %v2702_v33 = vsub.f32 %v5837_v20, %v2656_v50  ;;  %v2703_v51 = vsub.f32 %v5839_v52, %v2656_v50 }
 0xbc7   : > { %v2734_v12 = vmul.f32 1.442695, %v2702_v33  ;;  %v2736_v44 = vmul.f32 1.442695, %v2703_v51 }
 0xbc8   : > { %v2659_v6 = vpop.xlane.xlu0 %2658 }
 0xbc9   : > { %4349 = vpow2.f32 %v2734_v12  ;;  %v2704_v46 = vsub.f32 %v5843_v28, %v2659_v6  ;;  %v2705_v9 = vsub.f32 %v5845_v61, %v2659_v6 }
 0xbca   : > { %4351 = vpow2.f32 %v2736_v44 }
 0xbcb   : > { %v2738_v48 = vmul.f32 1.442695, %v2704_v46  ;;  %v2740_v53 = vmul.f32 1.442695, %v2705_v9 }
 0xbcc   : > { %v2662_v5 = vpop.xlane.xlu0 %2661 }
 0xbcd   : > { %4353 = vpow2.f32 %v2738_v48  ;;  %v2706_v14 = vsub.f32 %v5849_v21, %v2662_v5  ;;  %v2707_v49 = vsub.f32 %v5851_v18, %v2662_v5 }
 0xbce   : > { %4355 = vpow2.f32 %v2740_v53 }
 0xbcf   : > { %v2742_v11 = vmul.f32 1.442695, %v2706_v14  ;;  %v2744_v20 = vmul.f32 1.442695, %v2707_v49 }
 0xbd0   : > { %v2665_v52 = vpop.xlane.xlu0 %2664 }
 0xbd1   : > { %4357 = vpow2.f32 %v2742_v11  ;;  %v2708_v27 = vsub.f32 %v5855_v62, %v2665_v52  ;;  %v2709_v28 = vsub.f32 %v5857_v29, %v2665_v52 }
 0xbd2   : > { %4359 = vpow2.f32 %v2744_v20 }
 0xbd3   : > { %v5941_v61 = vpop.eup %4349  ;;  %v2746_v58 = vmul.f32 1.442695, %v2708_v27  ;;  %v2748_v13 = vmul.f32 1.442695, %v2709_v28 }
 0xbd4   : > { %v5943_v16 = vpop.eup %4351  ;;  %v2668_v56 = vpop.xlane.xlu1 %2667 }
 0xbd5   : > { %4361 = vpow2.f32 %v2746_v58  ;;  %v2710_v21 = vsub.f32 %v5861_v54, %v2668_v56  ;;  %v2711_v18 = vsub.f32 %v5863_v7, %v2668_v56  ;;  %v2798_v57 = vadd.f32 %v5943_v16, %v5941_v61 }
 0xbd6   : > { %4363 = vpow2.f32 %v2748_v13 }
 0xbd7   : > { %v5949_v62 = vpop.eup %4353  ;;  %v2750_v29 = vmul.f32 1.442695, %v2710_v21  ;;  %v2752_v39 = vmul.f32 1.442695, %v2711_v18  ;;  %2799 = vadd.xlane.f32.xlu0 %v2798_v57 }
 0xbd8   : > { %v5951_v15 = vpop.eup %4355  ;;  %v2671_v1 = vpop.xlane.xlu0 %2670 }
 0xbd9   : > { %4365 = vpow2.f32 %v2750_v29  ;;  %v2712_v31 = vsub.f32 %v5867_v60, %v2671_v1  ;;  %v2713_v25 = vsub.f32 %v5869_v10, %v2671_v1  ;;  %v2801_v54 = vadd.f32 %v5951_v15, %v5949_v62 }
 0xbda   : > { %4367 = vpow2.f32 %v2752_v39 }
 0xbdb   : > { %v5957_v7 = vpop.eup %4357  ;;  %v2754_v37 = vmul.f32 1.442695, %v2712_v31  ;;  %v2756_v47 = vmul.f32 1.442695, %v2713_v25  ;;  %2802 = vadd.xlane.f32.xlu0 %v2801_v54 }
 0xbdc   : > { %v5959_v36 = vpop.eup %4359  ;;  %v2674_v4 = vpop.xlane.xlu0 %2673 }
 0xbdd   : > { %4369 = vpow2.f32 %v2754_v37  ;;  %v2714_v24 = vsub.f32 %v5873_v2, %v2674_v4  ;;  %v2715_v50 = vsub.f32 %v5875_v26, %v2674_v4  ;;  %v2804_v60 = vadd.f32 %v5959_v36, %v5957_v7 }
 0xbde   : > { %4371 = vpow2.f32 %v2756_v47 }
 0xbdf   : > { %v5965_v10 = vpop.eup %4361  ;;  %v2758_v33 = vmul.f32 1.442695, %v2714_v24  ;;  %v2760_v51 = vmul.f32 1.442695, %v2715_v50  ;;  %2805 = vadd.xlane.f32.xlu0 %v2804_v60 }
 0xbe0   : > { %v5967_v12 = vpop.eup %4363  ;;  %v2677_v44 = vpop.xlane.xlu0 %2676 }
 0xbe1   : > { %4373 = vpow2.f32 %v2758_v33  ;;  %v2716_v6 = vsub.f32 %v5879_v30, %v2677_v44  ;;  %v2717_v46 = vsub.f32 %v5881_v22, %v2677_v44  ;;  %v2807_v2 = vadd.f32 %v5967_v12, %v5965_v10 }
 0xbe2   : > { %4375 = vpow2.f32 %v2760_v51 }
 0xbe3   : > { %v5973_v26 = vpop.eup %4365  ;;  %v2762_v9 = vmul.f32 1.442695, %v2716_v6  ;;  %v2764_v48 = vmul.f32 1.442695, %v2717_v46  ;;  %2808 = vadd.xlane.f32.xlu0 %v2807_v2 }
 0xbe4   : > { %v5975_v53 = vpop.eup %4367  ;;  %v2680_v5 = vpop.xlane.xlu0 %2679 }
 0xbe5   : > { %4377 = vpow2.f32 %v2762_v9  ;;  %v2718_v14 = vsub.f32 %v5885_v8, %v2680_v5  ;;  %v2719_v49 = vsub.f32 %v5887_v55, %v2680_v5  ;;  %v2810_v30 = vadd.f32 %v5975_v53, %v5973_v26 }
 0xbe6   : > { %4379 = vpow2.f32 %v2764_v48 }
 0xbe7   : > { %v5981_v22 = vpop.eup %4369  ;;  %v2766_v11 = vmul.f32 1.442695, %v2718_v14  ;;  %v2768_v20 = vmul.f32 1.442695, %v2719_v49  ;;  %2811 = vadd.xlane.f32.xlu0 %v2810_v30 }
 0xbe8   : > { %v5983_v52 = vpop.eup %4371  ;;  %v2683_v27 = vpop.xlane.xlu0 %2682 }
 0xbe9   : > { %4381 = vpow2.f32 %v2766_v11  ;;  %v2720_v28 = vsub.f32 %v5891_v43, %v2683_v27  ;;  %v2721_v58 = vsub.f32 %v5893_v32, %v2683_v27  ;;  %v2813_v8 = vadd.f32 %v5983_v52, %v5981_v22 }
 0xbea   : > { %4383 = vpow2.f32 %v2768_v20 }
 0xbeb   : > { %v5989_v55 = vpop.eup %4373  ;;  %v2770_v13 = vmul.f32 1.442695, %v2720_v28  ;;  %v2772_v56 = vmul.f32 1.442695, %v2721_v58  ;;  %2814 = vadd.xlane.f32.xlu0 %v2813_v8 }
 0xbec   : > { %v5991_v21 = vpop.eup %4375  ;;  %v2686_v18 = vpop.xlane.xlu0 %2685 }
 0xbed   : > { %4385 = vpow2.f32 %v2770_v13  ;;  %v2722_v57 = vsub.f32 %v5897_v41, %v2686_v18  ;;  %v2723_v29 = vsub.f32 %v5899_v17, %v2686_v18  ;;  %v2816_v43 = vadd.f32 %v5991_v21, %v5989_v55 }
 0xbee   : > { %4387 = vpow2.f32 %v2772_v56 }
 0xbef   : > { %v5997_v32 = vpop.eup %4377  ;;  %v2774_v39 = vmul.f32 1.442695, %v2722_v57  ;;  %v2776_v1 = vmul.f32 1.442695, %v2723_v29  ;;  %2817 = vadd.xlane.f32.xlu0 %v2816_v43 }
 0xbf0   : > { %v5999_v31 = vpop.eup %4379  ;;  %v2689_v25 = vpop.xlane.xlu0 %2688 }
 0xbf1   : > { %4389 = vpow2.f32 %v2774_v39  ;;  %v2724_v54 = vsub.f32 %v5903_v59, %v2689_v25  ;;  %v2725_v37 = vsub.f32 %v5905_v19, %v2689_v25  ;;  %v2819_v41 = vadd.f32 %v5999_v31, %v5997_v32 }
 0xbf2   : > { %4391 = vpow2.f32 %v2776_v1 }
 0xbf3   : > { %v6005_v17 = vpop.eup %4381  ;;  %v2778_v47 = vmul.f32 1.442695, %v2724_v54  ;;  %v2780_v4 = vmul.f32 1.442695, %v2725_v37  ;;  %2820 = vadd.xlane.f32.xlu0 %v2819_v41 }
 0xbf4   : > { %v6007_v24 = vpop.eup %4383  ;;  %v2692_v50 = vpop.xlane.xlu0 %2691 }
 0xbf5   : > { %4393 = vpow2.f32 %v2778_v47  ;;  %v2726_v60 = vsub.f32 %v5909_v23, %v2692_v50  ;;  %v2727_v33 = vsub.f32 %v5911_v0, %v2692_v50  ;;  %v2822_v59 = vadd.f32 %v6007_v24, %v6005_v17  ;;  %v1180_v47 = vld [vmem:[%s6513_s16 + $0x18] sm:$0xff] }
 0xbf6   : > { %4395 = vpow2.f32 %v2780_v4  ;;  %v2412_v4 = vld [vmem:[#allocation3 + $0x28] sm:$0xff] }
 0xbf7   : > { %v6013_v19 = vpop.eup %4385  ;;  %v2782_v51 = vmul.f32 1.442695, %v2726_v60  ;;  %v2784_v44 = vmul.f32 1.442695, %v2727_v33  ;;  %2823 = vadd.xlane.f32.xlu0 %v2822_v59  ;;  %2958 = vmatprep.mubr.f32.mxu1 %v2412_v4 }
 0xbf8   : > { %v6015_v6 = vpop.eup %4387  ;;  %v2695_v46 = vpop.xlane.xlu0 %2694 }
 0xbf9   : > { %4397 = vpow2.f32 %v2782_v51  ;;  %v2728_v2 = vsub.f32 %v5915_v63, %v2695_v46  ;;  %v2729_v9 = vsub.f32 %v5917_v42, %v2695_v46  ;;  %v2825_v23 = vadd.f32 %v6015_v6, %v6013_v19 }
 0xbfa   : > { %4399 = vpow2.f32 %v2784_v44 }
 0xbfb   : > { %v6021_v0 = vpop.eup %4389  ;;  %v2786_v48 = vmul.f32 1.442695, %v2728_v2  ;;  %v2788_v5 = vmul.f32 1.442695, %v2729_v9  ;;  %2826 = vadd.xlane.f32.xlu0 %v2825_v23 }
 0xbfc   : > { %v6023_v14 = vpop.eup %4391  ;;  %v2698_v49 = vpop.xlane.xlu0 %2697 }
 0xbfd   : > { %4401 = vpow2.f32 %v2786_v48  ;;  %v2730_v30 = vsub.f32 %v5921_v34, %v2698_v49  ;;  %v2731_v11 = vsub.f32 %v5923_v38, %v2698_v49  ;;  %v2828_v63 = vadd.f32 %v6023_v14, %v6021_v0 }
 0xbfe   : > { %4403 = vpow2.f32 %v2788_v5 }
 0xbff   : > { %v6029_v42 = vpop.eup %4393  ;;  %v2790_v20 = vmul.f32 1.442695, %v2730_v30  ;;  %v2792_v27 = vmul.f32 1.442695, %v2731_v11  ;;  %2829 = vadd.xlane.f32.xlu0 %v2828_v63 }
 0xc00   : > { %v6031_v28 = vpop.eup %4395  ;;  %v2701_v58 = vpop.xlane.xlu0 %2700 }
 0xc01   : > { %4405 = vpow2.f32 %v2790_v20  ;;  %v2732_v8 = vsub.f32 %v5927_v45, %v2701_v58  ;;  %v2733_v13 = vsub.f32 %v5929_v3, %v2701_v58  ;;  %v2831_v34 = vadd.f32 %v6031_v28, %v6029_v42 }
 0xc02   : > { %4407 = vpow2.f32 %v2792_v27 }
 0xc03   : > { %v6037_v38 = vpop.eup %4397  ;;  %v2794_v56 = vmul.f32 1.442695, %v2732_v8  ;;  %v2796_v18 = vmul.f32 1.442695, %v2733_v13  ;;  %2832 = vadd.xlane.f32.xlu0 %v2831_v34 }
 0xc04   : > { %v6039_v57 = vpop.eup %4399 }
 0xc05   : > { %4409 = vpow2.f32 %v2794_v56  ;;  %v2834_v29 = vadd.f32 %v6039_v57, %v6037_v38 }
 0xc06   : > { %4411 = vpow2.f32 %v2796_v18 }
 0xc07   : > { %v6043_v43 = vpop.eup %4401  ;;  %2835 = vadd.xlane.f32.xlu0 %v2834_v29 }
 0xc08   : > { %v6045_v45 = vpop.eup %4403 }
 0xc09   : > { %v2837_v3 = vadd.f32 %v6045_v45, %v6043_v43 }
 0xc0b   : > { %v6049_v39 = vpop.eup %4405  ;;  %2838 = vadd.xlane.f32.xlu1 %v2837_v3 }
 0xc0c   : > { %v6051_v1 = vpop.eup %4407 }
 0xc0d   : > { %v2840_v25 = vadd.f32 %v6051_v1, %v6049_v39 }
 0xc0f   : > { %v6055_v54 = vpop.eup %4409  ;;  %2841 = vadd.xlane.f32.xlu1 %v2840_v25 }
 0xc10   : > { %v6057_v37 = vpop.eup %4411 }
 0xc11   : > { %v2843_v41 = vadd.f32 %v6057_v37, %v6055_v54 }
 0xc13   : > { %2844 = vadd.xlane.f32.xlu1 %v2843_v41 }
 0xc1d   : > { %1198 = vperm.xlu0 %4139, %v1180_v47  }
 0xc64   : > { %v2800_v50 = vpop.xlane.xlu0 %2799 }
 0xc65   : > { %4413 = vrcp.f32 %v2800_v50 }
 0xc68   : > { %v2803_v60 = vpop.xlane.xlu0 %2802 }
 0xc69   : > { %4415 = vrcp.f32 %v2803_v60 }
 0xc6c   : > { %v2806_v33 = vpop.xlane.xlu0 %2805 }
 0xc6d   : > { %4417 = vrcp.f32 %v2806_v33 }
 0xc6f   : > { %v4414_v51 = vpop.eup %4413 }
 0xc70   : > { %v2809_v59 = vpop.xlane.xlu0 %2808  ;;  %v2848_v2 = vmul.f32 %v4414_v51, %v5943_v16  ;;  %v2847_v23 = vmul.f32 %v4414_v51, %v5941_v61 }
 0xc71   : > { %4419 = vrcp.f32 %v2809_v59 }
 0xc73   : > { %v4416_v44 = vpop.eup %4415 }
 0xc74   : > { %v2812_v46 = vpop.xlane.xlu0 %2811  ;;  %v2851_v9 = vmul.f32 %v4416_v44, %v5951_v15  ;;  %v2850_v48 = vmul.f32 %v4416_v44, %v5949_v62 }
 0xc75   : > { %4421 = vrcp.f32 %v2812_v46 }
 0xc76   : > { %v3928_v5 = vpack.c.bf16 %v2851_v9, %v2848_v2  ;;  %v3930_v49 = vpack.c.bf16 %v2850_v48, %v2847_v23 }
 0xc77   : > { %v4418_v11 = vpop.eup %4417 }
 0xc78   : > { %3929 = vmatprep.subr.bf16.mxu1 %v3928_v5  ;;  %v2815_v30 = vpop.xlane.xlu0 %2814  ;;  %v2854_v27 = vmul.f32 %v4418_v11, %v5959_v36  ;;  %v2853_v15 = vmul.f32 %v4418_v11, %v5957_v7 }
 0xc79   : > { %4423 = vrcp.f32 %v2815_v30  ;;  %3931 = vmatpush1.bf16.xpose.msra.mxu1 %v3930_v49 }
 0xc7b   : > { %v4420_v63 = vpop.eup %4419 }
 0xc7c   : > { %v2818_v20 = vpop.xlane.xlu0 %2817  ;;  %v2857_v16 = vmul.f32 %v4420_v63, %v5967_v12  ;;  %v2856_v61 = vmul.f32 %v4420_v63, %v5965_v10 }
 0xc7d   : > { %4425 = vrcp.f32 %v2818_v20 }
 0xc7e   : > { %v3932_v58 = vpack.c.bf16 %v2857_v16, %v2854_v27  ;;  %v3934_v62 = vpack.c.bf16 %v2856_v61, %v2853_v15 }
 0xc7f   : > { %v4422_v13 = vpop.eup %4421 }
 0xc80   : > { %3933 = vmatprep.subr.bf16.mxu1 %v3932_v58  ;;  %v2821_v8 = vpop.xlane.xlu0 %2820  ;;  %v2860_v18 = vmul.f32 %v4422_v13, %v5975_v53  ;;  %v2859_v12 = vmul.f32 %v4422_v13, %v5973_v26 }
 0xc81   : > { %4427 = vrcp.f32 %v2821_v8  ;;  %3935 = vmatpush1.bf16.xpose.msra.mxu1 %v3934_v62 }
 0xc83   : > { %v4424_v34 = vpop.eup %4423 }
 0xc84   : > { %v2824_v56 = vpop.xlane.xlu0 %2823  ;;  %v2863_v36 = vmul.f32 %v4424_v34, %v5983_v52  ;;  %v2862_v7 = vmul.f32 %v4424_v34, %v5981_v22  ;;  %v2965_v34 = vld [vmem:[#allocation2 + $0x38] sm:$0xff] }
 0xc85   : > { %4429 = vrcp.f32 %v2824_v56 }
 0xc86   : > { %v3936_v29 = vpack.c.bf16 %v2863_v36, %v2860_v18  ;;  %v3938_v10 = vpack.c.bf16 %v2862_v7, %v2859_v12 }
 0xc87   : > { %v4426_v25 = vpop.eup %4425 }
 0xc88   : > { %3937 = vmatprep.subr.bf16.mxu1 %v3936_v29  ;;  %v2827_v3 = vpop.xlane.xlu0 %2826  ;;  %v2866_v4 = vmul.f32 %v4426_v25, %v5991_v21  ;;  %v2865_v52 = vmul.f32 %v4426_v25, %v5989_v55 }
 0xc89   : > { %4431 = vrcp.f32 %v2827_v3  ;;  %3939 = vmatpush1.bf16.xpose.msra.mxu1 %v3938_v10 }
 0xc8b   : > { %v4428_v41 = vpop.eup %4427 }
 0xc8c   : > { %v2830_v47 = vpop.xlane.xlu0 %2829  ;;  %v2869_v53 = vmul.f32 %v4428_v41, %v5999_v31  ;;  %v2868_v26 = vmul.f32 %v4428_v41, %v5997_v32 }
 0xc8d   : > { %4433 = vrcp.f32 %v2830_v47 }
 0xc8e   : > { %v3940_v50 = vpack.c.bf16 %v2869_v53, %v2866_v4  ;;  %v3942_v22 = vpack.c.bf16 %v2868_v26, %v2865_v52  ;;  %v4543_v52 = vld [vmem:[%s5030_s6 + $0x10] sm:$0xff] }
 0xc8f   : > { %v4430_v33 = vpop.eup %4429 }
 0xc90   : > { %3941 = vmatprep.subr.bf16.mxu1 %v3940_v50  ;;  %v2833_v60 = vpop.xlane.xlu0 %2832  ;;  %v2872_v44 = vmul.f32 %v4430_v33, %v6007_v24  ;;  %v2871_v31 = vmul.f32 %v4430_v33, %v6005_v17 }
 0xc91   : > { %4435 = vrcp.f32 %v2833_v60  ;;  %3943 = vmatpush1.bf16.xpose.msra.mxu1 %v3942_v22 }
 0xc93   : > { %v4432_v59 = vpop.eup %4431 }
 0xc94   : > { %v2836_v51 = vpop.xlane.xlu0 %2835  ;;  %v2875_v21 = vmul.f32 %v4432_v59, %v6015_v6  ;;  %v2874_v55 = vmul.f32 %v4432_v59, %v6013_v19 }
 0xc95   : > { %4437 = vrcp.f32 %v2836_v51 }
 0xc96   : > { %v3944_v46 = vpack.c.bf16 %v2875_v21, %v2872_v44  ;;  %v3946_v32 = vpack.c.bf16 %v2874_v55, %v2871_v31 }
 0xc97   : > { %v4434_v9 = vpop.eup %4433 }
 0xc98   : > { %3945 = vmatprep.subr.bf16.mxu1 %v3944_v46  ;;  %v2839_v2 = vpop.xlane.xlu1 %2838  ;;  %v2878_v49 = vmul.f32 %v4434_v9, %v6023_v14  ;;  %v2877_v6 = vmul.f32 %v4434_v9, %v6021_v0 }
 0xc99   : > { %4439 = vrcp.f32 %v2839_v2  ;;  %3947 = vmatpush1.bf16.xpose.msra.mxu1 %v3946_v32 }
 0xc9b   : > { %v4436_v23 = vpop.eup %4435 }
 0xc9c   : > { %v1199_v48 = vpop.permute.xlu0 %1198  ;;  %v2842_v5 = vpop.xlane.xlu1 %2841  ;;  %v2881_v24 = vmul.f32 %v4436_v23, %v6031_v28  ;;  %v2880_v17 = vmul.f32 %v4436_v23, %v6029_v42 }
 0xc9d   : > { %v1295_v19 = vadd.f32 %v5214_v40, %v1199_v48  ;;  %4441 = vrcp.f32 %v2842_v5 }
 0xc9e   : > { %v3948_v30 = vpack.c.bf16 %v2881_v24, %v2878_v49  ;;  %v3950_v11 = vpack.c.bf16 %v2880_v17, %v2877_v6 }
 0xc9f   : > { %2968 = vxpose.xlu1.b32.start.end [1/1] (short) %v1295_v19, 128  ;;  %v4438_v20 = vpop.eup %4437 }
 0xca0   : > { %3949 = vmatprep.subr.bf16.mxu1 %v3948_v30  ;;  %v2845_v63 = vpop.xlane.xlu1 %2844  ;;  %v2884_v14 = vmul.f32 %v4438_v20, %v6039_v57  ;;  %v2883_v0 = vmul.f32 %v4438_v20, %v6037_v38  ;;  %v2411_v38 = vld [vmem:[#allocation3 + $0x20] sm:$0xff] }
 0xca1   : > { %4443 = vrcp.f32 %v2845_v63  ;;  %3951 = vmatpush1.bf16.xpose.msra.mxu1 %v3950_v11 }
 0xca3   : > { %v4440_v27 = vpop.eup %4439 }
 0xca4   : > { %v2887_v28 = vmul.f32 %v4440_v27, %v6045_v45  ;;  %v2886_v42 = vmul.f32 %v4440_v27, %v6043_v43  ;;  %v2964_v43 = vld [vmem:[#allocation2 + $0x30] sm:$0xff] }
 0xca6   : > { %v3952_v16 = vpack.c.bf16 %v2887_v28, %v2884_v14  ;;  %v3954_v40 = vpack.c.bf16 %v2886_v42, %v2883_v0 }
 0xca7   : > { %v4442_v15 = vpop.eup %4441 }
 0xca8   : > { %3953 = vmatprep.subr.bf16.mxu1 %v3952_v16  ;;  %v2890_v58 = vmul.f32 %v4442_v15, %v6051_v1  ;;  %v2889_v8 = vmul.f32 %v4442_v15, %v6049_v39 }
 0xca9   : > { %3955 = vmatpush1.bf16.xpose.msra.mxu1 %v3954_v40 }
 0xcab   : > { %v4444_v61 = vpop.eup %4443 }
 0xcac   : > { %v2893_v62 = vmul.f32 %v4444_v61, %v6057_v37  ;;  %v2892_v57 = vmul.f32 %v4444_v61, %v6055_v54 }
 0xcae   : > { %v3956_v13 = vpack.c.bf16 %v2893_v62, %v2890_v58  ;;  %v3958_v45 = vpack.c.bf16 %v2892_v57, %v2889_v8 }
 0xcb0   : > { %3957 = vmatprep.subr.bf16.mxu1 %v3956_v13 }
 0xcb1   : > { %3959 = vmatpush1.bf16.xpose.msra.mxu1 %v3958_v45 }
 0xcb2   : > { %3048 = vmatprep.subr.mxu1 %v2965_v34 }
 0xcb8   : > { %2959 = vmatmul.mubr.f32.vlgmr.msra.gmra.mrb[34].mxu1 %v2411_v38 }
 0xcb9   : > { %3049 = vmatpush1.msra.mxu1 %v2964_v43  ;;  %3112 = vmatprep.mubr.f32.mxu1 %v4744_v35 }
 0xd1f   : > { %v2984_v56 = vpop.trf.xlu1 }
 0xd20   : > { %3758 = vmatmul.mubr.msk.f32.vlgmr.msra.gmra.mrb[36].mxu1 %vm1334_vm2, %v2984_v56 }
 0xd21   : > { %3118 = vmatprep.mubr.f32.mxu1 %v4744_v35 }
 0xd23   : > { %v2985_v39 = vpop.trf.xlu1 }
 0xd24   : > { %3759 = vmatmul.mubr.msk.f32.gmra.mrb[38].mxu1 %vm1334_vm2, %v2985_v39 }
 0xd25   : > { %3124 = vmatprep.mubr.f32.mxu1 %v4744_v35 }
 0xd27   : > { %v2986_v1 = vpop.trf.xlu1 }
 0xd28   : > { %3760 = vmatmul.mubr.msk.f32.gmra.mrb[40].mxu1 %vm1334_vm2, %v2986_v1 }
 0xd29   : > { %3130 = vmatprep.mubr.f32.mxu1 %v4744_v35 }
 0xd2b   : > { %v2987_v54 = vpop.trf.xlu1 }
 0xd2c   : > { %3761 = vmatmul.mubr.msk.f32.gmra.mrb[42].mxu1 %vm1334_vm2, %v2987_v54 }
 0xd2d   : > { %3136 = vmatprep.mubr.f32.mxu1 %v4744_v35 }
 0xd2f   : > { %v2988_v37 = vpop.trf.xlu1 }
 0xd30   : > { %3762 = vmatmul.mubr.msk.f32.gmra.mrb[44].mxu1 %vm1334_vm2, %v2988_v37 }
 0xd31   : > { %3142 = vmatprep.mubr.f32.mxu1 %v4744_v35 }
 0xd33   : > { %v2989_v18 = vpop.trf.xlu1 }
 0xd34   : > { %3763 = vmatmul.mubr.msk.f32.gmra.mrb[46].mxu1 %vm1334_vm2, %v2989_v18 }
 0xd35   : > { %3148 = vmatprep.mubr.f32.mxu1 %v4744_v35 }
 0xd37   : > { %v2990_v36 = vpop.trf.xlu1 }
 0xd38   : > { %3764 = vmatmul.mubr.msk.f32.gmra.mrb[48].mxu1 %vm1334_vm2, %v2990_v36 }
 0xd39   : > { %3154 = vmatprep.mubr.f32.mxu1 %v4744_v35 }
 0xd3b   : > { %v2991_v12 = vpop.trf.xlu1 }
 0xd3c   : > { %3765 = vmatmul.mubr.msk.f32.gmra.mrb[50].mxu1 %vm1334_vm2, %v2991_v12 }
 0xd3d   : > { %3160 = vmatprep.mubr.f32.mxu1 %v4744_v35 }
 0xd3f   : > { %v2992_v7 = vpop.trf.xlu1 }
 0xd40   : > { %3766 = vmatmul.mubr.msk.f32.gmra.mrb[52].mxu1 %vm1334_vm2, %v2992_v7 }
 0xd41   : > { %3166 = vmatprep.mubr.f32.mxu1 %v4744_v35 }
 0xd43   : > { %v2993_v29 = vpop.trf.xlu1 }
 0xd44   : > { %3767 = vmatmul.mubr.msk.f32.gmra.mrb[54].mxu1 %vm1334_vm2, %v2993_v29 }
 0xd45   : > { %3172 = vmatprep.mubr.f32.mxu1 %v4744_v35 }
 0xd47   : > { %v2994_v10 = vpop.trf.xlu1 }
 0xd48   : > { %3768 = vmatmul.mubr.msk.f32.gmra.mrb[56].mxu1 %vm1334_vm2, %v2994_v10 }
 0xd49   : > { %3178 = vmatprep.mubr.f32.mxu1 %v4744_v35 }
 0xd4b   : > { %v2995_v3 = vpop.trf.xlu1 }
 0xd4c   : > { %3769 = vmatmul.mubr.msk.f32.gmra.mrb[58].mxu1 %vm1334_vm2, %v2995_v3 }
 0xd4d   : > { %3184 = vmatprep.mubr.f32.mxu1 %v4744_v35 }
 0xd4f   : > { %v2996_v25 = vpop.trf.xlu1 }
 0xd50   : > { %3770 = vmatmul.mubr.msk.f32.gmra.mrb[60].mxu1 %vm1334_vm2, %v2996_v25 }
 0xd51   : > { %3190 = vmatprep.mubr.f32.mxu1 %v4744_v35 }
 0xd53   : > { %v2997_v41 = vpop.trf.xlu1 }
 0xd54   : > { %3771 = vmatmul.mubr.msk.f32.gmra.mrb[62].mxu1 %vm1334_vm2, %v2997_v41 }
 0xd55   : > { %3196 = vmatprep.mubr.f32.mxu1 %v4744_v35 }
 0xd57   : > { %v2998_v47 = vpop.trf.xlu1 }
 0xd58   : > { %3772 = vmatmul.mubr.msk.f32.gmra.mrb[64].mxu1 %vm1334_vm2, %v2998_v47 }
 0xd59   : > { %3202 = vmatprep.mubr.f32.mxu1 %v4744_v35 }
 0xd5b   : > { %v2999_v4 = vpop.trf.xlu1 }
 0xd5c   : > { %3773 = vmatmul.mubr.msk.f32.gmra.mrb[66].mxu1 %vm1334_vm2, %v2999_v4 }
 0xd8b   : > { %v2960_v53 = vpop.f32.mrb[34].mxu1 }
 0xd8c   : > { %v3521_v26 = vadd.f32 %v4543_v52, %v2960_v53  ;;  %v2962_v50 = vpop.f32.mrb[35].mxu1 }
 0xd8e   : > { %3525 = vst [vmem:[%s5045_s11 + $0x10] sm:$0xff] %v3521_v26 }
 0xdf3   : > { %v6131_v22 = vpop.f32.mrb[36].mxu1 }
 0xdf4   : > { %v6133_v60 = vpop.f32.mrb[37].mxu1 }
 0xdf5   : > { %v3209_v33 = vmax.f32 %v6131_v22, %v6133_v60 }
 0xdf7   : > { %3210 = vmax.xlane.f32.xlu0 %v3209_v33  ;;  %v6137_v59 = vpop.f32.mrb[38].mxu1 }
 0xdf8   : > { %v6139_v51 = vpop.f32.mrb[39].mxu1 }
 0xdf9   : > { %v3212_v35 = vmax.f32 %v6137_v59, %v6139_v51 }
 0xdfb   : > { %3213 = vmax.xlane.f32.xlu0 %v3212_v35  ;;  %v6143_v44 = vpop.f32.mrb[40].mxu1 }
 0xdfc   : > { %v6145_v21 = vpop.f32.mrb[41].mxu1 }
 0xdfd   : > { %v3215_v31 = vmax.f32 %v6143_v44, %v6145_v21 }
 0xdff   : > { %3216 = vmax.xlane.f32.xlu0 %v3215_v31  ;;  %v6149_v55 = vpop.f32.mrb[42].mxu1 }
 0xe00   : > { %v6151_v46 = vpop.f32.mrb[43].mxu1 }
 0xe01   : > { %v3218_v32 = vmax.f32 %v6149_v55, %v6151_v46 }
 0xe03   : > { %3219 = vmax.xlane.f32.xlu0 %v3218_v32  ;;  %v6155_v2 = vpop.f32.mrb[44].mxu1 }
 0xe04   : > { %v6157_v9 = vpop.f32.mrb[45].mxu1 }
 0xe05   : > { %v3221_v23 = vmax.f32 %v6155_v2, %v6157_v9 }
 0xe07   : > { %3222 = vmax.xlane.f32.xlu1 %v3221_v23  ;;  %v6161_v48 = vpop.f32.mrb[46].mxu1 }
 0xe08   : > { %v6163_v5 = vpop.f32.mrb[47].mxu1 }
 0xe09   : > { %v3224_v49 = vmax.f32 %v6161_v48, %v6163_v5 }
 0xe0b   : > { %3225 = vmax.xlane.f32.xlu0 %v3224_v49  ;;  %v6167_v24 = vpop.f32.mrb[48].mxu1 }
 0xe0c   : > { %v6169_v6 = vpop.f32.mrb[49].mxu1 }
 0xe0d   : > { %v3227_v17 = vmax.f32 %v6167_v24, %v6169_v6 }
 0xe0f   : > { %3228 = vmax.xlane.f32.xlu0 %v3227_v17  ;;  %v6173_v19 = vpop.f32.mrb[50].mxu1 }
 0xe10   : > { %v6175_v30 = vpop.f32.mrb[51].mxu1 }
 0xe11   : > { %v3230_v11 = vmax.f32 %v6173_v19, %v6175_v30 }
 0xe13   : > { %3231 = vmax.xlane.f32.xlu0 %v3230_v11  ;;  %v6179_v63 = vpop.f32.mrb[52].mxu1 }
 0xe14   : > { %v6181_v20 = vpop.f32.mrb[53].mxu1 }
 0xe15   : > { %v3233_v27 = vmax.f32 %v6179_v63, %v6181_v20 }
 0xe17   : > { %3234 = vmax.xlane.f32.xlu0 %v3233_v27  ;;  %v6185_v14 = vpop.f32.mrb[54].mxu1 }
 0xe18   : > { %v6187_v28 = vpop.f32.mrb[55].mxu1 }
 0xe19   : > { %v3236_v0 = vmax.f32 %v6185_v14, %v6187_v28 }
 0xe1b   : > { %3237 = vmax.xlane.f32.xlu0 %v3236_v0  ;;  %v6191_v42 = vpop.f32.mrb[56].mxu1 }
 0xe1c   : > { %v6193_v16 = vpop.f32.mrb[57].mxu1 }
 0xe1d   : > { %v3239_v40 = vmax.f32 %v6191_v42, %v6193_v16 }
 0xe1f   : > { %3240 = vmax.xlane.f32.xlu0 %v3239_v40  ;;  %v6197_v15 = vpop.f32.mrb[58].mxu1 }
 0xe20   : > { %v6199_v61 = vpop.f32.mrb[59].mxu1 }
 0xe21   : > { %v3242_v58 = vmax.f32 %v6197_v15, %v6199_v61 }
 0xe23   : > { %3243 = vmax.xlane.f32.xlu0 %v3242_v58  ;;  %v6203_v62 = vpop.f32.mrb[60].mxu1 }
 0xe24   : > { %v6205_v8 = vpop.f32.mrb[61].mxu1 }
 0xe25   : > { %v3245_v57 = vmax.f32 %v6203_v62, %v6205_v8 }
 0xe27   : > { %3246 = vmax.xlane.f32.xlu0 %v3245_v57  ;;  %v6209_v13 = vpop.f32.mrb[62].mxu1 }
 0xe28   : > { %v6211_v45 = vpop.f32.mrb[63].mxu1 }
 0xe29   : > { %v3248_v34 = vmax.f32 %v6209_v13, %v6211_v45 }
 0xe2b   : > { %3249 = vmax.xlane.f32.xlu0 %v3248_v34  ;;  %v6215_v38 = vpop.f32.mrb[64].mxu1 }
 0xe2c   : > { %v6217_v43 = vpop.f32.mrb[65].mxu1 }
 0xe2d   : > { %v3251_v56 = vmax.f32 %v6215_v38, %v6217_v43 }
 0xe2f   : > { %3252 = vmax.xlane.f32.xlu0 %v3251_v56  ;;  %v6221_v39 = vpop.f32.mrb[66].mxu1 }
 0xe30   : > { %v6223_v1 = vpop.f32.mrb[67].mxu1 }
 0xe31   : > { %v3254_v54 = vmax.f32 %v6221_v39, %v6223_v1 }
 0xe33   : > { %3255 = vmax.xlane.f32.xlu0 %v3254_v54 }
 0xe84   : > { %v3211_v37 = vpop.xlane.xlu0 %3210 }
 0xe85   : > { %v3257_v18 = vsub.f32 %v6131_v22, %v3211_v37  ;;  %v3258_v36 = vsub.f32 %v6133_v60, %v3211_v37 }
 0xe87   : > { %v3289_v12 = vmul.f32 1.442695, %v3257_v18  ;;  %v3291_v7 = vmul.f32 1.442695, %v3258_v36 }
 0xe88   : > { %v3214_v29 = vpop.xlane.xlu0 %3213 }
 0xe89   : > { %4445 = vpow2.f32 %v3289_v12  ;;  %v3259_v10 = vsub.f32 %v6137_v59, %v3214_v29  ;;  %v3260_v3 = vsub.f32 %v6139_v51, %v3214_v29 }
 0xe8a   : > { %4447 = vpow2.f32 %v3291_v7 }
 0xe8b   : > { %v3293_v25 = vmul.f32 1.442695, %v3259_v10  ;;  %v3295_v41 = vmul.f32 1.442695, %v3260_v3 }
 0xe8c   : > { %v3217_v47 = vpop.xlane.xlu0 %3216 }
 0xe8d   : > { %4449 = vpow2.f32 %v3293_v25  ;;  %v3261_v4 = vsub.f32 %v6143_v44, %v3217_v47  ;;  %v3262_v53 = vsub.f32 %v6145_v21, %v3217_v47 }
 0xe8e   : > { %4451 = vpow2.f32 %v3295_v41 }
 0xe8f   : > { %v3297_v52 = vmul.f32 1.442695, %v3261_v4  ;;  %v3299_v26 = vmul.f32 1.442695, %v3262_v53 }
 0xe90   : > { %v3220_v50 = vpop.xlane.xlu0 %3219 }
 0xe91   : > { %4453 = vpow2.f32 %v3297_v52  ;;  %v3263_v22 = vsub.f32 %v6149_v55, %v3220_v50  ;;  %v3264_v60 = vsub.f32 %v6151_v46, %v3220_v50 }
 0xe92   : > { %4455 = vpow2.f32 %v3299_v26 }
 0xe93   : > { %v6235_v33 = vpop.eup %4445  ;;  %v3301_v59 = vmul.f32 1.442695, %v3263_v22  ;;  %v3303_v51 = vmul.f32 1.442695, %v3264_v60 }
 0xe94   : > { %v6237_v35 = vpop.eup %4447  ;;  %v3223_v31 = vpop.xlane.xlu1 %3222 }
 0xe95   : > { %4457 = vpow2.f32 %v3301_v59  ;;  %v3265_v44 = vsub.f32 %v6155_v2, %v3223_v31  ;;  %v3266_v21 = vsub.f32 %v6157_v9, %v3223_v31  ;;  %v3353_v32 = vadd.f32 %v6237_v35, %v6235_v33 }
 0xe96   : > { %4459 = vpow2.f32 %v3303_v51 }
 0xe97   : > { %v6243_v55 = vpop.eup %4449  ;;  %v3305_v46 = vmul.f32 1.442695, %v3265_v44  ;;  %v3307_v23 = vmul.f32 1.442695, %v3266_v21  ;;  %3354 = vadd.xlane.f32.xlu0 %v3353_v32 }
 0xe98   : > { %v6245_v49 = vpop.eup %4451  ;;  %v3226_v17 = vpop.xlane.xlu0 %3225 }
 0xe99   : > { %4461 = vpow2.f32 %v3305_v46  ;;  %v3267_v11 = vsub.f32 %v6161_v48, %v3226_v17  ;;  %v3268_v27 = vsub.f32 %v6163_v5, %v3226_v17  ;;  %v3356_v2 = vadd.f32 %v6245_v49, %v6243_v55 }
 0xe9a   : > { %4463 = vpow2.f32 %v3307_v23 }
 0xe9b   : > { %v6251_v9 = vpop.eup %4453  ;;  %v3309_v0 = vmul.f32 1.442695, %v3267_v11  ;;  %v3311_v40 = vmul.f32 1.442695, %v3268_v27  ;;  %3357 = vadd.xlane.f32.xlu0 %v3356_v2 }
 0xe9c   : > { %v6253_v58 = vpop.eup %4455  ;;  %v3229_v57 = vpop.xlane.xlu0 %3228 }
 0xe9d   : > { %4465 = vpow2.f32 %v3309_v0  ;;  %v3269_v34 = vsub.f32 %v6167_v24, %v3229_v57  ;;  %v3270_v56 = vsub.f32 %v6169_v6, %v3229_v57  ;;  %v3359_v48 = vadd.f32 %v6253_v58, %v6251_v9 }
 0xe9e   : > { %4467 = vpow2.f32 %v3311_v40 }
 0xe9f   : > { %v6259_v5 = vpop.eup %4457  ;;  %v3313_v54 = vmul.f32 1.442695, %v3269_v34  ;;  %v3315_v37 = vmul.f32 1.442695, %v3270_v56  ;;  %3360 = vadd.xlane.f32.xlu0 %v3359_v48 }
 0xea0   : > { %v6261_v18 = vpop.eup %4459  ;;  %v3232_v36 = vpop.xlane.xlu0 %3231 }
 0xea1   : > { %4469 = vpow2.f32 %v3313_v54  ;;  %v3271_v12 = vsub.f32 %v6173_v19, %v3232_v36  ;;  %v3272_v7 = vsub.f32 %v6175_v30, %v3232_v36  ;;  %v3362_v24 = vadd.f32 %v6261_v18, %v6259_v5 }
 0xea2   : > { %4471 = vpow2.f32 %v3315_v37 }
 0xea3   : > { %v6267_v6 = vpop.eup %4461  ;;  %v3317_v29 = vmul.f32 1.442695, %v3271_v12  ;;  %v3319_v10 = vmul.f32 1.442695, %v3272_v7  ;;  %3363 = vadd.xlane.f32.xlu0 %v3362_v24 }
 0xea4   : > { %v6269_v3 = vpop.eup %4463  ;;  %v3235_v25 = vpop.xlane.xlu0 %3234 }
 0xea5   : > { %4473 = vpow2.f32 %v3317_v29  ;;  %v3273_v41 = vsub.f32 %v6179_v63, %v3235_v25  ;;  %v3274_v47 = vsub.f32 %v6181_v20, %v3235_v25  ;;  %v3365_v19 = vadd.f32 %v6269_v3, %v6267_v6 }
 0xea6   : > { %4475 = vpow2.f32 %v3319_v10 }
 0xea7   : > { %v6275_v30 = vpop.eup %4465  ;;  %v3321_v4 = vmul.f32 1.442695, %v3273_v41  ;;  %v3323_v53 = vmul.f32 1.442695, %v3274_v47  ;;  %3366 = vadd.xlane.f32.xlu0 %v3365_v19 }
 0xea8   : > { %v6277_v52 = vpop.eup %4467  ;;  %v3238_v26 = vpop.xlane.xlu0 %3237 }
 0xea9   : > { %4477 = vpow2.f32 %v3321_v4  ;;  %v3275_v50 = vsub.f32 %v6185_v14, %v3238_v26  ;;  %v3276_v22 = vsub.f32 %v6187_v28, %v3238_v26  ;;  %v3368_v63 = vadd.f32 %v6277_v52, %v6275_v30 }
 0xeaa   : > { %4479 = vpow2.f32 %v3323_v53 }
 0xeab   : > { %v6283_v20 = vpop.eup %4469  ;;  %v3325_v60 = vmul.f32 1.442695, %v3275_v50  ;;  %v3327_v59 = vmul.f32 1.442695, %v3276_v22  ;;  %3369 = vadd.xlane.f32.xlu0 %v3368_v63 }
 0xeac   : > { %v6285_v51 = vpop.eup %4471  ;;  %v3241_v31 = vpop.xlane.xlu0 %3240 }
 0xead   : > { %4481 = vpow2.f32 %v3325_v60  ;;  %v3277_v44 = vsub.f32 %v6191_v42, %v3241_v31  ;;  %v3278_v21 = vsub.f32 %v6193_v16, %v3241_v31  ;;  %v3371_v14 = vadd.f32 %v6285_v51, %v6283_v20 }
 0xeae   : > { %4483 = vpow2.f32 %v3327_v59 }
 0xeaf   : > { %v6291_v28 = vpop.eup %4473  ;;  %v3329_v32 = vmul.f32 1.442695, %v3277_v44  ;;  %v3331_v46 = vmul.f32 1.442695, %v3278_v21  ;;  %3372 = vadd.xlane.f32.xlu0 %v3371_v14 }
 0xeb0   : > { %v6293_v23 = vpop.eup %4475  ;;  %v3244_v17 = vpop.xlane.xlu0 %3243 }
 0xeb1   : > { %4485 = vpow2.f32 %v3329_v32  ;;  %v3279_v11 = vsub.f32 %v6197_v15, %v3244_v17  ;;  %v3280_v27 = vsub.f32 %v6199_v61, %v3244_v17  ;;  %v3374_v42 = vadd.f32 %v6293_v23, %v6291_v28 }
 0xeb2   : > { %4487 = vpow2.f32 %v3331_v46 }
 0xeb3   : > { %v6299_v16 = vpop.eup %4477  ;;  %v3333_v2 = vmul.f32 1.442695, %v3279_v11  ;;  %v3335_v0 = vmul.f32 1.442695, %v3280_v27  ;;  %3375 = vadd.xlane.f32.xlu0 %v3374_v42  ;;  %v2967_v27 = vld [vmem:[#allocation3 + $0x38] sm:$0xff] }
 0xeb4   : > { %v6301_v40 = vpop.eup %4479  ;;  %v3247_v57 = vpop.xlane.xlu0 %3246  ;;  %3513 = vmatprep.mubr.f32.mxu0 %v2967_v27 }
 0xeb5   : > { %4489 = vpow2.f32 %v3333_v2  ;;  %v3281_v34 = vsub.f32 %v6203_v62, %v3247_v57  ;;  %v3282_v56 = vsub.f32 %v6205_v8, %v3247_v57  ;;  %v3377_v15 = vadd.f32 %v6301_v40, %v6299_v16 }
 0xeb6   : > { %4491 = vpow2.f32 %v3335_v0 }
 0xeb7   : > { %v6307_v61 = vpop.eup %4481  ;;  %v3337_v48 = vmul.f32 1.442695, %v3281_v34  ;;  %v3339_v54 = vmul.f32 1.442695, %v3282_v56  ;;  %3378 = vadd.xlane.f32.xlu0 %v3377_v15 }
 0xeb8   : > { %v6309_v37 = vpop.eup %4483  ;;  %v3250_v36 = vpop.xlane.xlu0 %3249 }
 0xeb9   : > { %4493 = vpow2.f32 %v3337_v48  ;;  %v3283_v12 = vsub.f32 %v6209_v13, %v3250_v36  ;;  %v3284_v7 = vsub.f32 %v6211_v45, %v3250_v36  ;;  %v3380_v62 = vadd.f32 %v6309_v37, %v6307_v61 }
 0xeba   : > { %4495 = vpow2.f32 %v3339_v54 }
 0xebb   : > { %v6315_v8 = vpop.eup %4485  ;;  %v3341_v24 = vmul.f32 1.442695, %v3283_v12  ;;  %v3343_v29 = vmul.f32 1.442695, %v3284_v7  ;;  %3381 = vadd.xlane.f32.xlu0 %v3380_v62 }
 0xebc   : > { %v6317_v10 = vpop.eup %4487  ;;  %v3253_v25 = vpop.xlane.xlu0 %3252 }
 0xebd   : > { %4497 = vpow2.f32 %v3341_v24  ;;  %v3285_v41 = vsub.f32 %v6215_v38, %v3253_v25  ;;  %v3286_v47 = vsub.f32 %v6217_v43, %v3253_v25  ;;  %v3383_v13 = vadd.f32 %v6317_v10, %v6315_v8 }
 0xebe   : > { %4499 = vpow2.f32 %v3343_v29 }
 0xebf   : > { %v6323_v45 = vpop.eup %4489  ;;  %v3345_v19 = vmul.f32 1.442695, %v3285_v41  ;;  %v3347_v4 = vmul.f32 1.442695, %v3286_v47  ;;  %3384 = vadd.xlane.f32.xlu0 %v3383_v13 }
 0xec0   : > { %v6325_v53 = vpop.eup %4491  ;;  %v3256_v26 = vpop.xlane.xlu0 %3255 }
 0xec1   : > { %4501 = vpow2.f32 %v3345_v19  ;;  %v3287_v50 = vsub.f32 %v6221_v39, %v3256_v26  ;;  %v3288_v22 = vsub.f32 %v6223_v1, %v3256_v26  ;;  %v3386_v38 = vadd.f32 %v6325_v53, %v6323_v45 }
 0xec2   : > { %4503 = vpow2.f32 %v3347_v4 }
 0xec3   : > { %v6331_v43 = vpop.eup %4493  ;;  %v3349_v63 = vmul.f32 1.442695, %v3287_v50  ;;  %v3351_v60 = vmul.f32 1.442695, %v3288_v22  ;;  %3387 = vadd.xlane.f32.xlu0 %v3386_v38 }
 0xec4   : > { %v6333_v59 = vpop.eup %4495 }
 0xec5   : > { %4505 = vpow2.f32 %v3349_v63  ;;  %v3389_v31 = vadd.f32 %v6333_v59, %v6331_v43 }
 0xec6   : > { %4507 = vpow2.f32 %v3351_v60 }
 0xec7   : > { %v6337_v44 = vpop.eup %4497  ;;  %3390 = vadd.xlane.f32.xlu0 %v3389_v31 }
 0xec8   : > { %v6339_v39 = vpop.eup %4499 }
 0xec9   : > { %v3392_v1 = vadd.f32 %v6339_v39, %v6337_v44 }
 0xecb   : > { %v6343_v21 = vpop.eup %4501  ;;  %3393 = vadd.xlane.f32.xlu0 %v3392_v1 }
 0xecc   : > { %v6345_v14 = vpop.eup %4503 }
 0xecd   : > { %v3395_v32 = vadd.f32 %v6345_v14, %v6343_v21 }
 0xecf   : > { %v6349_v46 = vpop.eup %4505  ;;  %3396 = vadd.xlane.f32.xlu1 %v3395_v32 }
 0xed0   : > { %v6351_v17 = vpop.eup %4507 }
 0xed1   : > { %v3398_v11 = vadd.f32 %v6351_v17, %v6349_v46 }
 0xed3   : > { %3399 = vadd.xlane.f32.xlu0 %v3398_v11 }
 0xf24   : > { %v3355_v42 = vpop.xlane.xlu0 %3354 }
 0xf25   : > { %4509 = vrcp.f32 %v3355_v42 }
 0xf28   : > { %v3358_v2 = vpop.xlane.xlu0 %3357 }
 0xf29   : > { %4511 = vrcp.f32 %v3358_v2 }
 0xf2c   : > { %v3361_v0 = vpop.xlane.xlu0 %3360 }
 0xf2d   : > { %4513 = vrcp.f32 %v3361_v0 }
 0xf2f   : > { %v4510_v34 = vpop.eup %4509 }
 0xf30   : > { %v3364_v57 = vpop.xlane.xlu0 %3363  ;;  %v3403_v48 = vmul.f32 %v4510_v34, %v6237_v35  ;;  %v3402_v36 = vmul.f32 %v4510_v34, %v6235_v33 }
 0xf31   : > { %4515 = vrcp.f32 %v3364_v57 }
 0xf33   : > { %v4512_v56 = vpop.eup %4511 }
 0xf34   : > { %v3367_v15 = vpop.xlane.xlu0 %3366  ;;  %v3406_v54 = vmul.f32 %v4512_v56, %v6245_v49  ;;  %v3405_v12 = vmul.f32 %v4512_v56, %v6243_v55 }
 0xf35   : > { %4517 = vrcp.f32 %v3367_v15 }
 0xf36   : > { %v3960_v7 = vpack.c.bf16 %v3406_v54, %v3403_v48  ;;  %v3962_v62 = vpack.c.bf16 %v3405_v12, %v3402_v36 }
 0xf37   : > { %v4514_v29 = vpop.eup %4513 }
 0xf38   : > { %3961 = vmatprep.subr.bf16.mxu0 %v3960_v7  ;;  %v3370_v24 = vpop.xlane.xlu0 %3369  ;;  %v3409_v47 = vmul.f32 %v4514_v29, %v6253_v58  ;;  %v3408_v49 = vmul.f32 %v4514_v29, %v6251_v9 }
 0xf39   : > { %4519 = vrcp.f32 %v3370_v24  ;;  %3963 = vmatpush1.bf16.xpose.msra.mxu0 %v3962_v62 }
 0xf3b   : > { %v4516_v25 = vpop.eup %4515 }
 0xf3c   : > { %v3373_v41 = vpop.xlane.xlu0 %3372  ;;  %v3412_v35 = vmul.f32 %v4516_v25, %v6261_v18  ;;  %v3411_v33 = vmul.f32 %v4516_v25, %v6259_v5 }
 0xf3d   : > { %4521 = vrcp.f32 %v3373_v41 }
 0xf3e   : > { %v3964_v13 = vpack.c.bf16 %v3412_v35, %v3409_v47  ;;  %v3966_v55 = vpack.c.bf16 %v3411_v33, %v3408_v49  ;;  %v2966_v33 = vld [vmem:[#allocation3 + $0x30] sm:$0xff] }
 0xf3f   : > { %v4518_v4 = vpop.eup %4517 }
 0xf40   : > { %3965 = vmatprep.subr.bf16.mxu0 %v3964_v13  ;;  %v3376_v19 = vpop.xlane.xlu0 %3375  ;;  %v3415_v22 = vmul.f32 %v4518_v4, %v6269_v3  ;;  %v3414_v18 = vmul.f32 %v4518_v4, %v6267_v6 }
 0xf41   : > { %4523 = vrcp.f32 %v3376_v19  ;;  %3967 = vmatpush1.bf16.xpose.msra.mxu0 %v3966_v55 }
 0xf43   : > { %v4520_v26 = vpop.eup %4519 }
 0xf44   : > { %v3379_v50 = vpop.xlane.xlu0 %3378  ;;  %v3418_v58 = vmul.f32 %v4520_v26, %v6277_v52  ;;  %v3417_v9 = vmul.f32 %v4520_v26, %v6275_v30 }
 0xf45   : > { %4525 = vrcp.f32 %v3379_v50 }
 0xf46   : > { %v3968_v38 = vpack.c.bf16 %v3418_v58, %v3415_v22  ;;  %v3970_v5 = vpack.c.bf16 %v3417_v9, %v3414_v18 }
 0xf47   : > { %v4522_v60 = vpop.eup %4521 }
 0xf48   : > { %3969 = vmatprep.subr.bf16.mxu0 %v3968_v38  ;;  %v3382_v63 = vpop.xlane.xlu0 %3381  ;;  %v3421_v32 = vmul.f32 %v4522_v60, %v6285_v51  ;;  %v3420_v52 = vmul.f32 %v4522_v60, %v6283_v20 }
 0xf49   : > { %4527 = vrcp.f32 %v3382_v63  ;;  %3971 = vmatpush1.bf16.xpose.msra.mxu0 %v3970_v5 }
 0xf4b   : > { %v4524_v31 = vpop.eup %4523 }
 0xf4c   : > { %v3385_v1 = vpop.xlane.xlu0 %3384  ;;  %v3424_v3 = vmul.f32 %v4524_v31, %v6293_v23  ;;  %v3423_v6 = vmul.f32 %v4524_v31, %v6291_v28 }
 0xf4d   : > { %4529 = vrcp.f32 %v3385_v1 }
 0xf4e   : > { %v3972_v11 = vpack.c.bf16 %v3424_v3, %v3421_v32  ;;  %v3974_v30 = vpack.c.bf16 %v3423_v6, %v3420_v52 }
 0xf4f   : > { %v4526_v42 = vpop.eup %4525 }
 0xf50   : > { %3973 = vmatprep.subr.bf16.mxu0 %v3972_v11  ;;  %v3388_v27 = vpop.xlane.xlu0 %3387  ;;  %v3427_v57 = vmul.f32 %v4526_v42, %v6301_v40  ;;  %v3426_v23 = vmul.f32 %v4526_v42, %v6299_v16 }
 0xf51   : > { %4531 = vrcp.f32 %v3388_v27  ;;  %3975 = vmatpush1.bf16.xpose.msra.mxu0 %v3974_v30 }
 0xf53   : > { %v4528_v2 = vpop.eup %4527 }
 0xf54   : > { %v3391_v0 = vpop.xlane.xlu0 %3390  ;;  %v3430_v51 = vmul.f32 %v4528_v2, %v6309_v37  ;;  %v3429_v20 = vmul.f32 %v4528_v2, %v6307_v61 }
 0xf55   : > { %4533 = vrcp.f32 %v3391_v0 }
 0xf56   : > { %v3976_v34 = vpack.c.bf16 %v3430_v51, %v3427_v57  ;;  %v3978_v28 = vpack.c.bf16 %v3429_v20, %v3426_v23 }
 0xf57   : > { %v4530_v15 = vpop.eup %4529 }
 0xf58   : > { %3977 = vmatprep.subr.bf16.mxu0 %v3976_v34  ;;  %v3394_v56 = vpop.xlane.xlu0 %3393  ;;  %v3433_v36 = vmul.f32 %v4530_v15, %v6317_v10  ;;  %v3432_v37 = vmul.f32 %v4530_v15, %v6315_v8 }
 0xf59   : > { %4535 = vrcp.f32 %v3394_v56  ;;  %3979 = vmatpush1.bf16.xpose.msra.mxu0 %v3978_v28 }
 0xf5b   : > { %v4532_v48 = vpop.eup %4531 }
 0xf5c   : > { %v3397_v54 = vpop.xlane.xlu1 %3396  ;;  %v3436_v40 = vmul.f32 %v4532_v48, %v6325_v53  ;;  %v3435_v16 = vmul.f32 %v4532_v48, %v6323_v45 }
 0xf5d   : > { %4537 = vrcp.f32 %v3397_v54 }
 0xf5e   : > { %v3980_v12 = vpack.c.bf16 %v3436_v40, %v3433_v36  ;;  %v3982_v61 = vpack.c.bf16 %v3435_v16, %v3432_v37 }
 0xf5f   : > { %v4534_v62 = vpop.eup %4533 }
 0xf60   : > { %3981 = vmatprep.subr.bf16.mxu0 %v3980_v12  ;;  %v3400_v7 = vpop.xlane.xlu0 %3399  ;;  %v3439_v29 = vmul.f32 %v4534_v62, %v6333_v59  ;;  %v3438_v10 = vmul.f32 %v4534_v62, %v6331_v43 }
 0xf61   : > { %4539 = vrcp.f32 %v3400_v7  ;;  %3983 = vmatpush1.bf16.xpose.msra.mxu0 %v3982_v61 }
 0xf63   : > { %v4536_v24 = vpop.eup %4535 }
 0xf64   : > { %v3442_v25 = vmul.f32 %v4536_v24, %v6339_v39  ;;  %v3441_v53 = vmul.f32 %v4536_v24, %v6337_v44 }
 0xf66   : > { %v3984_v8 = vpack.c.bf16 %v3442_v25, %v3439_v29  ;;  %v3986_v45 = vpack.c.bf16 %v3441_v53, %v3438_v10 }
 0xf67   : > { %v4538_v41 = vpop.eup %4537 }
 0xf68   : > { %3985 = vmatprep.subr.bf16.mxu0 %v3984_v8  ;;  %v3445_v35 = vmul.f32 %v4538_v41, %v6345_v14  ;;  %v3444_v59 = vmul.f32 %v4538_v41, %v6343_v21  ;;  %v4544_v14 = vld [vmem:[%s5030_s6 + $0x18] sm:$0xff] }
 0xf69   : > { %3987 = vmatpush1.bf16.xpose.msra.mxu0 %v3986_v45 }
 0xf6b   : > { %v4540_v47 = vpop.eup %4539 }
 0xf6c   : > { %v3448_v49 = vmul.f32 %v4540_v47, %v6351_v17  ;;  %v3447_v43 = vmul.f32 %v4540_v47, %v6349_v46 }
 0xf6e   : > { %v3988_v39 = vpack.c.bf16 %v3448_v49, %v3445_v35  ;;  %v3990_v44 = vpack.c.bf16 %v3447_v43, %v3444_v59 }
 0xf70   : > { %3989 = vmatprep.subr.bf16.mxu0 %v3988_v39 }
 0xf71   : > { %3991 = vmatpush1.bf16.xpose.msra.mxu0 %v3990_v44 }
 0xf78   : > { %3514 = vmatmul.mubr.f32.vlgmr.msra.gmra.mrb[74].mxu0 %v2966_v33 }
0x104b   : > { %v3515_v21 = vpop.f32.mrb[74].mxu0 }
0x104c   : > { %v3522_v46 = vadd.f32 %v4544_v14, %v3515_v21  ;;  %v3517_v17 = vpop.f32.mrb[75].mxu0 }
0x104e   : > { %3526 = vst [vmem:[%s5045_s11 + $0x18] sm:$0xff] %v3522_v46 }
0x104f   : > { %4644 = shalt.err (!%p4641_p4)
}
0x1050   : > { %s4645_s6 = scalar_lea.hbm %s6393_s0, 512  ;;  %s4649_s29 = scalar_lea.hbm %s6516_s27, 2048 }
0x1051   : > { %p4646_p10 = scmp.ne.s32.totalorder %s6393_s0, %s4645_s6  ;;  %p4650_p2 = scmp.lt.u32.totalorder %s6393_s0, %s6516_s27 }
0x1052   : > { %p4651_p12 = scmp.lt.u32.totalorder %s4649_s29, %s4645_s6  ;;  %p4653_p3 = scmp.lt.u32.totalorder %s4645_s6, %s6393_s0 }
0x1053   : > { %p4647_p11 = pnand %p4646_p10, %p6517_p7 }
0x1054   : > { %p4652_p13 = por %p4651_p12, %p4650_p2 }
0x1055   : > { %p4648_p1 = pneg %p4647_p11 }
0x1056   : > { %p4654_p6 = por %p4653_p3, %p4652_p13 }
0x1058   : > { %p4655_p8 = pnand %p4654_p6, %p4648_p1 }
0x105a   : > { %4658 = shalt.err (!%p4655_p8)
}
0x105b   : > { %s4746_s21 = smov 128   ;;  %s4747_s20 = smov 256  }
0x105c   : > { %s4748_s5 = smov 8  }
0x105d   : > { %4006 = dma.vmem_to_hbm [thread:$0]  (%p6517_p7), %s6395_s30, 512, %s6393_s0, %s3528_s1, %s4746_s21, %s4747_s20, %s4748_s5  }
0x105e PF: > { %s6518_s24 = sld [smem:[#allocation15_spill]]  ;;  %s6519_s11 = sld [smem:[#allocation14_spill]] }
0x105f   : > { %s6520_s12 = sld [smem:[#allocation17_spill]] }
0x1064   : > { %p4028_p9 = scmp.ge.s32.totalorder %s6518_s24, 2  ;;  %s3557_s29 = sand.u32 1, %s6519_s11  }
0x1065   : > { %p6521_p5 = scmp.ne.s32.totalorder %s6520_s12, 0  ;;  %s3558_s6 = scalar_lea.sflag [#allocation6], %s3557_s29 }
0x1067   : > { %p4020_p0 = pnand %p4028_p9, %p6521_p5 }
0x1069   : > { %4700 = dma.done.wait (!%p4020_p0), %s3558_s6, 512  }
0x106a   : > { %4702 = vsyncadd (!%p4020_p0), %s3558_s6, 4294966784  ;;  %s28_s24 = sadd.s32 1, %s6518_s24   ;;  %s6522_s17 = smov %s4709_s18 }
0x106b   : > { %p25_p4 = scmp.ge.s32.totalorder %s28_s24, 6   ;;  %s6523_s18 = smov %s4713_s19 }
0x106c   : > { %s6524_s19 = smov %s5021_s8  ;;  %s6525_s20 = smov %s4725_s22 }
0x106d   : > { %s6526_s21 = smov %s4729_s23  ;;  %s6527_s22 = smov %s6530_s9 }
0x106e   : > { %s6528_s23 = smov %s6534_s10  ;;  %27 = sbr.rel (!%p25_p4) target bundleno = 17 (0x11), region = 124 }
0x1075   :  { %3563 = vsyncpa [#allocation5], 1 }
0x1076   :  { %3565 = vsyncpa [#allocation5 + $0x1], 1 }
0x1077   :  { %3566 = vsyncpa [#allocation8], 1 }
0x1078   :  { %3567 = vsyncpa [#allocation6], 1 }
0x1079   :  { %3569 = vsyncpa [#allocation6 + $0x1], 1 }

</bundles_post_ra>
